<compile_context>
chip_gen: v5e
topology: v5e:2x2
jax: 0.10.0
libtpu: 0.0.40
codegen_flags: <defaults>
</compile_context>

<pallas_src>
import jax
import jax.numpy as jnp
from jax import lax
from jax.experimental import pallas as pl
from jax.experimental.pallas import tpu as pltpu

_BN_EPS = 1e-5


# ---------------------------------------------------------------------------
# Stand-alone hard-sigmoid  (improved version of the previous kernel)
#   - lane-dense (512-wide, 128-multiple) tiles, 256 rows per block
#   - tiled grid => auto double-buffered DMA, "parallel" for megacore
#   - tiny inputs fall back to XLA-fused jnp (launch overhead dominates there)
# ---------------------------------------------------------------------------
_HS_ROWS = 256
_HS_LANES = 512
_HS_MIN_PALLAS = 64 * 1024


def _h_sigmoid_kernel(x_ref, o_ref):
    x = x_ref[...]
    o_ref[...] = (jnp.clip(x + 3.0, 0.0, 6.0) * (1.0 / 6.0)).astype(o_ref.dtype)


def hard_sigmoid(x):
    """ReLU6(x + 3) / 6 elementwise (PyTorch h_sigmoid), any shape/dtype."""
    n = x.size
    if n < _HS_MIN_PALLAS:
        return jnp.clip(x + 3.0, 0.0, 6.0) * (1.0 / 6.0)

    flat = x.reshape(-1)
    tile = _HS_ROWS * _HS_LANES
    pad = (-n) % tile
    if pad:
        flat = jnp.pad(flat, (0, pad))
    x2d = flat.reshape(-1, _HS_LANES)
    rows = x2d.shape[0]
    out2d = pl.pallas_call(
        _h_sigmoid_kernel,
        out_shape=jax.ShapeDtypeStruct((rows, _HS_LANES), x.dtype),
        grid=(rows // _HS_ROWS,),
        in_specs=[pl.BlockSpec((_HS_ROWS, _HS_LANES), lambda i: (i, 0))],
        out_specs=pl.BlockSpec((_HS_ROWS, _HS_LANES), lambda i: (i, 0)),
        compiler_params=pltpu.CompilerParams(dimension_semantics=("parallel",)),
    )(x2d)
    return out2d.reshape(-1)[:n].reshape(x.shape)


# ---------------------------------------------------------------------------
# Fused block:  depthwise 3x3 (no bias) -> 1x1 conv (+ folded BN) -> ReLU
# Optionally also emits CoordAtt pools (mean over W and over H) in the epilogue.
# ---------------------------------------------------------------------------
def _dw_pw_relu(xp_ref, wd_ref, wp_ref, bp_ref, out_shape):
    H, W, C = out_shape
    xp = xp_ref[...].astype(jnp.float32)          # (H+2, W+2, C)  padded input
    wd = wd_ref[...].astype(jnp.float32)          # (9, C)         depthwise taps
    acc = jnp.zeros((H, W, C), jnp.float32)
    for dy in range(3):                           # 9 shifted multiply-adds (VPU)
        for dx in range(3):
            k = 3 * dy + dx
            tap = wd[k:k + 1, :].reshape(1, 1, C)
            acc = acc + xp[dy:dy + H, dx:dx + W, :] * tap
    # pointwise 1x1 conv (MXU) with BatchNorm folded into weight/bias
    z = jnp.dot(acc.reshape(H * W, C), wp_ref[...].astype(jnp.float32),
                preferred_element_type=jnp.float32)
    z = z + bp_ref[...].astype(jnp.float32)       # (H*W, C) + (1, C)
    z = jnp.maximum(z, 0.0)                       # fused ReLU epilogue
    return z.reshape(H, W, C)


def _conv_block_kernel(xp_ref, wd_ref, wp_ref, bp_ref, o_ref):
    y = _dw_pw_relu(xp_ref, wd_ref, wp_ref, bp_ref, o_ref.shape)
    o_ref[...] = y.astype(o_ref.dtype)


def _conv_block_pool_kernel(xp_ref, wd_ref, wp_ref, bp_ref, o_ref, ph_ref, pw_ref):
    y = _dw_pw_relu(xp_ref, wd_ref, wp_ref, bp_ref, o_ref.shape)
    o_ref[...] = y.astype(o_ref.dtype)
    # CoordAtt pooling fused into the producer epilogue: saves one full HBM read.
    ph_ref[...] = jnp.mean(y, axis=1).astype(ph_ref.dtype)   # mean over W -> (H, C)
    pw_ref[...] = jnp.mean(y, axis=0).astype(pw_ref.dtype)   # mean over H -> (W, C)


def conv_block(x, dw_w, pw_w, pw_b, gamma, beta, mean, var, *, with_pools):
    """x: (N, H, W, C). Fused depthwise3x3 -> 1x1 conv -> BN(eval) -> ReLU."""
    N, H, W, C = x.shape
    # Fold inference BatchNorm into the pointwise conv.
    s = gamma / jnp.sqrt(var + _BN_EPS)                       # (C,)
    wp = (pw_w * s[None, :]).astype(jnp.float32)              # (Cin, Cout)
    bp = (pw_b * s + beta - mean * s).reshape(1, C).astype(jnp.float32)
    wd = dw_w.reshape(9, C).astype(jnp.float32)
    xp = jnp.pad(x, ((0, 0), (1, 1), (1, 1), (0, 0)))         # SAME padding

    # TODO(synk): for large spatial sizes add an H-tile grid axis (with 1-row halo)
    # to bound the per-block VMEM footprint (v7x has only 64 MiB VMEM).
    x_spec = pl.BlockSpec((None, H + 2, W + 2, C), lambda n: (n, 0, 0, 0))
    wd_spec = pl.BlockSpec((9, C), lambda n: (0, 0))
    wp_spec = pl.BlockSpec((C, C), lambda n: (0, 0))
    bp_spec = pl.BlockSpec((1, C), lambda n: (0, 0))
    o_spec = pl.BlockSpec((None, H, W, C), lambda n: (n, 0, 0, 0))
    cparams = pltpu.CompilerParams(dimension_semantics=("parallel",))

    if not with_pools:
        return pl.pallas_call(
            _conv_block_kernel,
            out_shape=jax.ShapeDtypeStruct((N, H, W, C), x.dtype),
            grid=(N,),
            in_specs=[x_spec, wd_spec, wp_spec, bp_spec],
            out_specs=o_spec,
            compiler_params=cparams,
        )(xp, wd, wp, bp)

    ph_spec = pl.BlockSpec((None, H, C), lambda n: (n, 0, 0))
    pw_spec = pl.BlockSpec((None, W, C), lambda n: (n, 0, 0))
    return pl.pallas_call(
        _conv_block_pool_kernel,
        out_shape=(jax.ShapeDtypeStruct((N, H, W, C), x.dtype),
                   jax.ShapeDtypeStruct((N, H, C), x.dtype),
                   jax.ShapeDtypeStruct((N, W, C), x.dtype)),
        grid=(N,),
        in_specs=[x_spec, wd_spec, wp_spec, bp_spec],
        out_specs=(o_spec, ph_spec, pw_spec),
        compiler_params=cparams,
    )(xp, wd, wp, bp)


# ---------------------------------------------------------------------------
# CoordAtt final re-weighting:  out[n,h,w,c] = x[n,h,w,c] * a_h[n,h,c] * a_w[n,w,c]
# ---------------------------------------------------------------------------
def _coordatt_combine_kernel(x_ref, ah_ref, aw_ref, o_ref):
    x = x_ref[...]              # (H, W, C)
    ah = ah_ref[...]            # (H, C)
    aw = aw_ref[...]            # (W, C)
    o_ref[...] = (x * ah[:, None, :] * aw[None, :, :]).astype(o_ref.dtype)


def coordatt_combine(x, a_h, a_w):
    N, H, W, C = x.shape
    return pl.pallas_call(
        _coordatt_combine_kernel,
        out_shape=jax.ShapeDtypeStruct((N, H, W, C), x.dtype),
        grid=(N,),
        in_specs=[pl.BlockSpec((None, H, W, C), lambda n: (n, 0, 0, 0)),
                  pl.BlockSpec((None, H, C), lambda n: (n, 0, 0)),
                  pl.BlockSpec((None, W, C), lambda n: (n, 0, 0))],
        out_specs=pl.BlockSpec((None, H, W, C), lambda n: (n, 0, 0, 0)),
        compiler_params=pltpu.CompilerParams(dimension_semantics=("parallel",)),
    )(x, a_h, a_w)


# ---------------------------------------------------------------------------
# Full Conv(dim) forward
# ---------------------------------------------------------------------------
def conv_forward(x_nhwc, p):
    """x_nhwc: (N, H, W, C) -> (N, W, H, C), matching Conv.forward."""
    x1 = conv_block(x_nhwc, p["dw0"], p["pw0"], p["pb0"],
                    p["g0"], p["be0"], p["m0"], p["v0"], with_pools=False)
    x1, ph, pw_ = conv_block(x1, p["dw2"], p["pw2"], p["pb2"],
                             p["g2"], p["be2"], p["m2"], p["v2"], with_pools=True)
    N, H, W, C = x1.shape

    # CoordAtt squeeze path: tiny tensors (N*(H+W)*mip) -> plain jnp (per review).
    y = jnp.concatenate([ph, pw_], axis=1)                              # (N, H+W, C)
    y = jnp.einsum("nlc,cm->nlm", y, p["w1"],
                   precision=lax.Precision.HIGHEST) + p["b1"]           # conv1 (1x1)
    y = (y - p["m1"]) / jnp.sqrt(p["v1"] + _BN_EPS) * p["g1"] + p["be1"]  # bn1
    y = y * hard_sigmoid(y)                                             # h_swish
    th, tw = y[:, :H, :], y[:, H:, :]
    a_h = jax.nn.sigmoid(jnp.einsum("nhm,mc->nhc", th, p["wh"],
                                    precision=lax.Precision.HIGHEST) + p["bh"])
    a_w = jax.nn.sigmoid(jnp.einsum("nwm,mc->nwc", tw, p["ww"],
                                    precision=lax.Precision.HIGHEST) + p["bw"])

    out = coordatt_combine(x1, a_h, a_w)                                # (N, H, W, C)
    # out1.permute(0, 3, 2, 1) on NCHW  ==  (N, W, H, C) in our NHWC layout.
    return jnp.transpose(out, (0, 2, 1, 3))


# ---------------------------------------------------------------------------
# Pure-JAX reference (lax.conv / einsum based) for correctness checking
# ---------------------------------------------------------------------------
def _ref_conv_block(x, dw_w, pw_w, pw_b, gamma, beta, mean, var):
    N, H, W, C = x.shape
    dw = lax.conv_general_dilated(
        x, dw_w.reshape(3, 3, 1, C),
        window_strides=(1, 1), padding=((1, 1), (1, 1)),
        feature_group_count=C,
        dimension_numbers=("NHWC", "HWIO", "NHWC"),
        precision=lax.Precision.HIGHEST)
    z = jnp.einsum("nhwc,cd->nhwd", dw, pw_w,
                   precision=lax.Precision.HIGHEST) + pw_b
    z = (z - mean) / jnp.sqrt(var + _BN_EPS) * gamma + beta
    return jnp.maximum(z, 0.0)


def conv_forward_reference(x_nhwc, p):
    x1 = _ref_conv_block(x_nhwc, p["dw0"], p["pw0"], p["pb0"],
                         p["g0"], p["be0"], p["m0"], p["v0"])
    x1 = _ref_conv_block(x1, p["dw2"], p["pw2"], p["pb2"],
                         p["g2"], p["be2"], p["m2"], p["v2"])
    N, H, W, C = x1.shape
    ph = jnp.mean(x1, axis=2)     # (N, H, C)
    pw_ = jnp.mean(x1, axis=1)    # (N, W, C)
    y = jnp.concatenate([ph, pw_], axis=1)
    y = jnp.einsum("nlc,cm->nlm", y, p["w1"],
                   precision=lax.Precision.HIGHEST) + p["b1"]
    y = (y - p["m1"]) / jnp.sqrt(p["v1"] + _BN_EPS) * p["g1"] + p["be1"]
    y = y * (jnp.clip(y + 3.0, 0.0, 6.0) / 6.0)
    th, tw = y[:, :H, :], y[:, H:, :]
    a_h = jax.nn.sigmoid(jnp.einsum("nhm,mc->nhc", th, p["wh"],
                                    precision=lax.Precision.HIGHEST) + p["bh"])
    a_w = jax.nn.sigmoid(jnp.einsum("nwm,mc->nwc", tw, p["ww"],
                                    precision=lax.Precision.HIGHEST) + p["bw"])
    out = x1 * a_h[:, :, None, :] * a_w[:, None, :, :]
    return jnp.transpose(out, (0, 2, 1, 3))


def init_params(key, dim):
    mip = max(8, dim // 32)
    keys = iter(jax.random.split(key, 24))

    def nrm(shape, scale):
        return jax.random.normal(next(keys), shape, jnp.float32) * scale

    def uni(shape, lo=0.5, hi=1.5):
        return jax.random.uniform(next(keys), shape, jnp.float32, lo, hi)

    p = {}
    for tag in ("0", "2"):
        p["dw" + tag] = nrm((3, 3, dim), 0.3)                    # depthwise (kH,kW,C)
        p["pw" + tag] = nrm((dim, dim), 1.0 / float(dim) ** 0.5)  # 1x1 (Cin,Cout)
        p["pb" + tag] = nrm((dim,), 0.1)
        p["g" + tag] = uni((dim,))
        p["be" + tag] = nrm((dim,), 0.1)
        p["m" + tag] = nrm((dim,), 0.1)
        p["v" + tag] = uni((dim,))
    p["w1"] = nrm((dim, mip), 1.0 / float(dim) ** 0.5)
    p["b1"] = nrm((mip,), 0.1)
    p["g1"] = uni((mip,))
    p["be1"] = nrm((mip,), 0.1)
    p["m1"] = nrm((mip,), 0.1)
    p["v1"] = uni((mip,))
    p["wh"] = nrm((mip, dim), 1.0 / float(mip) ** 0.5)
    p["bh"] = nrm((dim,), 0.1)
    p["ww"] = nrm((mip, dim), 1.0 / float(mip) ** 0.5)
    p["bw"] = nrm((dim,), 0.1)
    return p


if __name__ == "__main__":
    key = jax.random.PRNGKey(0)
    kx, kp, kh = jax.random.split(key, 3)

    N, H, W, dim = 2, 16, 16, 32
    x = jax.random.normal(kx, (N, H, W, dim), jnp.float32)
    params = init_params(kp, dim)

    fwd = jax.jit(conv_forward)
    y = jax.block_until_ready(fwd(x, params))
    ref = jax.block_until_ready(conv_forward_reference(x, params))

    assert y.shape == (N, W, H, dim) and y.dtype == x.dtype
    err = float(jnp.max(jnp.abs(y - ref)))
    assert err < 5e-2, f"Conv forward mismatch: max abs err = {err}"

    # Exercise the improved tiled stand-alone h_sigmoid kernel on a large input.
    big = jax.random.normal(kh, (512, 1024), jnp.float32) * 4.0
    hs = jax.block_until_ready(hard_sigmoid(big))
    hs_ref = jnp.clip(big + 3.0, 0.0, 6.0) / 6.0
    assert float(jnp.max(jnp.abs(hs - hs_ref))) < 1e-6

    print("KERNEL_OK")
</pallas_src>

<mosaic_0001>
module attributes {stable_mosaic.version = 11 : i64} {
  func.func @_conv_block_kernel(%arg0: i32, %arg1: memref<1x18x18x32xf32, #tpu.memory_space<vmem>>, %arg2: memref<9x32xf32, #tpu.memory_space<vmem>>, %arg3: memref<32x32xf32, #tpu.memory_space<vmem>>, %arg4: memref<1x32xf32, #tpu.memory_space<vmem>>, %arg5: memref<1x16x16x32xf32, #tpu.memory_space<vmem>>) attributes {dimension_semantics = [#tpu.dimension_semantics<parallel>], iteration_bounds = array<i64: 2>, scalar_prefetch = 0 : i64, scratch_operands = 0 : i64, tpu.core_type = #tpu.core_type<tc>, window_params = [{transform_indices = @transform_0, window_bounds = array<i64: 1, 18, 18, 32>}, {pipeline_mode = #tpu.pipeline_mode<synchronous>, transform_indices = @transform_1, window_bounds = array<i64: 9, 32>}, {pipeline_mode = #tpu.pipeline_mode<synchronous>, transform_indices = @transform_2, window_bounds = array<i64: 32, 32>}, {pipeline_mode = #tpu.pipeline_mode<synchronous>, transform_indices = @transform_3, window_bounds = array<i64: 1, 32>}, {transform_indices = @transform_4, window_bounds = array<i64: 1, 16, 16, 32>}]} {
    %c0 = arith.constant 0 : index
    %c0_0 = arith.constant 0 : index
    %c0_1 = arith.constant 0 : index
    %c0_2 = arith.constant 0 : index
    %0 = vector.load %arg1[%c0, %c0_0, %c0_1, %c0_2] : memref<1x18x18x32xf32, #tpu.memory_space<vmem>>, vector<1x18x18x32xf32>
    %1 = vector.shape_cast %0 : vector<1x18x18x32xf32> to vector<18x18x32xf32>
    %c0_3 = arith.constant 0 : index
    %c0_4 = arith.constant 0 : index
    %2 = vector.load %arg2[%c0_3, %c0_4] : memref<9x32xf32, #tpu.memory_space<vmem>>, vector<9x32xf32>
    %cst = arith.constant 0.000000e+00 : f32
    %3 = vector.broadcast %cst : f32 to vector<16x16x32xf32>
    %4 = vector.extract_strided_slice %2 {offsets = [0, 0], sizes = [1, 32], strides = [1, 1]} : vector<9x32xf32> to vector<1x32xf32>
    %5 = vector.shape_cast %4 : vector<1x32xf32> to vector<1x1x32xf32>
    %6 = vector.extract_strided_slice %1 {offsets = [0, 0, 0], sizes = [16, 16, 32], strides = [1, 1, 1]} : vector<18x18x32xf32> to vector<16x16x32xf32>
    %7 = vector.broadcast %5 : vector<1x1x32xf32> to vector<16x16x32xf32>
    %8 = arith.mulf %6, %7 : vector<16x16x32xf32>
    %9 = arith.addf %3, %8 : vector<16x16x32xf32>
    %10 = vector.extract_strided_slice %2 {offsets = [1, 0], sizes = [1, 32], strides = [1, 1]} : vector<9x32xf32> to vector<1x32xf32>
    %11 = vector.shape_cast %10 : vector<1x32xf32> to vector<1x1x32xf32>
    %12 = vector.extract_strided_slice %1 {offsets = [0, 1, 0], sizes = [16, 16, 32], strides = [1, 1, 1]} : vector<18x18x32xf32> to vector<16x16x32xf32>
    %13 = vector.broadcast %11 : vector<1x1x32xf32> to vector<16x16x32xf32>
    %14 = arith.mulf %12, %13 : vector<16x16x32xf32>
    %15 = arith.addf %9, %14 : vector<16x16x32xf32>
    %16 = vector.extract_strided_slice %2 {offsets = [2, 0], sizes = [1, 32], strides = [1, 1]} : vector<9x32xf32> to vector<1x32xf32>
    %17 = vector.shape_cast %16 : vector<1x32xf32> to vector<1x1x32xf32>
    %18 = vector.extract_strided_slice %1 {offsets = [0, 2, 0], sizes = [16, 16, 32], strides = [1, 1, 1]} : vector<18x18x32xf32> to vector<16x16x32xf32>
    %19 = vector.broadcast %17 : vector<1x1x32xf32> to vector<16x16x32xf32>
    %20 = arith.mulf %18, %19 : vector<16x16x32xf32>
    %21 = arith.addf %15, %20 : vector<16x16x32xf32>
    %22 = vector.extract_strided_slice %2 {offsets = [3, 0], sizes = [1, 32], strides = [1, 1]} : vector<9x32xf32> to vector<1x32xf32>
    %23 = vector.shape_cast %22 : vector<1x32xf32> to vector<1x1x32xf32>
    %24 = vector.extract_strided_slice %1 {offsets = [1, 0, 0], sizes = [16, 16, 32], strides = [1, 1, 1]} : vector<18x18x32xf32> to vector<16x16x32xf32>
    %25 = vector.broadcast %23 : vector<1x1x32xf32> to vector<16x16x32xf32>
    %26 = arith.mulf %24, %25 : vector<16x16x32xf32>
    %27 = arith.addf %21, %26 : vector<16x16x32xf32>
    %28 = vector.extract_strided_slice %2 {offsets = [4, 0], sizes = [1, 32], strides = [1, 1]} : vector<9x32xf32> to vector<1x32xf32>
    %29 = vector.shape_cast %28 : vector<1x32xf32> to vector<1x1x32xf32>
    %30 = vector.extract_strided_slice %1 {offsets = [1, 1, 0], sizes = [16, 16, 32], strides = [1, 1, 1]} : vector<18x18x32xf32> to vector<16x16x32xf32>
    %31 = vector.broadcast %29 : vector<1x1x32xf32> to vector<16x16x32xf32>
    %32 = arith.mulf %30, %31 : vector<16x16x32xf32>
    %33 = arith.addf %27, %32 : vector<16x16x32xf32>
    %34 = vector.extract_strided_slice %2 {offsets = [5, 0], sizes = [1, 32], strides = [1, 1]} : vector<9x32xf32> to vector<1x32xf32>
    %35 = vector.shape_cast %34 : vector<1x32xf32> to vector<1x1x32xf32>
    %36 = vector.extract_strided_slice %1 {offsets = [1, 2, 0], sizes = [16, 16, 32], strides = [1, 1, 1]} : vector<18x18x32xf32> to vector<16x16x32xf32>
    %37 = vector.broadcast %35 : vector<1x1x32xf32> to vector<16x16x32xf32>
    %38 = arith.mulf %36, %37 : vector<16x16x32xf32>
    %39 = arith.addf %33, %38 : vector<16x16x32xf32>
    %40 = vector.extract_strided_slice %2 {offsets = [6, 0], sizes = [1, 32], strides = [1, 1]} : vector<9x32xf32> to vector<1x32xf32>
    %41 = vector.shape_cast %40 : vector<1x32xf32> to vector<1x1x32xf32>
    %42 = vector.extract_strided_slice %1 {offsets = [2, 0, 0], sizes = [16, 16, 32], strides = [1, 1, 1]} : vector<18x18x32xf32> to vector<16x16x32xf32>
    %43 = vector.broadcast %41 : vector<1x1x32xf32> to vector<16x16x32xf32>
    %44 = arith.mulf %42, %43 : vector<16x16x32xf32>
    %45 = arith.addf %39, %44 : vector<16x16x32xf32>
    %46 = vector.extract_strided_slice %2 {offsets = [7, 0], sizes = [1, 32], strides = [1, 1]} : vector<9x32xf32> to vector<1x32xf32>
    %47 = vector.shape_cast %46 : vector<1x32xf32> to vector<1x1x32xf32>
    %48 = vector.extract_strided_slice %1 {offsets = [2, 1, 0], sizes = [16, 16, 32], strides = [1, 1, 1]} : vector<18x18x32xf32> to vector<16x16x32xf32>
    %49 = vector.broadcast %47 : vector<1x1x32xf32> to vector<16x16x32xf32>
    %50 = arith.mulf %48, %49 : vector<16x16x32xf32>
    %51 = arith.addf %45, %50 : vector<16x16x32xf32>
    %52 = vector.extract_strided_slice %2 {offsets = [8, 0], sizes = [1, 32], strides = [1, 1]} : vector<9x32xf32> to vector<1x32xf32>
    %53 = vector.shape_cast %52 : vector<1x32xf32> to vector<1x1x32xf32>
    %54 = vector.extract_strided_slice %1 {offsets = [2, 2, 0], sizes = [16, 16, 32], strides = [1, 1, 1]} : vector<18x18x32xf32> to vector<16x16x32xf32>
    %55 = vector.broadcast %53 : vector<1x1x32xf32> to vector<16x16x32xf32>
    %56 = arith.mulf %54, %55 : vector<16x16x32xf32>
    %57 = arith.addf %51, %56 : vector<16x16x32xf32>
    %58 = vector.shape_cast %57 : vector<16x16x32xf32> to vector<256x32xf32>
    %c0_5 = arith.constant 0 : index
    %c0_6 = arith.constant 0 : index
    %59 = vector.load %arg3[%c0_5, %c0_6] : memref<32x32xf32, #tpu.memory_space<vmem>>, vector<32x32xf32>
    %cst_7 = arith.constant dense<0.000000e+00> : vector<256x32xf32>
    %60 = tpu.matmul %58, %59, %cst_7 {dimension_numbers = #tpu.dot_dimension_numbers<[1], [0], [0], [1], [0, 0, 1, 1], [], []>} : vector<256x32xf32>, vector<32x32xf32>, vector<256x32xf32> -> vector<256x32xf32>
    %c0_8 = arith.constant 0 : index
    %c0_9 = arith.constant 0 : index
    %61 = vector.load %arg4[%c0_8, %c0_9] : memref<1x32xf32, #tpu.memory_space<vmem>>, vector<1x32xf32>
    %62 = vector.broadcast %61 : vector<1x32xf32> to vector<256x32xf32>
    %63 = arith.addf %60, %62 : vector<256x32xf32>
    %cst_10 = arith.constant 0.000000e+00 : f32
    %64 = vector.broadcast %cst_10 : f32 to vector<256x32xf32>
    %65 = arith.maximumf %63, %64 : vector<256x32xf32>
    %66 = vector.shape_cast %65 : vector<256x32xf32> to vector<16x16x32xf32>
    %c0_11 = arith.constant 0 : index
    %c0_12 = arith.constant 0 : index
    %c0_13 = arith.constant 0 : index
    %c0_14 = arith.constant 0 : index
    %67 = vector.load %arg5[%c0_11, %c0_12, %c0_13, %c0_14] : memref<1x16x16x32xf32, #tpu.memory_space<vmem>>, vector<1x16x16x32xf32>
    %68 = vector.shape_cast %67 : vector<1x16x16x32xf32> to vector<16x16x32xf32>
    %69 = vector.shape_cast %66 : vector<16x16x32xf32> to vector<1x16x16x32xf32>
    tpu.vector_store %arg5[%c0_11, %c0_12, %c0_13, %c0_14], %69 {strides = array<i32>} : memref<1x16x16x32xf32, #tpu.memory_space<vmem>>, vector<1x16x16x32xf32>,
    return
  }
  func.func @transform_0(%arg0: i32) -> (i32, i32, i32, i32) {
    %c0_i32 = arith.constant 0 : i32
    %c0_i32_0 = arith.constant 0 : i32
    %c0_i32_1 = arith.constant 0 : i32
    %c0_i32_2 = arith.constant 0 : i32
    return %arg0, %c0_i32, %c0_i32_0, %c0_i32_1 : i32, i32, i32, i32
  }
  func.func @transform_1(%arg0: i32) -> (i32, i32) {
    %c0_i32 = arith.constant 0 : i32
    %c0_i32_0 = arith.constant 0 : i32
    %c0_i32_1 = arith.constant 0 : i32
    return %c0_i32, %c0_i32_0 : i32, i32
  }
  func.func @transform_2(%arg0: i32) -> (i32, i32) {
    %c0_i32 = arith.constant 0 : i32
    %c0_i32_0 = arith.constant 0 : i32
    %c0_i32_1 = arith.constant 0 : i32
    return %c0_i32, %c0_i32_0 : i32, i32
  }
  func.func @transform_3(%arg0: i32) -> (i32, i32) {
    %c0_i32 = arith.constant 0 : i32
    %c0_i32_0 = arith.constant 0 : i32
    %c0_i32_1 = arith.constant 0 : i32
    return %c0_i32, %c0_i32_0 : i32, i32
  }
  func.func @transform_4(%arg0: i32) -> (i32, i32, i32, i32) {
    %c0_i32 = arith.constant 0 : i32
    %c0_i32_0 = arith.constant 0 : i32
    %c0_i32_1 = arith.constant 0 : i32
    %c0_i32_2 = arith.constant 0 : i32
    return %arg0, %c0_i32, %c0_i32_0, %c0_i32_1 : i32, i32, i32, i32
  }
}

module attributes {stable_mosaic.version = 11 : i64} {
  func.func @_conv_block_pool_kernel(%arg0: i32, %arg1: memref<1x18x18x32xf32, #tpu.memory_space<vmem>>, %arg2: memref<9x32xf32, #tpu.memory_space<vmem>>, %arg3: memref<32x32xf32, #tpu.memory_space<vmem>>, %arg4: memref<1x32xf32, #tpu.memory_space<vmem>>, %arg5: memref<1x16x16x32xf32, #tpu.memory_space<vmem>>, %arg6: memref<1x16x32xf32, #tpu.memory_space<vmem>>, %arg7: memref<1x16x32xf32, #tpu.memory_space<vmem>>) attributes {dimension_semantics = [#tpu.dimension_semantics<parallel>], iteration_bounds = array<i64: 2>, scalar_prefetch = 0 : i64, scratch_operands = 0 : i64, tpu.core_type = #tpu.core_type<tc>, window_params = [{transform_indices = @transform_0, window_bounds = array<i64: 1, 18, 18, 32>}, {pipeline_mode = #tpu.pipeline_mode<synchronous>, transform_indices = @transform_1, window_bounds = array<i64: 9, 32>}, {pipeline_mode = #tpu.pipeline_mode<synchronous>, transform_indices = @transform_2, window_bounds = array<i64: 32, 32>}, {pipeline_mode = #tpu.pipeline_mode<synchronous>, transform_indices = @transform_3, window_bounds = array<i64: 1, 32>}, {transform_indices = @transform_4, window_bounds = array<i64: 1, 16, 16, 32>}, {transform_indices = @transform_5, window_bounds = array<i64: 1, 16, 32>}, {transform_indices = @transform_6, window_bounds = array<i64: 1, 16, 32>}]} {
    %c0 = arith.constant 0 : index
    %c0_0 = arith.constant 0 : index
    %c0_1 = arith.constant 0 : index
    %c0_2 = arith.constant 0 : index
    %0 = vector.load %arg1[%c0, %c0_0, %c0_1, %c0_2] : memref<1x18x18x32xf32, #tpu.memory_space<vmem>>, vector<1x18x18x32xf32>
    %1 = vector.shape_cast %0 : vector<1x18x18x32xf32> to vector<18x18x32xf32>
    %c0_3 = arith.constant 0 : index
    %c0_4 = arith.constant 0 : index
    %2 = vector.load %arg2[%c0_3, %c0_4] : memref<9x32xf32, #tpu.memory_space<vmem>>, vector<9x32xf32>
    %cst = arith.constant 0.000000e+00 : f32
    %3 = vector.broadcast %cst : f32 to vector<16x16x32xf32>
    %4 = vector.extract_strided_slice %2 {offsets = [0, 0], sizes = [1, 32], strides = [1, 1]} : vector<9x32xf32> to vector<1x32xf32>
    %5 = vector.shape_cast %4 : vector<1x32xf32> to vector<1x1x32xf32>
    %6 = vector.extract_strided_slice %1 {offsets = [0, 0, 0], sizes = [16, 16, 32], strides = [1, 1, 1]} : vector<18x18x32xf32> to vector<16x16x32xf32>
    %7 = vector.broadcast %5 : vector<1x1x32xf32> to vector<16x16x32xf32>
    %8 = arith.mulf %6, %7 : vector<16x16x32xf32>
    %9 = arith.addf %3, %8 : vector<16x16x32xf32>
    %10 = vector.extract_strided_slice %2 {offsets = [1, 0], sizes = [1, 32], strides = [1, 1]} : vector<9x32xf32> to vector<1x32xf32>
    %11 = vector.shape_cast %10 : vector<1x32xf32> to vector<1x1x32xf32>
    %12 = vector.extract_strided_slice %1 {offsets = [0, 1, 0], sizes = [16, 16, 32], strides = [1, 1, 1]} : vector<18x18x32xf32> to vector<16x16x32xf32>
    %13 = vector.broadcast %11 : vector<1x1x32xf32> to vector<16x16x32xf32>
    %14 = arith.mulf %12, %13 : vector<16x16x32xf32>
    %15 = arith.addf %9, %14 : vector<16x16x32xf32>
    %16 = vector.extract_strided_slice %2 {offsets = [2, 0], sizes = [1, 32], strides = [1, 1]} : vector<9x32xf32> to vector<1x32xf32>
    %17 = vector.shape_cast %16 : vector<1x32xf32> to vector<1x1x32xf32>
    %18 = vector.extract_strided_slice %1 {offsets = [0, 2, 0], sizes = [16, 16, 32], strides = [1, 1, 1]} : vector<18x18x32xf32> to vector<16x16x32xf32>
    %19 = vector.broadcast %17 : vector<1x1x32xf32> to vector<16x16x32xf32>
    %20 = arith.mulf %18, %19 : vector<16x16x32xf32>
    %21 = arith.addf %15, %20 : vector<16x16x32xf32>
    %22 = vector.extract_strided_slice %2 {offsets = [3, 0], sizes = [1, 32], strides = [1, 1]} : vector<9x32xf32> to vector<1x32xf32>
    %23 = vector.shape_cast %22 : vector<1x32xf32> to vector<1x1x32xf32>
    %24 = vector.extract_strided_slice %1 {offsets = [1, 0, 0], sizes = [16, 16, 32], strides = [1, 1, 1]} : vector<18x18x32xf32> to vector<16x16x32xf32>
    %25 = vector.broadcast %23 : vector<1x1x32xf32> to vector<16x16x32xf32>
    %26 = arith.mulf %24, %25 : vector<16x16x32xf32>
    %27 = arith.addf %21, %26 : vector<16x16x32xf32>
    %28 = vector.extract_strided_slice %2 {offsets = [4, 0], sizes = [1, 32], strides = [1, 1]} : vector<9x32xf32> to vector<1x32xf32>
    %29 = vector.shape_cast %28 : vector<1x32xf32> to vector<1x1x32xf32>
    %30 = vector.extract_strided_slice %1 {offsets = [1, 1, 0], sizes = [16, 16, 32], strides = [1, 1, 1]} : vector<18x18x32xf32> to vector<16x16x32xf32>
    %31 = vector.broadcast %29 : vector<1x1x32xf32> to vector<16x16x32xf32>
    %32 = arith.mulf %30, %31 : vector<16x16x32xf32>
    %33 = arith.addf %27, %32 : vector<16x16x32xf32>
    %34 = vector.extract_strided_slice %2 {offsets = [5, 0], sizes = [1, 32], strides = [1, 1]} : vector<9x32xf32> to vector<1x32xf32>
    %35 = vector.shape_cast %34 : vector<1x32xf32> to vector<1x1x32xf32>
    %36 = vector.extract_strided_slice %1 {offsets = [1, 2, 0], sizes = [16, 16, 32], strides = [1, 1, 1]} : vector<18x18x32xf32> to vector<16x16x32xf32>
    %37 = vector.broadcast %35 : vector<1x1x32xf32> to vector<16x16x32xf32>
    %38 = arith.mulf %36, %37 : vector<16x16x32xf32>
    %39 = arith.addf %33, %38 : vector<16x16x32xf32>
    %40 = vector.extract_strided_slice %2 {offsets = [6, 0], sizes = [1, 32], strides = [1, 1]} : vector<9x32xf32> to vector<1x32xf32>
    %41 = vector.shape_cast %40 : vector<1x32xf32> to vector<1x1x32xf32>
    %42 = vector.extract_strided_slice %1 {offsets = [2, 0, 0], sizes = [16, 16, 32], strides = [1, 1, 1]} : vector<18x18x32xf32> to vector<16x16x32xf32>
    %43 = vector.broadcast %41 : vector<1x1x32xf32> to vector<16x16x32xf32>
    %44 = arith.mulf %42, %43 : vector<16x16x32xf32>
    %45 = arith.addf %39, %44 : vector<16x16x32xf32>
    %46 = vector.extract_strided_slice %2 {offsets = [7, 0], sizes = [1, 32], strides = [1, 1]} : vector<9x32xf32> to vector<1x32xf32>
    %47 = vector.shape_cast %46 : vector<1x32xf32> to vector<1x1x32xf32>
    %48 = vector.extract_strided_slice %1 {offsets = [2, 1, 0], sizes = [16, 16, 32], strides = [1, 1, 1]} : vector<18x18x32xf32> to vector<16x16x32xf32>
    %49 = vector.broadcast %47 : vector<1x1x32xf32> to vector<16x16x32xf32>
    %50 = arith.mulf %48, %49 : vector<16x16x32xf32>
    %51 = arith.addf %45, %50 : vector<16x16x32xf32>
    %52 = vector.extract_strided_slice %2 {offsets = [8, 0], sizes = [1, 32], strides = [1, 1]} : vector<9x32xf32> to vector<1x32xf32>
    %53 = vector.shape_cast %52 : vector<1x32xf32> to vector<1x1x32xf32>
    %54 = vector.extract_strided_slice %1 {offsets = [2, 2, 0], sizes = [16, 16, 32], strides = [1, 1, 1]} : vector<18x18x32xf32> to vector<16x16x32xf32>
    %55 = vector.broadcast %53 : vector<1x1x32xf32> to vector<16x16x32xf32>
    %56 = arith.mulf %54, %55 : vector<16x16x32xf32>
    %57 = arith.addf %51, %56 : vector<16x16x32xf32>
    %58 = vector.shape_cast %57 : vector<16x16x32xf32> to vector<256x32xf32>
    %c0_5 = arith.constant 0 : index
    %c0_6 = arith.constant 0 : index
    %59 = vector.load %arg3[%c0_5, %c0_6] : memref<32x32xf32, #tpu.memory_space<vmem>>, vector<32x32xf32>
    %cst_7 = arith.constant dense<0.000000e+00> : vector<256x32xf32>
    %60 = tpu.matmul %58, %59, %cst_7 {dimension_numbers = #tpu.dot_dimension_numbers<[1], [0], [0], [1], [0, 0, 1, 1], [], []>} : vector<256x32xf32>, vector<32x32xf32>, vector<256x32xf32> -> vector<256x32xf32>
    %c0_8 = arith.constant 0 : index
    %c0_9 = arith.constant 0 : index
    %61 = vector.load %arg4[%c0_8, %c0_9] : memref<1x32xf32, #tpu.memory_space<vmem>>, vector<1x32xf32>
    %62 = vector.broadcast %61 : vector<1x32xf32> to vector<256x32xf32>
    %63 = arith.addf %60, %62 : vector<256x32xf32>
    %cst_10 = arith.constant 0.000000e+00 : f32
    %64 = vector.broadcast %cst_10 : f32 to vector<256x32xf32>
    %65 = arith.maximumf %63, %64 : vector<256x32xf32>
    %66 = vector.shape_cast %65 : vector<256x32xf32> to vector<16x16x32xf32>
    %c0_11 = arith.constant 0 : index
    %c0_12 = arith.constant 0 : index
    %c0_13 = arith.constant 0 : index
    %c0_14 = arith.constant 0 : index
    %67 = vector.load %arg5[%c0_11, %c0_12, %c0_13, %c0_14] : memref<1x16x16x32xf32, #tpu.memory_space<vmem>>, vector<1x16x16x32xf32>
    %68 = vector.shape_cast %67 : vector<1x16x16x32xf32> to vector<16x16x32xf32>
    %69 = vector.shape_cast %66 : vector<16x16x32xf32> to vector<1x16x16x32xf32>
    tpu.vector_store %arg5[%c0_11, %c0_12, %c0_13, %c0_14], %69 {strides = array<i32>} : memref<1x16x16x32xf32, #tpu.memory_space<vmem>>, vector<1x16x16x32xf32>,
    %cst_15 = arith.constant dense<0.000000e+00> : vector<16x32xf32>
    %70 = vector.multi_reduction <add>, %66, %cst_15 [1] : vector<16x16x32xf32> to vector<16x32xf32>
    %cst_16 = arith.constant 1.600000e+01 : f32
    %71 = vector.broadcast %cst_16 : f32 to vector<16x32xf32>
    %72 = arith.divf %70, %71 : vector<16x32xf32>
    %c0_17 = arith.constant 0 : index
    %c0_18 = arith.constant 0 : index
    %c0_19 = arith.constant 0 : index
    %73 = vector.load %arg6[%c0_17, %c0_18, %c0_19] : memref<1x16x32xf32, #tpu.memory_space<vmem>>, vector<1x16x32xf32>
    %74 = vector.shape_cast %73 : vector<1x16x32xf32> to vector<16x32xf32>
    %75 = vector.shape_cast %72 : vector<16x32xf32> to vector<1x16x32xf32>
    tpu.vector_store %arg6[%c0_17, %c0_18, %c0_19], %75 {strides = array<i32>} : memref<1x16x32xf32, #tpu.memory_space<vmem>>, vector<1x16x32xf32>,
    %cst_20 = arith.constant dense<0.000000e+00> : vector<16x32xf32>
    %76 = vector.multi_reduction <add>, %66, %cst_20 [0] : vector<16x16x32xf32> to vector<16x32xf32>
    %cst_21 = arith.constant 1.600000e+01 : f32
    %77 = vector.broadcast %cst_21 : f32 to vector<16x32xf32>
    %78 = arith.divf %76, %77 : vector<16x32xf32>
    %c0_22 = arith.constant 0 : index
    %c0_23 = arith.constant 0 : index
    %c0_24 = arith.constant 0 : index
    %79 = vector.load %arg7[%c0_22, %c0_23, %c0_24] : memref<1x16x32xf32, #tpu.memory_space<vmem>>, vector<1x16x32xf32>
    %80 = vector.shape_cast %79 : vector<1x16x32xf32> to vector<16x32xf32>
    %81 = vector.shape_cast %78 : vector<16x32xf32> to vector<1x16x32xf32>
    tpu.vector_store %arg7[%c0_22, %c0_23, %c0_24], %81 {strides = array<i32>} : memref<1x16x32xf32, #tpu.memory_space<vmem>>, vector<1x16x32xf32>,
    return
  }
  func.func @transform_0(%arg0: i32) -> (i32, i32, i32, i32) {
    %c0_i32 = arith.constant 0 : i32
    %c0_i32_0 = arith.constant 0 : i32
    %c0_i32_1 = arith.constant 0 : i32
    %c0_i32_2 = arith.constant 0 : i32
    return %arg0, %c0_i32, %c0_i32_0, %c0_i32_1 : i32, i32, i32, i32
  }
  func.func @transform_1(%arg0: i32) -> (i32, i32) {
    %c0_i32 = arith.constant 0 : i32
    %c0_i32_0 = arith.constant 0 : i32
    %c0_i32_1 = arith.constant 0 : i32
    return %c0_i32, %c0_i32_0 : i32, i32
  }
  func.func @transform_2(%arg0: i32) -> (i32, i32) {
    %c0_i32 = arith.constant 0 : i32
    %c0_i32_0 = arith.constant 0 : i32
    %c0_i32_1 = arith.constant 0 : i32
    return %c0_i32, %c0_i32_0 : i32, i32
  }
  func.func @transform_3(%arg0: i32) -> (i32, i32) {
    %c0_i32 = arith.constant 0 : i32
    %c0_i32_0 = arith.constant 0 : i32
    %c0_i32_1 = arith.constant 0 : i32
    return %c0_i32, %c0_i32_0 : i32, i32
  }
  func.func @transform_4(%arg0: i32) -> (i32, i32, i32, i32) {
    %c0_i32 = arith.constant 0 : i32
    %c0_i32_0 = arith.constant 0 : i32
    %c0_i32_1 = arith.constant 0 : i32
    %c0_i32_2 = arith.constant 0 : i32
    return %arg0, %c0_i32, %c0_i32_0, %c0_i32_1 : i32, i32, i32, i32
  }
  func.func @transform_5(%arg0: i32) -> (i32, i32, i32) {
    %c0_i32 = arith.constant 0 : i32
    %c0_i32_0 = arith.constant 0 : i32
    %c0_i32_1 = arith.constant 0 : i32
    return %arg0, %c0_i32, %c0_i32_0 : i32, i32, i32
  }
  func.func @transform_6(%arg0: i32) -> (i32, i32, i32) {
    %c0_i32 = arith.constant 0 : i32
    %c0_i32_0 = arith.constant 0 : i32
    %c0_i32_1 = arith.constant 0 : i32
    return %arg0, %c0_i32, %c0_i32_0 : i32, i32, i32
  }
}

module attributes {stable_mosaic.version = 11 : i64} {
  func.func @_coordatt_combine_kernel(%arg0: i32, %arg1: memref<1x16x16x32xf32, #tpu.memory_space<vmem>>, %arg2: memref<1x16x32xf32, #tpu.memory_space<vmem>>, %arg3: memref<1x16x32xf32, #tpu.memory_space<vmem>>, %arg4: memref<1x16x16x32xf32, #tpu.memory_space<vmem>>) attributes {dimension_semantics = [#tpu.dimension_semantics<parallel>], iteration_bounds = array<i64: 2>, scalar_prefetch = 0 : i64, scratch_operands = 0 : i64, tpu.core_type = #tpu.core_type<tc>, window_params = [{transform_indices = @transform_0, window_bounds = array<i64: 1, 16, 16, 32>}, {transform_indices = @transform_1, window_bounds = array<i64: 1, 16, 32>}, {transform_indices = @transform_2, window_bounds = array<i64: 1, 16, 32>}, {transform_indices = @transform_3, window_bounds = array<i64: 1, 16, 16, 32>}]} {
    %c0 = arith.constant 0 : index
    %c0_0 = arith.constant 0 : index
    %c0_1 = arith.constant 0 : index
    %c0_2 = arith.constant 0 : index
    %0 = vector.load %arg1[%c0, %c0_0, %c0_1, %c0_2] : memref<1x16x16x32xf32, #tpu.memory_space<vmem>>, vector<1x16x16x32xf32>
    %1 = vector.shape_cast %0 : vector<1x16x16x32xf32> to vector<16x16x32xf32>
    %c0_3 = arith.constant 0 : index
    %c0_4 = arith.constant 0 : index
    %c0_5 = arith.constant 0 : index
    %2 = vector.load %arg2[%c0_3, %c0_4, %c0_5] : memref<1x16x32xf32, #tpu.memory_space<vmem>>, vector<1x16x32xf32>
    %3 = vector.shape_cast %2 : vector<1x16x32xf32> to vector<16x32xf32>
    %c0_6 = arith.constant 0 : index
    %c0_7 = arith.constant 0 : index
    %c0_8 = arith.constant 0 : index
    %4 = vector.load %arg3[%c0_6, %c0_7, %c0_8] : memref<1x16x32xf32, #tpu.memory_space<vmem>>, vector<1x16x32xf32>
    %5 = vector.shape_cast %4 : vector<1x16x32xf32> to vector<16x32xf32>
    %6 = vector.shape_cast %3 : vector<16x32xf32> to vector<16x1x32xf32>
    %7 = vector.broadcast %6 : vector<16x1x32xf32> to vector<16x16x32xf32>
    %8 = arith.mulf %1, %7 : vector<16x16x32xf32>
    %9 = vector.shape_cast %5 : vector<16x32xf32> to vector<1x16x32xf32>
    %10 = vector.broadcast %9 : vector<1x16x32xf32> to vector<16x16x32xf32>
    %11 = arith.mulf %8, %10 : vector<16x16x32xf32>
    %c0_9 = arith.constant 0 : index
    %c0_10 = arith.constant 0 : index
    %c0_11 = arith.constant 0 : index
    %c0_12 = arith.constant 0 : index
    %12 = vector.load %arg4[%c0_9, %c0_10, %c0_11, %c0_12] : memref<1x16x16x32xf32, #tpu.memory_space<vmem>>, vector<1x16x16x32xf32>
    %13 = vector.shape_cast %12 : vector<1x16x16x32xf32> to vector<16x16x32xf32>
    %14 = vector.shape_cast %11 : vector<16x16x32xf32> to vector<1x16x16x32xf32>
    tpu.vector_store %arg4[%c0_9, %c0_10, %c0_11, %c0_12], %14 {strides = array<i32>} : memref<1x16x16x32xf32, #tpu.memory_space<vmem>>, vector<1x16x16x32xf32>,
    return
  }
  func.func @transform_0(%arg0: i32) -> (i32, i32, i32, i32) {
    %c0_i32 = arith.constant 0 : i32
    %c0_i32_0 = arith.constant 0 : i32
    %c0_i32_1 = arith.constant 0 : i32
    %c0_i32_2 = arith.constant 0 : i32
    return %arg0, %c0_i32, %c0_i32_0, %c0_i32_1 : i32, i32, i32, i32
  }
  func.func @transform_1(%arg0: i32) -> (i32, i32, i32) {
    %c0_i32 = arith.constant 0 : i32
    %c0_i32_0 = arith.constant 0 : i32
    %c0_i32_1 = arith.constant 0 : i32
    return %arg0, %c0_i32, %c0_i32_0 : i32, i32, i32
  }
  func.func @transform_2(%arg0: i32) -> (i32, i32, i32) {
    %c0_i32 = arith.constant 0 : i32
    %c0_i32_0 = arith.constant 0 : i32
    %c0_i32_1 = arith.constant 0 : i32
    return %arg0, %c0_i32, %c0_i32_0 : i32, i32, i32
  }
  func.func @transform_3(%arg0: i32) -> (i32, i32, i32, i32) {
    %c0_i32 = arith.constant 0 : i32
    %c0_i32_0 = arith.constant 0 : i32
    %c0_i32_1 = arith.constant 0 : i32
    %c0_i32_2 = arith.constant 0 : i32
    return %arg0, %c0_i32, %c0_i32_0, %c0_i32_1 : i32, i32, i32, i32
  }
}

</mosaic_0001>

<bundles_post_ra>
// kernel: conv_forward.5
= control target key start
LH: loop header
LB: loop body
LE: loop exit
PB: predicated region body
PF: predicated region fallthrough
CT: control target
= control target key end

     0   :  { %s526_s12 = smov 0   ;;  %s709_s0 = inlined_call_operand.vmem [shape: f32[2,16,16,32], index: 0, kind: input, shape index: {}]   ;;  %s710_s1 = inlined_call_operand.vmem [shape: f32[2,16,32], index: 1, kind: input, shape index: {}]   ;;  %s711_s2 = inlined_call_operand.vmem [shape: f32[2,16,32], index: 2, kind: input, shape index: {}]   ;;  %s712_s3 = inlined_call_operand.vmem [shape: f32[2,16,16,32], index: 3, kind: output, shape index: {}]  }
   0x1 LB: > { %s471_s13 = sadd.s32 4294967295, %s504_s12   ;;  %p475_p0 = scmp.ge.s32.totalorder %s504_s12, 1  ;;  %s504_s12 = sphi %s526_s12, %s13_s12  }
   0x2   : > { %p157_p1 = scmp.lt.s32.totalorder %s504_s12, 3 }
   0x4   : > { %p158_p2 = pnand %p475_p0, %p157_p1 }
   0x5   : > { %p191_p3 = scmp.lt.s32.totalorder (!%p158_p2), %s471_s13, 1 }
   0x6   : > { %161 = sbr.rel (%p158_p2) target bundleno = 54 (0x36), region = 32 }
   0xb   : > { %s714_s13 = smov (!%p191_p3, %s471_s13), 1  ;;  %vm359_vm0 = vcmask 261120  }
   0xc   : > { %s486_s14 = sshll.u32 %s714_s13, 8  ;;  %s487_s15 = sshll.u32 %s714_s13, 4 }
   0xd   : > { %s537_s18 = scalar_lea.vmem %s709_s0, %s486_s14  ;;  %s542_s21 = scalar_lea.vmem %s710_s1, %s487_s15 }
   0xe   : > { %s205_s24 = scalar_lea.vmem %s711_s2, %s487_s15  ;;  %v211_v0 = vld [vmem:[%s537_s18] sm:$0xff]  ;;  %v212_v2 = vld [vmem:[%s537_s18 + $0x8] sm:$0xff]  ;;  %v213_v8 = vld [vmem:[%s537_s18 + $0x10] sm:$0xff]  ;;  %s571_s27 = scalar_lea.vmem %s712_s3, %s486_s14 }
   0xf   : > { %v549_v1 = vld [vmem:[%s542_s21] sm:$0xff]  ;;  %v554_v4 = vld [vmem:[%s205_s24 + $0x8] sm:$0xff]  ;;  %v214_v9 = vld [vmem:[%s537_s18 + $0x18] sm:$0xff] }
  0x10   : > { %v552_v3 = vld [vmem:[%s205_s24] sm:$0xff]  ;;  %v263_v5 = vperm.slane %v549_v1, 0  ;;  %v249_v6 = vrot.slane %v549_v1, 1  ;;  %v250_v7 = vrot.slane %v549_v1, 2  ;;  %v251_v11 = vrot.slane %v549_v1, 3  ;;  %v216_v18 = vld [vmem:[%s537_s18 + $0x28] sm:$0xff] }
  0x11   : > { %v215_v10 = vld [vmem:[%s537_s18 + $0x20] sm:$0xff]  ;;  %v252_v12 = vrot.slane %v549_v1, 4  ;;  %v253_v13 = vrot.slane %v549_v1, 5  ;;  %v217_v19 = vld [vmem:[%s537_s18 + $0x30] sm:$0xff]  ;;  %v218_v20 = vld [vmem:[%s537_s18 + $0x38] sm:$0xff]  ;;  %v254_v48 = vrot.slane %v549_v1, 6 }
  0x12   : > { %v295_v14 = vmul.f32 %v263_v5, %v211_v0  ;;  %v296_v15 = vmul.f32 %v263_v5, %v212_v2  ;;  %v264_v16 = vperm.slane %v249_v6, 0  ;;  %v265_v17 = vperm.slane %v250_v7, 0  ;;  %v219_v22 = vld [vmem:[%s537_s18 + $0x40] sm:$0xff]  ;;  %v220_v29 = vld [vmem:[%s537_s18 + $0x48] sm:$0xff]  ;;  %v221_v34 = vld [vmem:[%s537_s18 + $0x50] sm:$0xff] }
  0x13   : > { %v266_v21 = vperm.slane %v251_v11, 0  ;;  %v267_v23 = vperm.slane %v252_v12, 0  ;;  %v268_v24 = vperm.slane %v253_v13, 0  ;;  %v222_v35 = vld [vmem:[%s537_s18 + $0x58] sm:$0xff]  ;;  %v584_v39 = vld [vmem:[%s542_s21 + $0x8] sm:$0xff]  ;;  %v223_v47 = vld [vmem:[%s537_s18 + $0x60] sm:$0xff] }
  0x14   : > { %v327_v25 = vmul.f32 %v295_v14, %v552_v3  ;;  %v328_v26 = vmul.f32 %v296_v15, %v554_v4  ;;  %v297_v27 = vmul.f32 %v264_v16, %v213_v8  ;;  %v298_v28 = vmul.f32 %v264_v16, %v214_v9  ;;  %v224_v52 = vld [vmem:[%s537_s18 + $0x68] sm:$0xff]  ;;  %v225_v53 = vld [vmem:[%s537_s18 + $0x70] sm:$0xff]  ;;  %v226_v54 = vld [vmem:[%s537_s18 + $0x78] sm:$0xff] }
  0x15   : > { %v299_v30 = vmul.f32 %v265_v17, %v215_v10  ;;  %v300_v31 = vmul.f32 %v265_v17, %v216_v18  ;;  %v301_v32 = vmul.f32 %v266_v21, %v217_v19  ;;  %v302_v33 = vmul.f32 %v266_v21, %v218_v20  ;;  %v227_v60 = vld [vmem:[%s537_s18 + $0x80] sm:$0xff]  ;;  %v228_v63 = vld [vmem:[%s537_s18 + $0x88] sm:$0xff]  ;;  %v229_v8 = vld [vmem:[%s537_s18 + $0x90] sm:$0xff] }
  0x16   : > { %360 = vst.msk [vmem:[%s571_s27] sm:$0xff] %vm359_vm0, %v327_v25  ;;  %v329_v36 = vmul.f32 %v297_v27, %v552_v3  ;;  %v330_v37 = vmul.f32 %v298_v28, %v554_v4  ;;  %v303_v38 = vmul.f32 %v267_v23, %v219_v22  ;;  %v304_v42 = vmul.f32 %v267_v23, %v220_v29  ;;  %v230_v10 = vld [vmem:[%s537_s18 + $0x98] sm:$0xff]  ;;  %v231_v16 = vld [vmem:[%s537_s18 + $0xa0] sm:$0xff]  ;;  %v232_v19 = vld [vmem:[%s537_s18 + $0xa8] sm:$0xff] }
  0x17   : > { %361 = vst.msk [vmem:[%s571_s27 + $0x8] sm:$0xff] %vm359_vm0, %v328_v26  ;;  %v331_v40 = vmul.f32 %v299_v30, %v552_v3  ;;  %v332_v41 = vmul.f32 %v300_v31, %v554_v4  ;;  %v333_v43 = vmul.f32 %v301_v32, %v552_v3  ;;  %v305_v44 = vmul.f32 %v268_v24, %v221_v34  ;;  %v233_v23 = vld [vmem:[%s537_s18 + $0xb0] sm:$0xff]  ;;  %v234_v27 = vld [vmem:[%s537_s18 + $0xb8] sm:$0xff]  ;;  %v235_v32 = vld [vmem:[%s537_s18 + $0xc0] sm:$0xff] }
  0x18   : > { %362 = vst.msk [vmem:[%s571_s27 + $0x10] sm:$0xff] %vm359_vm0, %v329_v36  ;;  %v306_v45 = vmul.f32 %v268_v24, %v222_v35  ;;  %v334_v46 = vmul.f32 %v302_v33, %v554_v4  ;;  %v255_v49 = vrot.slane %v549_v1, 7  ;;  %v256_v50 = vrot.slane %v584_v39, 1  ;;  %v236_v35 = vld [vmem:[%s537_s18 + $0xc8] sm:$0xff] }
  0x19   : > { %363 = vst.msk [vmem:[%s571_s27 + $0x18] sm:$0xff] %vm359_vm0, %v330_v37  ;;  %v335_v51 = vmul.f32 %v303_v38, %v552_v3  ;;  %v271_v55 = vperm.slane %v584_v39, 0  ;;  %v257_v56 = vrot.slane %v584_v39, 2  ;;  %v336_v57 = vmul.f32 %v304_v42, %v554_v4 }
  0x1a   : > { %364 = vst.msk [vmem:[%s571_s27 + $0x20] sm:$0xff] %vm359_vm0, %v331_v40  ;;  %v269_v58 = vperm.slane %v254_v48, 0  ;;  %v270_v59 = vperm.slane %v255_v49, 0  ;;  %v337_v61 = vmul.f32 %v305_v44, %v552_v3  ;;  %v338_v62 = vmul.f32 %v306_v45, %v554_v4  ;;  %v238_v44 = vld [vmem:[%s537_s18 + $0xd8] sm:$0xff] }
  0x1b   : > { %365 = vst.msk [vmem:[%s571_s27 + $0x28] sm:$0xff] %vm359_vm0, %v332_v41  ;;  %v272_v0 = vperm.slane %v256_v50, 0  ;;  %v258_v1 = vrot.slane %v584_v39, 3  ;;  %v311_v9 = vmul.f32 %v271_v55, %v227_v60  ;;  %v273_v11 = vperm.slane %v257_v56, 0  ;;  %v237_v41 = vld [vmem:[%s537_s18 + $0xd0] sm:$0xff]  ;;  %v240_v50 = vld [vmem:[%s537_s18 + $0xe8] sm:$0xff] }
  0x1c   : > { %366 = vst.msk [vmem:[%s571_s27 + $0x30] sm:$0xff] %vm359_vm0, %v333_v43  ;;  %v307_v2 = vmul.f32 %v269_v58, %v223_v47  ;;  %v308_v5 = vmul.f32 %v269_v58, %v224_v52  ;;  %v309_v6 = vmul.f32 %v270_v59, %v225_v53  ;;  %v310_v7 = vmul.f32 %v270_v59, %v226_v54  ;;  %v239_v47 = vld [vmem:[%s537_s18 + $0xe0] sm:$0xff]  ;;  %v241_v54 = vld [vmem:[%s537_s18 + $0xf0] sm:$0xff] }
  0x1d   : > { %367 = vst.msk [vmem:[%s571_s27 + $0x38] sm:$0xff] %vm359_vm0, %v334_v46  ;;  %v259_v12 = vrot.slane %v584_v39, 4  ;;  %v312_v15 = vmul.f32 %v271_v55, %v228_v63  ;;  %v313_v18 = vmul.f32 %v272_v0, %v229_v8  ;;  %v274_v20 = vperm.slane %v258_v1, 0 }
  0x1e   : > { %368 = vst.msk [vmem:[%s571_s27 + $0x40] sm:$0xff] %vm359_vm0, %v335_v51  ;;  %v339_v13 = vmul.f32 %v307_v2, %v552_v3  ;;  %v340_v14 = vmul.f32 %v308_v5, %v554_v4  ;;  %v341_v17 = vmul.f32 %v309_v6, %v552_v3  ;;  %v342_v21 = vmul.f32 %v310_v7, %v554_v4 }
  0x1f   : > { %369 = vst.msk [vmem:[%s571_s27 + $0x48] sm:$0xff] %vm359_vm0, %v336_v57  ;;  %v314_v22 = vmul.f32 %v272_v0, %v230_v10  ;;  %v260_v24 = vrot.slane %v584_v39, 5  ;;  %v343_v25 = vmul.f32 %v311_v9, %v552_v3  ;;  %v315_v26 = vmul.f32 %v273_v11, %v231_v16  ;;  %v242_v57 = vld [vmem:[%s537_s18 + $0xf8] sm:$0xff] }
  0x20   : > { %370 = vst.msk [vmem:[%s571_s27 + $0x50] sm:$0xff] %vm359_vm0, %v337_v61  ;;  %v275_v28 = vperm.slane %v259_v12, 0  ;;  %v261_v29 = vrot.slane %v584_v39, 6  ;;  %v344_v30 = vmul.f32 %v312_v15, %v554_v4  ;;  %v316_v31 = vmul.f32 %v273_v11, %v232_v19 }
  0x21   : > { %371 = vst.msk [vmem:[%s571_s27 + $0x58] sm:$0xff] %vm359_vm0, %v338_v62  ;;  %v345_v33 = vmul.f32 %v313_v18, %v552_v3  ;;  %v317_v34 = vmul.f32 %v274_v20, %v233_v23  ;;  %v276_v36 = vperm.slane %v260_v24, 0  ;;  %v262_v37 = vrot.slane %v584_v39, 7 }
  0x22   : > { %372 = vst.msk [vmem:[%s571_s27 + $0x60] sm:$0xff] %vm359_vm0, %v339_v13  ;;  %v346_v38 = vmul.f32 %v314_v22, %v554_v4  ;;  %v318_v40 = vmul.f32 %v274_v20, %v234_v27  ;;  %v347_v42 = vmul.f32 %v315_v26, %v552_v3  ;;  %v319_v43 = vmul.f32 %v275_v28, %v235_v32 }
  0x23   : > { %373 = vst.msk [vmem:[%s571_s27 + $0x68] sm:$0xff] %vm359_vm0, %v340_v14  ;;  %v277_v45 = vperm.slane %v261_v29, 0  ;;  %v348_v39 = vmul.f32 %v316_v31, %v554_v4  ;;  %v320_v46 = vmul.f32 %v275_v28, %v236_v35  ;;  %v349_v48 = vmul.f32 %v317_v34, %v552_v3 }
  0x24   : > { %374 = vst.msk [vmem:[%s571_s27 + $0x70] sm:$0xff] %vm359_vm0, %v341_v17  ;;  %v321_v49 = vmul.f32 %v276_v36, %v237_v41  ;;  %v278_v51 = vperm.slane %v262_v37, 0  ;;  %v350_v52 = vmul.f32 %v318_v40, %v554_v4  ;;  %v322_v53 = vmul.f32 %v276_v36, %v238_v44 }
  0x25   : > { %375 = vst.msk [vmem:[%s571_s27 + $0x78] sm:$0xff] %vm359_vm0, %v342_v21  ;;  %v351_v55 = vmul.f32 %v319_v43, %v552_v3  ;;  %v323_v56 = vmul.f32 %v277_v45, %v239_v47  ;;  %v352_v58 = vmul.f32 %v320_v46, %v554_v4  ;;  %v324_v59 = vmul.f32 %v277_v45, %v240_v50 }
  0x26   : > { %376 = vst.msk [vmem:[%s571_s27 + $0x80] sm:$0xff] %vm359_vm0, %v343_v25  ;;  %v353_v60 = vmul.f32 %v321_v49, %v552_v3  ;;  %v325_v61 = vmul.f32 %v278_v51, %v241_v54  ;;  %v354_v62 = vmul.f32 %v322_v53, %v554_v4  ;;  %v326_v63 = vmul.f32 %v278_v51, %v242_v57 }
  0x27   : > { %377 = vst.msk [vmem:[%s571_s27 + $0x88] sm:$0xff] %vm359_vm0, %v344_v30  ;;  %v355_v0 = vmul.f32 %v323_v56, %v552_v3  ;;  %v356_v1 = vmul.f32 %v324_v59, %v554_v4 }
  0x28   : > { %378 = vst.msk [vmem:[%s571_s27 + $0x90] sm:$0xff] %vm359_vm0, %v345_v33  ;;  %v357_v2 = vmul.f32 %v325_v61, %v552_v3  ;;  %v358_v5 = vmul.f32 %v326_v63, %v554_v4 }
  0x29   : > { %379 = vst.msk [vmem:[%s571_s27 + $0x98] sm:$0xff] %vm359_vm0, %v346_v38 }
  0x2a   : > { %380 = vst.msk [vmem:[%s571_s27 + $0xa0] sm:$0xff] %vm359_vm0, %v347_v42 }
  0x2b   : > { %381 = vst.msk [vmem:[%s571_s27 + $0xa8] sm:$0xff] %vm359_vm0, %v348_v39 }
  0x2c   : > { %382 = vst.msk [vmem:[%s571_s27 + $0xb0] sm:$0xff] %vm359_vm0, %v349_v48 }
  0x2d   : > { %383 = vst.msk [vmem:[%s571_s27 + $0xb8] sm:$0xff] %vm359_vm0, %v350_v52 }
  0x2e   : > { %384 = vst.msk [vmem:[%s571_s27 + $0xc0] sm:$0xff] %vm359_vm0, %v351_v55 }
  0x2f   : > { %385 = vst.msk [vmem:[%s571_s27 + $0xc8] sm:$0xff] %vm359_vm0, %v352_v58 }
  0x30   : > { %386 = vst.msk [vmem:[%s571_s27 + $0xd0] sm:$0xff] %vm359_vm0, %v353_v60 }
  0x31   : > { %387 = vst.msk [vmem:[%s571_s27 + $0xd8] sm:$0xff] %vm359_vm0, %v354_v62 }
  0x32   : > { %388 = vst.msk [vmem:[%s571_s27 + $0xe0] sm:$0xff] %vm359_vm0, %v355_v0 }
  0x33   : > { %389 = vst.msk [vmem:[%s571_s27 + $0xe8] sm:$0xff] %vm359_vm0, %v356_v1 }
  0x34   : > { %390 = vst.msk [vmem:[%s571_s27 + $0xf0] sm:$0xff] %vm359_vm0, %v357_v2 }
  0x35   : > { %391 = vst.msk [vmem:[%s571_s27 + $0xf8] sm:$0xff] %vm359_vm0, %v358_v5 }
  0x36 PF: > { %s13_s12 = sadd.s32 1, %s504_s12  }
  0x37   : > { %p10_p4 = scmp.ge.s32.totalorder %s13_s12, 4  }
  0x39   :  { %12 = sbr.rel (!%p10_p4) target bundleno = 1 (0x1), region = 68 }

// kernel: conv_forward.3
= control target key start
LH: loop header
LB: loop body
LE: loop exit
PB: predicated region body
PF: predicated region fallthrough
CT: control target
= control target key end

     0   :  { %s2377_s15 = smov 0   ;;  %s4378_s0 = inlined_call_operand.vmem [shape: f32[2,18,18,32], index: 0, kind: input, shape index: {}]   ;;  %s4379_s1 = inlined_call_operand.vmem [shape: f32[9,32], index: 1, kind: input, shape index: {}]   ;;  %s4380_s2 = inlined_call_operand.vmem [shape: f32[32,32], index: 2, kind: input, shape index: {}]   ;;  %s4381_s3 = inlined_call_operand.vmem [shape: f32[1,32], index: 3, kind: input, shape index: {}]   ;;  %s4382_s4 = inlined_call_operand.vmem [shape: f32[2,16,16,32], index: 4, kind: output, shape index: {}]  }
   0x1 LB: > { %s2234_s16 = sadd.s32 4294967295, %s2350_s15   ;;  %p2238_p0 = scmp.ge.s32.totalorder %s2350_s15, 1  ;;  %s2350_s15 = sphi %s2377_s15, %s14_s15  }
   0x2   : > { %p162_p1 = scmp.lt.s32.totalorder %s2350_s15, 3 }
   0x4   : > { %p163_p2 = pnand %p2238_p0, %p162_p1 }
   0x6   : > { %166 = sbr.rel (%p163_p2) target bundleno = 464 (0x1d0), region = 36 }
   0xb   : > { %v1900_v0 = vld [vmem:[%s4380_s2 + $0x18] sm:$0xff]  ;;  %v1899_v1 = vld [vmem:[%s4380_s2 + $0x10] sm:$0xff]  ;;  %p188_p3 = scmp.lt.s32.totalorder %s2234_s16, 1  ;;  %v252_v2 = vld [vmem:[%s4379_s1] sm:$0xff]  ;;  %vm416_vm0 = vcmask 1046528   ;;  %vm658_vm1 = vcmask 1045504  }
   0xc   : > { %2278 = vmatpush.msra.mxu2 %v1900_v0  ;;  %2279 = vmatpush.msra.mxu3 %v1900_v0  ;;  %v1898_v3 = vld [vmem:[%s4380_s2 + $0x8] sm:$0xff]  ;;  %v1897_v4 = vld [vmem:[%s4380_s2] sm:$0xff]  ;;  %v2403_v5 = vperm.slane %v252_v2, 0  ;;  %v2405_v6 = vperm.slane %v252_v2, 1  ;;  %v2407_v7 = vperm.slane %v252_v2, 2  ;;  %v2409_v8 = vperm.slane %v252_v2, 3 }
   0xd   : > { %2014 = vmatpush.msra.mxu0 %v1900_v0  ;;  %2277 = vmatpush.msra.mxu1 %v1900_v0  ;;  %s4720_s16 = smov (!%p188_p3, %s2234_s16), 1  ;;  %v2411_v9 = vperm.slane %v252_v2, 4  ;;  %v2418_v10 = vperm.slane %v252_v2, 5  ;;  %v2427_v14 = vperm.slane %v252_v2, 6  ;;  %v2429_v15 = vperm.slane %v252_v2, 7 }
   0xe   : > { %2281 = vmatpush.msra.mxu2 %v1899_v1  ;;  %2282 = vmatpush.msra.mxu3 %v1899_v1  ;;  %s2289_s27 = smul.u32 432, %s4720_s16  ;;  %v2462_v30 = vld [vmem:[%s4379_s1 + $0x8] ss:$0 sm:$0xff]  ;;  %vm1905_vm2 = vcmask 261120   ;;  %s2276_s13 = sshll.u32 %s4720_s16, 8 }
   0xf   : > { %2015 = vmatpush.msra.mxu0 %v1899_v1  ;;  %2280 = vmatpush.msra.mxu1 %v1899_v1  ;;  %s4263_s17 = scalar_lea.vmem %s4382_s4, %s2276_s13 }
  0x10   : > { %2284 = vmatpush.msra.mxu2 %v1898_v3  ;;  %2285 = vmatpush.msra.mxu3 %v1898_v3  ;;  %s2416_s30 = scalar_lea.vmem %s4378_s0, %s2289_s27 }
  0x11   : > { %2016 = vmatpush.msra.mxu0 %v1898_v3  ;;  %2283 = vmatpush.msra.mxu1 %v1898_v3  ;;  %v222_v11 = vld [vmem:[%s2416_s30 + $0xc0] sm:$0xff]  ;;  %v2422_v12 = vld [vmem:[%s2416_s30 + $0xc8] sm:$0xff]  ;;  %v2425_v13 = vld [vmem:[%s2416_s30 + $0xd8] sm:$0xff] }
  0x12   : > { %2287 = vmatpush.msra.mxu2 %v1897_v4  ;;  %2288 = vmatpush.msra.mxu3 %v1897_v4  ;;  %4535 = vst [vmem:[#allocation2_spill] sm:$0xff] %v2425_v13  ;;  %v2432_v16 = vld [vmem:[%s2416_s30 + $0xe0] sm:$0xff]  ;;  %v271_v17 = vmul.f32 %v2403_v5, %v222_v11  ;;  %v344_v18 = vmul.f32 %v2405_v6, %v222_v11  ;;  %v2442_v21 = vld [vmem:[%s2416_s30 + $0xf0] sm:$0xff]  ;;  %v2465_v31 = vld [vmem:[%s2416_s30 + $0xf8] sm:$0xff] }
  0x13   : > { %v2438_v19 = vmul.f32 %v2405_v6, %v2422_v12  ;;  %v586_v20 = vmul.f32 %v2407_v7, %v222_v11  ;;  %2017 = vmatpush.msra.mxu0 %v1897_v4  ;;  %4536 = vst [vmem:[#allocation3_spill] sm:$0xff] %v2442_v21  ;;  %v2446_v22 = vmul.f32 %v2407_v7, %v2422_v12  ;;  %v234_v40 = vld [vmem:[%s2416_s30 + $0x120] sm:$0xff]  ;;  %v2489_v45 = vld [vmem:[%s2416_s30 + $0x128] sm:$0xff]  ;;  %v2505_v52 = vld [vmem:[%s2416_s30 + $0x138] sm:$0xff] }
  0x14   : > { %v820_v23 = vmul.f32 %v2409_v8, %v2425_v13  ;;  %v893_v24 = vmul.f32 %v2411_v9, %v2425_v13  ;;  %v2454_v25 = vmul.f32 %v2411_v9, %v2432_v16  ;;  %2286 = vmatpush.msra.mxu1 %v1897_v4  ;;  %v457_v26 = vrot.slane %v344_v18, 1  ;;  %4537 = vst [vmem:[#allocation4_spill] sm:$0xff] %v2505_v52  ;;  %v2516_v60 = vld [vmem:[%s2416_s30 + $0x140] sm:$0xff]  ;;  %v2533_v11 = vld [vmem:[%s2416_s30 + $0x150] sm:$0xff] }
  0x15   : > { %v4398_v27 = vrot.slane %v2438_v19, 1  ;;  %v699_v28 = vrot.slane %v586_v20, 2  ;;  %v1134_v29 = vmul.f32 %v2418_v10, %v2425_v13  ;;  %v4395_v32 = vrot.slane %v2446_v22, 2  ;;  %4538 = vst [vmem:[#allocation5_spill] sm:$0xff] %v2533_v11 }
  0x16   : > { %v1005_v33 = vrot.slane %v893_v24, 1  ;;  %v4394_v34 = vrot.slane %v2454_v25, 1  ;;  %v2471_v35 = vmul.f32 %v2418_v10, %v2432_v16  ;;  %v1367_v38 = vmul.f32 %v2427_v14, %v2442_v21 }
  0x17   : > { %v459_v36 = vsel %vm416_vm0, %v457_v26, %v4398_v27  ;;  %v1246_v37 = vrot.slane %v1134_v29, 2  ;;  %v1440_v39 = vmul.f32 %v2429_v15, %v2442_v21  ;;  %v701_v42 = vsel %vm658_vm1, %v699_v28, %v4395_v32  ;;  %v2665_v32 = vld [vmem:[%s2416_s30 + $0x78] sm:$0xff] }
  0x18   : > { %v545_v41 = vadd.f32 %v459_v36, %v271_v17  ;;  %v1007_v43 = vsel %vm416_vm0, %v1005_v33, %v4394_v34  ;;  %v4393_v44 = vrot.slane %v2471_v35, 2  ;;  %v2493_v46 = vmul.f32 %v2429_v15, %v2465_v31  ;;  %4541 = vst [vmem:[#allocation8_spill] sm:$0xff] %v2665_v32 }
  0x19   : > { %v1552_v47 = vrot.slane %v1440_v39, 1  ;;  %v1681_v48 = vmul.f32 %v2462_v30, %v2442_v21  ;;  %v2499_v49 = vmul.f32 %v2462_v30, %v2465_v31  ;;  %v279_v53 = vmul.f32 %v2403_v5, %v234_v40 }
  0x1a   : > { %v787_v50 = vadd.f32 %v701_v42, %v545_v41  ;;  %v1248_v51 = vsel %vm658_vm1, %v1246_v37, %v4393_v44  ;;  %v356_v54 = vmul.f32 %v2405_v6, %v234_v40  ;;  %v4392_v55 = vrot.slane %v2493_v46, 1 }
  0x1b   : > { %v1793_v56 = vrot.slane %v1681_v48, 2  ;;  %v4389_v57 = vrot.slane %v2499_v49, 2  ;;  %v2513_v58 = vmul.f32 %v2405_v6, %v2489_v45  ;;  %v598_v62 = vmul.f32 %v2407_v7, %v234_v40 }
  0x1c   : > { %v852_v59 = vadd.f32 %v820_v23, %v787_v50  ;;  %v477_v61 = vrot.slane %v356_v54, 1  ;;  %v2521_v63 = vmul.f32 %v2407_v7, %v2489_v45  ;;  %v1554_v0 = vsel %vm416_vm0, %v1552_v47, %v4392_v55  ;;  %v2539_v23 = vld [vmem:[%s2416_s30 + $0x158] sm:$0xff] }
  0x1d   : > { %v1795_v1 = vsel %vm658_vm1, %v1793_v56, %v4389_v57  ;;  %v4388_v2 = vrot.slane %v2513_v58, 1  ;;  %v828_v3 = vmul.f32 %v2409_v8, %v2505_v52  ;;  %v719_v17 = vrot.slane %v598_v62, 2 }
  0x1e   : > { %v1093_v4 = vadd.f32 %v1007_v43, %v852_v59  ;;  %v4387_v18 = vrot.slane %v2521_v63, 2  ;;  %v905_v20 = vmul.f32 %v2411_v9, %v2505_v52  ;;  %v2546_v26 = vmul.f32 %v2411_v9, %v2516_v60 }
  0x1f   : > { %v479_v24 = vsel %vm416_vm0, %v477_v61, %v4388_v2  ;;  %v1146_v28 = vmul.f32 %v2418_v10, %v2505_v52  ;;  %v2552_v29 = vmul.f32 %v2418_v10, %v2516_v60  ;;  %v1375_v43 = vmul.f32 %v2427_v14, %v2533_v11  ;;  %v2581_v61 = vld [vmem:[%s2416_s30 + $0x8] sm:$0xff] }
  0x20   : > { %v1334_v33 = vadd.f32 %v1248_v51, %v1093_v4  ;;  %v553_v36 = vadd.f32 %v479_v24, %v279_v53  ;;  %v721_v37 = vsel %vm658_vm1, %v719_v17, %v4387_v18  ;;  %v1025_v39 = vrot.slane %v905_v20, 1  ;;  %v198_v53 = vld [vmem:[%s2416_s30] sm:$0xff] }
  0x21   : > { %v4386_v40 = vrot.slane %v2546_v26, 1  ;;  %v1266_v41 = vrot.slane %v1146_v28, 2  ;;  %v4385_v42 = vrot.slane %v2552_v29, 2  ;;  %v1452_v50 = vmul.f32 %v2429_v15, %v2533_v11 }
  0x22   : > { %v1399_v47 = vadd.f32 %v1367_v38, %v1334_v33  ;;  %v795_v48 = vadd.f32 %v721_v37, %v553_v36  ;;  %v2565_v51 = vmul.f32 %v2429_v15, %v2539_v23  ;;  %v1693_v38 = vmul.f32 %v2462_v30, %v2533_v11  ;;  %v2586_v33 = vld [vmem:[%s2416_s30 + $0x18] sm:$0xff] }
  0x23   : > { %v1027_v54 = vsel %vm416_vm0, %v1025_v39, %v4386_v40  ;;  %v1268_v56 = vsel %vm658_vm1, %v1266_v41, %v4385_v42  ;;  %v2578_v59 = vmul.f32 %v2462_v30, %v2539_v23  ;;  %v1572_v17 = vrot.slane %v1452_v50, 1  ;;  %4539 = vst [vmem:[#allocation6_spill] sm:$0xff] %v2586_v33 }
  0x24   : > { %v1640_v62 = vadd.f32 %v1554_v0, %v1399_v47  ;;  %v860_v4 = vadd.f32 %v828_v3, %v795_v48  ;;  %v4383_v20 = vrot.slane %v2565_v51, 1  ;;  %v1813_v24 = vrot.slane %v1693_v38, 2  ;;  %v2594_v3 = vld [vmem:[%s2416_s30 + $0x20] sm:$0xff] }
  0x25   : > { %v4384_v28 = vrot.slane %v2578_v59, 2  ;;  %v255_v36 = vmul.f32 %v2403_v5, %v198_v53  ;;  %v320_v37 = vmul.f32 %v2405_v6, %v198_v53  ;;  %v2598_v47 = vmul.f32 %v2405_v6, %v2581_v61 }
  0x26   : > { %v1881_v39 = vadd.f32 %v1795_v1, %v1640_v62  ;;  %v1101_v41 = vadd.f32 %v1027_v54, %v860_v4  ;;  %v1574_v0 = vsel %vm416_vm0, %v1572_v17, %v4383_v20  ;;  %v562_v38 = vmul.f32 %v2407_v7, %v198_v53  ;;  %v2615_v20 = vld [vmem:[%s2416_s30 + $0x30] sm:$0xff] }
  0x27   : > { %v1815_v48 = vsel %vm658_vm1, %v1813_v24, %v4384_v28  ;;  %v417_v50 = vrot.slane %v320_v37, 1  ;;  %v2606_v1 = vmul.f32 %v2407_v7, %v2581_v61  ;;  %v4390_v62 = vrot.slane %v2598_v47, 1  ;;  %4540 = vst [vmem:[#allocation7_spill] sm:$0xff] %v2615_v20 }
  0x28   : > { %2258 = vmatmul.msk.f32.vlgmr.msra.gmra.mxu2 %vm1905_vm2, %v1881_v39  ;;  %v1342_v54 = vadd.f32 %v1268_v56, %v1101_v41  ;;  %v804_v4 = vmul.f32 %v2409_v8, %v2586_v33  ;;  %v869_v17 = vmul.f32 %v2411_v9, %v2586_v33  ;;  %v659_v24 = vrot.slane %v562_v38, 2  ;;  %v2625_v41 = vld [vmem:[%s2416_s30 + $0x38] sm:$0xff] }
  0x29   : > { %v4391_v53 = vrot.slane %v2606_v1, 2  ;;  %v2620_v37 = vmul.f32 %v2411_v9, %v2594_v3  ;;  %v1110_v56 = vmul.f32 %v2418_v10, %v2586_v33  ;;  %v419_v28 = vsel %vm416_vm0, %v417_v50, %v4390_v62  ;;  %v2690_v33 = vld [vmem:[%s2416_s30 + $0x90] sm:$0xff] }
  0x2a   : > { %v1407_v39 = vadd.f32 %v1375_v43, %v1342_v54  ;;  %v965_v42 = vrot.slane %v869_v17, 1  ;;  %v2632_v38 = vmul.f32 %v2418_v10, %v2594_v3  ;;  %v529_v40 = vadd.f32 %v419_v28, %v255_v36  ;;  %4544 = vst [vmem:[#allocation11_spill] sm:$0xff] %v2690_v33 }
  0x2b   : > { %v661_v18 = vsel %vm658_vm1, %v659_v24, %v4391_v53  ;;  %v4397_v43 = vrot.slane %v2620_v37, 1  ;;  %v1206_v54 = vrot.slane %v1110_v56, 2  ;;  %v1416_v50 = vmul.f32 %v2429_v15, %v2615_v20  ;;  %v210_v24 = vld [vmem:[%s2416_s30 + $0x60] sm:$0xff] }
  0x2c   : > { %v1648_v2 = vadd.f32 %v1574_v0, %v1407_v39  ;;  %v4396_v57 = vrot.slane %v2632_v38, 2  ;;  %v771_v17 = vadd.f32 %v661_v18, %v529_v40  ;;  %v1351_v62 = vmul.f32 %v2427_v14, %v2615_v20  ;;  %v2651_v0 = vld [vmem:[%s2416_s30 + $0x68] sm:$0xff] }
  0x2d   : > { %v2645_v28 = vmul.f32 %v2429_v15, %v2625_v41  ;;  %v1657_v36 = vmul.f32 %v2462_v30, %v2615_v20  ;;  %v967_v39 = vsel %vm416_vm0, %v965_v42, %v4397_v43  ;;  %v1512_v18 = vrot.slane %v1416_v50, 1  ;;  %v2670_v42 = vld [vmem:[%s2416_s30 + $0x80] sm:$0xff] }
  0x2e   : > { %v1889_v56 = vadd.f32 %v1815_v48, %v1648_v2  ;;  %v2658_v40 = vmul.f32 %v2462_v30, %v2625_v41  ;;  %v836_v53 = vadd.f32 %v804_v4, %v771_v17  ;;  %v1208_v55 = vsel %vm658_vm1, %v1206_v54, %v4396_v57  ;;  %4542 = vst [vmem:[#allocation9_spill] sm:$0xff] %v2670_v42 }
  0x2f   : > { %v4403_v44 = vrot.slane %v2645_v28, 1  ;;  %v1753_v34 = vrot.slane %v1657_v36, 2  ;;  %v332_v48 = vmul.f32 %v2405_v6, %v210_v24  ;;  %v2675_v4 = vmul.f32 %v2405_v6, %v2651_v0 }
  0x30   : > { %2266 = vmatmul.msk.f32.vlgmr.msra.gmra.mxu3 %vm1905_vm2, %v1889_v56  ;;  %v574_v54 = vmul.f32 %v2407_v7, %v210_v24  ;;  %v1077_v50 = vadd.f32 %v967_v39, %v836_v53  ;;  %v263_v36 = vmul.f32 %v2403_v5, %v210_v24  ;;  %v2684_v56 = vmul.f32 %v2407_v7, %v2651_v0 }
  0x31   : > { %4543 = vst [vmem:[#allocation10_spill] sm:$0xff] %v2675_v4  ;;  %v1514_v17 = vsel %vm416_vm0, %v1512_v18, %v4403_v44  ;;  %v437_v57 = vrot.slane %v332_v48, 1  ;;  %v4412_v43 = vrot.slane %v2675_v4, 1  ;;  %v812_v2 = vmul.f32 %v2409_v8, %v2665_v32 }
  0x32   : > { %v679_v27 = vrot.slane %v574_v54, 2  ;;  %v1318_v20 = vadd.f32 %v1208_v55, %v1077_v50  ;;  %v881_v39 = vmul.f32 %v2411_v9, %v2665_v32  ;;  %v2697_v24 = vmul.f32 %v2411_v9, %v2670_v42  ;;  %v2703_v54 = vld [vmem:[%s2416_s30 + $0x98] sm:$0xff] }
  0x33   : > { %v4546_v18 = vrot.slane %v2658_v40, 2  ;;  %4547 = vst [vmem:[#allocation13_spill] sm:$0xff] %v2703_v54  ;;  %v439_v55 = vsel %vm416_vm0, %v437_v57, %v4412_v43  ;;  %v1122_v50 = vmul.f32 %v2418_v10, %v2665_v32  ;;  %v2712_v44 = vmul.f32 %v2418_v10, %v2670_v42 }
  0x34   : > { %4545 = vst [vmem:[#allocation12_spill] sm:$0xff] %v2697_v24  ;;  %v1383_v53 = vadd.f32 %v1351_v62, %v1318_v20  ;;  %v537_v11 = vadd.f32 %v439_v55, %v263_v36  ;;  %v4548_v52 = vrot.slane %v2684_v56, 2  ;;  %v4417_v21 = vrot.slane %v2697_v24, 1 }
  0x35   : > { %v1755_v48 = vsel %vm658_vm1, %v1753_v34, %v4546_v18  ;;  %v985_v18 = vrot.slane %v881_v39, 1  ;;  %v1226_v13 = vrot.slane %v1122_v50, 2  ;;  %v4420_v57 = vrot.slane %v2712_v44, 2 }
  0x36   : > { %v681_v34 = vsel %vm658_vm1, %v679_v27, %v4548_v52  ;;  %v1428_v43 = vmul.f32 %v2429_v15, %v2690_v33  ;;  %v1624_v32 = vadd.f32 %v1514_v17, %v1383_v53  ;;  %v2723_v20 = vmul.f32 %v2429_v15, %v2703_v54  ;;  %v224_v27 = vld [vmem:[%s2416_s30 + $0xd0] sm:$0x3] }
  0x37   : > { %v779_v4 = vadd.f32 %v681_v34, %v537_v11  ;;  %v1669_v62 = vmul.f32 %v2462_v30, %v2690_v33  ;;  %v987_v52 = vsel %vm416_vm0, %v985_v18, %v4417_v21  ;;  %v1359_v36 = vmul.f32 %v2427_v14, %v2690_v33  ;;  %v2738_v11 = vld [vmem:[%s2416_s30 + $0xe8] sm:$0x3]  ;;  %v2746_v21 = vld [vmem:[%s2416_s30 + $0x100] sm:$0x3] }
  0x38   : > { %4549 = vst [vmem:[#allocation14_spill] sm:$0xff] %v2723_v20  ;;  %v1532_v39 = vrot.slane %v1428_v43, 1  ;;  %v2735_v17 = vmul.f32 %v2462_v30, %v2703_v54  ;;  %v1865_v53 = vadd.f32 %v1755_v48, %v1624_v32  ;;  %v4421_v50 = vrot.slane %v2723_v20, 1 }
  0x39   : > { %4551 = vst [vmem:[#allocation16_spill] sm:$0xff] %v2738_v11  ;;  %v844_v55 = vadd.f32 %v812_v2, %v779_v4  ;;  %v1773_v34 = vrot.slane %v1669_v62, 2  ;;  %v1228_v24 = vsel %vm658_vm1, %v1226_v13, %v4420_v57  ;;  %v346_v43 = vmul.f32 %v2405_v6, %v224_v27 }
  0x3a   : > { %4550 = vst [vmem:[#allocation15_spill] sm:$0xff] %v2735_v17  ;;  %v4425_v18 = vrot.slane %v2735_v17, 2  ;;  %v588_v33 = vmul.f32 %v2407_v7, %v224_v27  ;;  %2242 = vmatmul.msk.f32.vlgmr.msra.gmra.mxu0 %vm1905_vm2, %v1865_v53  ;;  %v1534_v2 = vsel %vm416_vm0, %v1532_v39, %v4421_v50  ;;  %v272_v4 = vmul.f32 %v2403_v5, %v2422_v12  ;;  %v2779_v17 = vld [vmem:[%s2416_s30 + $0x148] sm:$0x3] }
  0x3b   : > { %v1085_v32 = vadd.f32 %v987_v52, %v844_v55  ;;  %v895_v13 = vmul.f32 %v2411_v9, %v2738_v11  ;;  %v460_v48 = vrot.slane %v346_v43, 1  ;;  %v821_v57 = vmul.f32 %v2409_v8, %v2432_v16  ;;  %v236_v55 = vld [vmem:[%s2416_s30 + $0x130] sm:$0x3] }
  0x3c   : > { %v702_v62 = vrot.slane %v588_v33, 2  ;;  %v1136_v27 = vmul.f32 %v2418_v10, %v2738_v11  ;;  %v1775_v39 = vsel %vm658_vm1, %v1773_v34, %v4425_v18  ;;  %v1442_v12 = vmul.f32 %v2429_v15, %v2746_v21 }
  0x3d   : > { %v1326_v52 = vadd.f32 %v1228_v24, %v1085_v32  ;;  %v1008_v53 = vrot.slane %v895_v13, 1  ;;  %v4552_v43 = vrot.slane %v2438_v19, 1  ;;  %v4553_v50 = vrot.slane %v2446_v22, 2 }
  0x3e   : > { %v1249_v11 = vrot.slane %v1136_v27, 2  ;;  %v1683_v24 = vmul.f32 %v2462_v30, %v2746_v21  ;;  %v1368_v13 = vmul.f32 %v2427_v14, %v2465_v31  ;;  %v1555_v18 = vrot.slane %v1442_v12, 1 }
  0x3f   : > { %v461_v33 = vsel %vm416_vm0, %v4552_v43, %v460_v48  ;;  %v703_v20 = vsel %vm658_vm1, %v4553_v50, %v702_v62  ;;  %v1391_v32 = vadd.f32 %v1359_v36, %v1326_v52  ;;  %v4554_v19 = vrot.slane %v2454_v25, 1 }
  0x40   : > { %v546_v34 = vadd.f32 %v461_v33, %v272_v4  ;;  %v4555_v22 = vrot.slane %v2471_v35, 2  ;;  %v1796_v62 = vrot.slane %v1683_v24, 2  ;;  %v358_v27 = vmul.f32 %v2405_v6, %v236_v55  ;;  %v2789_v4 = vld [vmem:[%s2416_s30 + $0x160] sm:$0x3] }
  0x41   : > { %v1009_v48 = vsel %vm416_vm0, %v4554_v19, %v1008_v53  ;;  %v1632_v43 = vadd.f32 %v1534_v2, %v1391_v32  ;;  %v280_v52 = vmul.f32 %v2403_v5, %v2489_v45  ;;  %v600_v12 = vmul.f32 %v2407_v7, %v236_v55  ;;  %v200_v19 = vld [vmem:[%s2416_s30 + $0x10] sm:$0x3] }
  0x42   : > { %v1250_v50 = vsel %vm658_vm1, %v4555_v22, %v1249_v11  ;;  %v788_v36 = vadd.f32 %v703_v20, %v546_v34  ;;  %v4556_v25 = vrot.slane %v2493_v46, 1  ;;  %v4557_v35 = vrot.slane %v2499_v49, 2 }
  0x43   : > { %v480_v33 = vrot.slane %v358_v27, 1  ;;  %v907_v20 = vmul.f32 %v2411_v9, %v2779_v17  ;;  %v1873_v2 = vadd.f32 %v1775_v39, %v1632_v43  ;;  %v722_v32 = vrot.slane %v600_v12, 2 }
  0x44   : > { %v1556_v53 = vsel %vm416_vm0, %v4556_v25, %v1555_v18  ;;  %v1797_v11 = vsel %vm658_vm1, %v4557_v35, %v1796_v62  ;;  %v853_v24 = vadd.f32 %v821_v57, %v788_v36  ;;  %v1148_v45 = vmul.f32 %v2418_v10, %v2779_v17  ;;  %v2824_v35 = vld [vmem:[%s2416_s30 + $0x28] sm:$0x3] }
  0x45   : > { %v4558_v55 = vrot.slane %v2513_v58, 1  ;;  %v829_v49 = vmul.f32 %v2409_v8, %v2516_v60  ;;  %v1028_v18 = vrot.slane %v907_v20, 1  ;;  %v1454_v34 = vmul.f32 %v2429_v15, %v2789_v4  ;;  %2250 = vmatmul.msk.f32.vlgmr.msra.gmra.mxu1 %vm1905_vm2, %v1873_v2 }
  0x46   : > { %v1094_v57 = vadd.f32 %v1009_v48, %v853_v24  ;;  %v4559_v22 = vrot.slane %v2521_v63, 2  ;;  %v1269_v27 = vrot.slane %v1148_v45, 2  ;;  %v4560_v58 = vrot.slane %v2546_v26, 1 }
  0x47   : > { %v481_v46 = vsel %vm416_vm0, %v4558_v55, %v480_v33  ;;  %v1376_v36 = vmul.f32 %v2427_v14, %v2539_v23  ;;  %v1575_v12 = vrot.slane %v1454_v34, 1  ;;  %v1695_v25 = vmul.f32 %v2462_v30, %v2789_v4 }
  0x48   : > { %v554_v39 = vadd.f32 %v481_v46, %v280_v52  ;;  %v723_v62 = vsel %vm658_vm1, %v4559_v22, %v722_v32  ;;  %v1029_v43 = vsel %vm416_vm0, %v4560_v58, %v1028_v18  ;;  %v1335_v48 = vadd.f32 %v1250_v50, %v1094_v57  ;;  %v2837_v50 = vld [vmem:[%s2416_s30 + $0x40] sm:$0x3] }
  0x49   : > { %v256_v63 = vmul.f32 %v2403_v5, %v2581_v61  ;;  %v322_v33 = vmul.f32 %v2405_v6, %v200_v19  ;;  %v4561_v26 = vrot.slane %v2552_v29, 2  ;;  %v4562_v2 = vrot.slane %v2565_v51, 1 }
  0x4a   : > { %v796_v52 = vadd.f32 %v723_v62, %v554_v39  ;;  %v1816_v32 = vrot.slane %v1695_v25, 2  ;;  %v564_v45 = vmul.f32 %v2407_v7, %v200_v19  ;;  %v1400_v55 = vadd.f32 %v1368_v13, %v1335_v48  ;;  %v212_v48 = vld [vmem:[%s2416_s30 + $0x70] sm:$0x3] }
  0x4b   : > { %v1270_v20 = vsel %vm658_vm1, %v4561_v26, %v1269_v27  ;;  %v1576_v24 = vsel %vm416_vm0, %v4562_v2, %v1575_v12  ;;  %v420_v18 = vrot.slane %v322_v33, 1  ;;  %v871_v61 = vmul.f32 %v2411_v9, %v2824_v35 }
  0x4c   : > { %v861_v46 = vadd.f32 %v829_v49, %v796_v52  ;;  %v4563_v29 = vrot.slane %v2578_v59, 2  ;;  %v662_v57 = vrot.slane %v564_v45, 2  ;;  %v805_v51 = vmul.f32 %v2409_v8, %v2594_v3 }
  0x4d   : > { %v1112_v13 = vmul.f32 %v2418_v10, %v2824_v35  ;;  %v1641_v49 = vadd.f32 %v1556_v53, %v1400_v55  ;;  %v4564_v39 = vrot.slane %v2598_v47, 1  ;;  %v968_v62 = vrot.slane %v871_v61, 1 }
  0x4e   : > { %v1817_v34 = vsel %vm658_vm1, %v4563_v29, %v1816_v32  ;;  %v1102_v19 = vadd.f32 %v1029_v43, %v861_v46  ;;  %v4565_v59 = vrot.slane %v2606_v1, 2  ;;  %v1418_v25 = vmul.f32 %v2429_v15, %v2837_v50  ;;  %v2862_v43 = vld [vmem:[%s2416_s30 + $0x88] sm:$0x3]  ;;  %v2877_v29 = vld [vmem:[%s2416_s30 + $0xa0] sm:$0x3] }
  0x4f   : > { %v421_v22 = vsel %vm416_vm0, %v4564_v39, %v420_v18  ;;  %v1209_v12 = vrot.slane %v1112_v13, 2  ;;  %v1882_v52 = vadd.f32 %v1797_v11, %v1641_v49  ;;  %v1352_v53 = vmul.f32 %v2427_v14, %v2625_v41  ;;  %4566 = vst [vmem:[#allocation17_spill] sm:$0xff] %v2862_v43 }
  0x50   : > { %v530_v27 = vadd.f32 %v421_v22, %v256_v63  ;;  %v663_v58 = vsel %vm658_vm1, %v4565_v59, %v662_v57  ;;  %v1343_v33 = vadd.f32 %v1270_v20, %v1102_v19  ;;  %v1659_v47 = vmul.f32 %v2462_v30, %v2837_v50  ;;  %4570 = vst [vmem:[#allocation18_spill] sm:$0xff] %v2877_v29 }
  0x51   : > { %v4567_v1 = vrot.slane %v2620_v37, 1  ;;  %v4568_v2 = vrot.slane %v2632_v38, 2  ;;  %v1515_v11 = vrot.slane %v1418_v25, 1  ;;  %2259 = vmatmul.msk.f32.gmra.mxu2 %vm1905_vm2, %v1882_v52  ;;  %v334_v55 = vmul.f32 %v2405_v6, %v212_v48 }
  0x52   : > { %v772_v63 = vadd.f32 %v663_v58, %v530_v27  ;;  %v1408_v20 = vadd.f32 %v1376_v36, %v1343_v33  ;;  %v1756_v45 = vrot.slane %v1659_v47, 2  ;;  %v576_v46 = vmul.f32 %v2407_v7, %v212_v48 }
  0x53   : > { %v969_v26 = vsel %vm416_vm0, %v4567_v1, %v968_v62  ;;  %v1210_v32 = vsel %vm658_vm1, %v4568_v2, %v1209_v12  ;;  %v4569_v61 = vrot.slane %v2645_v28, 1  ;;  %v264_v38 = vmul.f32 %v2403_v5, %v2651_v0  ;;  %v4572_v0 = vld [vmem:[#allocation10_spill] sm:$0xff] }
  0x54   : > { %v837_v18 = vadd.f32 %v805_v51, %v772_v63  ;;  %v883_v57 = vmul.f32 %v2411_v9, %v2862_v43  ;;  %v1649_v13 = vadd.f32 %v1576_v24, %v1408_v20  ;;  %v440_v36 = vrot.slane %v334_v55, 1 }
  0x55   : > { %v1516_v37 = vsel %vm416_vm0, %v4569_v61, %v1515_v11  ;;  %v682_v49 = vrot.slane %v576_v46, 2  ;;  %v813_v19 = vmul.f32 %v2409_v8, %v2670_v42  ;;  %v4571_v51 = vrot.slane %v2658_v40, 2 }
  0x56   : > { %v1078_v39 = vadd.f32 %v969_v26, %v837_v18  ;;  %v988_v22 = vrot.slane %v883_v57, 1  ;;  %v1124_v62 = vmul.f32 %v2418_v10, %v2862_v43  ;;  %v1890_v27 = vadd.f32 %v1817_v34, %v1649_v13  ;;  %v4575_v34 = vld [vmem:[#allocation12_spill] sm:$0xff]  ;;  %v4577_v26 = vld [vmem:[#allocation2_spill] sm:$0xff] }
  0x57   : > { %v1757_v28 = vsel %vm658_vm1, %v4571_v51, %v1756_v45  ;;  %v4573_v59 = vrot.slane %v4572_v0, 1  ;;  %v4574_v24 = vrot.slane %v2684_v56, 2  ;;  %v1430_v25 = vmul.f32 %v2429_v15, %v2877_v29 }
  0x58   : > { %v1319_v48 = vadd.f32 %v1210_v32, %v1078_v39  ;;  %v1229_v52 = vrot.slane %v1124_v62, 2  ;;  %v1360_v33 = vmul.f32 %v2427_v14, %v2703_v54  ;;  %2267 = vmatmul.msk.f32.gmra.mxu3 %vm1905_vm2, %v1890_v27  ;;  %v4576_v47 = vrot.slane %v4575_v34, 1 }
  0x59   : > { %v441_v58 = vsel %vm416_vm0, %v4573_v59, %v440_v36  ;;  %v683_v12 = vsel %vm658_vm1, %v4574_v24, %v682_v49  ;;  %v1535_v1 = vrot.slane %v1430_v25, 1  ;;  %v1671_v56 = vmul.f32 %v2462_v30, %v2877_v29  ;;  %v4579_v49 = vld [vmem:[#allocation14_spill] sm:$0xff]  ;;  %v2939_v24 = vld [vmem:[%s2416_s30 + $0x110] sm:$0xff] }
  0x5a   : > { %v538_v40 = vadd.f32 %v441_v58, %v264_v38  ;;  %v989_v63 = vsel %vm416_vm0, %v4576_v47, %v988_v22  ;;  %v347_v2 = vmul.f32 %v2405_v6, %v4577_v26  ;;  %v1384_v11 = vadd.f32 %v1352_v53, %v1319_v48  ;;  %v4581_v22 = vld [vmem:[#allocation3_spill] sm:$0xff] }
  0x5b   : > { %v273_v20 = vmul.f32 %v2403_v5, %v4577_v26  ;;  %v2912_v45 = vmul.f32 %v2405_v6, %v2432_v16  ;;  %v4578_v55 = vrot.slane %v2712_v44, 2  ;;  %v1776_v18 = vrot.slane %v1671_v56, 2 }
  0x5c   : > { %v780_v32 = vadd.f32 %v683_v12, %v538_v40  ;;  %v462_v61 = vrot.slane %v347_v2, 1  ;;  %v589_v38 = vmul.f32 %v2407_v7, %v4577_v26  ;;  %v1625_v53 = vadd.f32 %v1516_v37, %v1384_v11 }
  0x5d   : > { %v1230_v46 = vsel %vm658_vm1, %v4578_v55, %v1229_v52  ;;  %v4437_v13 = vrot.slane %v2912_v45, 1  ;;  %v2922_v36 = vmul.f32 %v2407_v7, %v2432_v16  ;;  %v4580_v39 = vrot.slane %v4579_v49, 1  ;;  %v4583_v52 = vld [vmem:[#allocation15_spill] sm:$0xff] }
  0x5e   : > { %v845_v57 = vadd.f32 %v813_v19, %v780_v32  ;;  %v704_v51 = vrot.slane %v589_v38, 2  ;;  %v822_v62 = vmul.f32 %v2409_v8, %v4581_v22  ;;  %v896_v27 = vmul.f32 %v2411_v9, %v4581_v22  ;;  %v2932_v19 = vld [vmem:[%s2416_s30 + $0x108] sm:$0xff] }
  0x5f   : > { %v1536_v44 = vsel %vm416_vm0, %v4580_v39, %v1535_v1  ;;  %v1866_v0 = vadd.f32 %v1757_v28, %v1625_v53  ;;  %4582 = vst [vmem:[#allocation10_spill] sm:$0xff] %v2932_v19  ;;  %v464_v59 = vsel %vm416_vm0, %v462_v61, %v4437_v13  ;;  %v4436_v58 = vrot.slane %v2922_v36, 2 }
  0x60   : > { %v1086_v37 = vadd.f32 %v989_v63, %v845_v57  ;;  %v547_v12 = vadd.f32 %v464_v59, %v273_v20  ;;  %v2943_v25 = vmul.f32 %v2411_v9, %v2465_v31  ;;  %v1010_v48 = vrot.slane %v896_v27, 1  ;;  %v4585_v27 = vld [vmem:[#allocation4_spill] sm:$0xff] }
  0x61   : > { %v1137_v28 = vmul.f32 %v2418_v10, %v4581_v22  ;;  %2243 = vmatmul.msk.f32.gmra.mxu0 %vm1905_vm2, %v1866_v0  ;;  %v4584_v34 = vrot.slane %v4583_v52, 2  ;;  %v706_v63 = vsel %vm658_vm1, %v704_v51, %v4436_v58  ;;  %v2956_v1 = vmul.f32 %v2418_v10, %v2465_v31 }
  0x62   : > { %v1327_v40 = vadd.f32 %v1230_v46, %v1086_v37  ;;  %v789_v56 = vadd.f32 %v706_v63, %v547_v12  ;;  %v4434_v26 = vrot.slane %v2943_v25, 1  ;;  %v1443_v11 = vmul.f32 %v2429_v15, %v2932_v19 }
  0x63   : > { %v1777_v47 = vsel %vm658_vm1, %v4584_v34, %v1776_v18  ;;  %v1251_v2 = vrot.slane %v1137_v28, 2  ;;  %v4433_v20 = vrot.slane %v2956_v1, 2  ;;  %v2964_v55 = vmul.f32 %v2429_v15, %v2939_v24 }
  0x64   : > { %v1392_v32 = vadd.f32 %v1360_v33, %v1327_v40  ;;  %v1684_v46 = vmul.f32 %v2462_v30, %v2932_v19  ;;  %v854_v18 = vadd.f32 %v822_v62, %v789_v56  ;;  %v1012_v61 = vsel %vm416_vm0, %v1010_v48, %v4434_v26  ;;  %v4586_v56 = vld [vmem:[#allocation5_spill] sm:$0xff] }
  0x65   : > { %v1557_v38 = vrot.slane %v1443_v11, 1  ;;  %v2973_v53 = vmul.f32 %v2462_v30, %v2939_v24  ;;  %v1253_v57 = vsel %vm658_vm1, %v1251_v2, %v4433_v20  ;;  %v4432_v49 = vrot.slane %v2964_v55, 1 }
  0x66   : > { %v1633_v33 = vadd.f32 %v1536_v44, %v1392_v32  ;;  %v1798_v39 = vrot.slane %v1684_v46, 2  ;;  %v1095_v51 = vadd.f32 %v1012_v61, %v854_v18  ;;  %v1369_v22 = vmul.f32 %v2427_v14, %v2932_v19  ;;  %v3007_v32 = vld [vmem:[%s2416_s30 + $0x168] sm:$0xff]  ;;  %v3010_v46 = vld [vmem:[%s2416_s30 + $0x170] sm:$0xff] }
  0x67   : > { %v4431_v62 = vrot.slane %v2973_v53, 2  ;;  %v359_v0 = vmul.f32 %v2405_v6, %v4585_v27  ;;  %v281_v44 = vmul.f32 %v2403_v5, %v4585_v27  ;;  %v2988_v59 = vmul.f32 %v2405_v6, %v2516_v60  ;;  %4587 = vst [vmem:[#allocation12_spill] sm:$0xff] %v3007_v32 }
  0x68   : > { %v1874_v37 = vadd.f32 %v1777_v47, %v1633_v33  ;;  %v601_v12 = vmul.f32 %v2407_v7, %v4585_v27  ;;  %v1336_v48 = vadd.f32 %v1253_v57, %v1095_v51  ;;  %v1559_v28 = vsel %vm416_vm0, %v1557_v38, %v4432_v49  ;;  %v4589_v49 = vld [vmem:[#allocation7_spill] sm:$0xff] }
  0x69   : > { %v482_v40 = vrot.slane %v359_v0, 1  ;;  %v2997_v52 = vmul.f32 %v2407_v7, %v2516_v60  ;;  %v1800_v34 = vsel %vm658_vm1, %v1798_v39, %v4431_v62  ;;  %v4427_v47 = vrot.slane %v2988_v59, 1 }
  0x6a   : > { %2251 = vmatmul.msk.f32.gmra.mxu1 %vm1905_vm2, %v1874_v37  ;;  %v724_v63 = vrot.slane %v601_v12, 2  ;;  %v908_v2 = vmul.f32 %v2411_v9, %v4586_v56  ;;  %v1401_v11 = vadd.f32 %v1369_v22, %v1336_v48  ;;  %v3015_v61 = vmul.f32 %v2411_v9, %v2539_v23 }
  0x6b   : > { %v4429_v18 = vrot.slane %v2997_v52, 2  ;;  %v1149_v38 = vmul.f32 %v2418_v10, %v4586_v56  ;;  %v484_v33 = vsel %vm416_vm0, %v482_v40, %v4427_v47  ;;  %v830_v57 = vmul.f32 %v2409_v8, %v4586_v56 }
  0x6c   : > { %v1030_v39 = vrot.slane %v908_v2, 1  ;;  %v3026_v51 = vmul.f32 %v2418_v10, %v2539_v23  ;;  %v1642_v22 = vadd.f32 %v1559_v28, %v1401_v11  ;;  %v555_v27 = vadd.f32 %v484_v33, %v281_v44 }
  0x6d   : > { %v726_v0 = vsel %vm658_vm1, %v724_v63, %v4429_v18  ;;  %v4428_v37 = vrot.slane %v3015_v61, 1  ;;  %v1271_v12 = vrot.slane %v1149_v38, 2  ;;  %v1455_v40 = vmul.f32 %v2429_v15, %v3007_v32 }
  0x6e   : > { %v4430_v48 = vrot.slane %v3026_v51, 2  ;;  %v3037_v56 = vmul.f32 %v2429_v15, %v3010_v46  ;;  %v1883_v2 = vadd.f32 %v1800_v34, %v1642_v22  ;;  %v797_v47 = vadd.f32 %v726_v0, %v555_v27  ;;  %v4588_v0 = vld [vmem:[#allocation6_spill] sm:$0xff] }
  0x6f   : > { %v1377_v44 = vmul.f32 %v2427_v14, %v3007_v32  ;;  %v1696_v28 = vmul.f32 %v2462_v30, %v3007_v32  ;;  %v1032_v63 = vsel %vm416_vm0, %v1030_v39, %v4428_v37  ;;  %v1577_v11 = vrot.slane %v1455_v40, 1 }
  0x70   : > { %v4435_v38 = vrot.slane %v3037_v56, 1  ;;  %v3049_v33 = vmul.f32 %v2462_v30, %v3010_v46  ;;  %2260 = vmatmul.msk.f32.gmra.mxu2 %vm1905_vm2, %v1883_v2  ;;  %v862_v34 = vadd.f32 %v830_v57, %v797_v47  ;;  %v1273_v22 = vsel %vm658_vm1, %v1271_v12, %v4430_v48 }
  0x71   : > { %v1818_v27 = vrot.slane %v1696_v28, 2  ;;  %v323_v39 = vmul.f32 %v2405_v6, %v4588_v0  ;;  %v257_v37 = vmul.f32 %v2403_v5, %v4588_v0  ;;  %v3062_v18 = vmul.f32 %v2405_v6, %v2594_v3 }
  0x72   : > { %v4444_v40 = vrot.slane %v3049_v33, 2  ;;  %v565_v47 = vmul.f32 %v2407_v7, %v4588_v0  ;;  %v1103_v57 = vadd.f32 %v1032_v63, %v862_v34  ;;  %v1579_v12 = vsel %vm416_vm0, %v1577_v11, %v4435_v38  ;;  %v3079_v63 = vld [vmem:[%s2416_s30 + $0x48] sm:$0xff]  ;;  %v3082_v34 = vld [vmem:[%s2416_s30 + $0x50] sm:$0xff] }
  0x73   : > { %v422_v2 = vrot.slane %v323_v39, 1  ;;  %v3071_v28 = vmul.f32 %v2407_v7, %v2594_v3  ;;  %v4445_v48 = vrot.slane %v3062_v18, 1  ;;  %v806_v20 = vmul.f32 %v2409_v8, %v4589_v49  ;;  %4590 = vst [vmem:[#allocation2_spill] sm:$0xff] %v3079_v63 }
  0x74   : > { %v664_v62 = vrot.slane %v565_v47, 2  ;;  %v872_v26 = vmul.f32 %v2411_v9, %v4589_v49  ;;  %v1344_v0 = vadd.f32 %v1273_v22, %v1103_v57  ;;  %v3087_v39 = vmul.f32 %v2411_v9, %v2625_v41 }
  0x75   : > { %v1113_v47 = vmul.f32 %v2418_v10, %v4589_v49  ;;  %v1820_v38 = vsel %vm658_vm1, %v1818_v27, %v4444_v40  ;;  %v424_v22 = vsel %vm416_vm0, %v422_v2, %v4445_v48  ;;  %v3099_v58 = vmul.f32 %v2418_v10, %v2625_v41 }
  0x76   : > { %4591 = vst [vmem:[#allocation14_spill] sm:$0xff] %v3087_v39  ;;  %v970_v57 = vrot.slane %v872_v26, 1  ;;  %v1409_v13 = vadd.f32 %v1377_v44, %v1344_v0  ;;  %v531_v11 = vadd.f32 %v424_v22, %v257_v37  ;;  %v4593_v32 = vrot.slane %v3071_v28, 2 }
  0x77   : > { %4592 = vst [vmem:[#allocation3_spill] sm:$0xff] %v3099_v58  ;;  %v4446_v49 = vrot.slane %v3087_v39, 1  ;;  %v1211_v29 = vrot.slane %v1113_v47, 2  ;;  %v4448_v27 = vrot.slane %v3099_v58, 2  ;;  %v1419_v40 = vmul.f32 %v2429_v15, %v3079_v63 }
  0x78   : > { %v666_v19 = vsel %vm658_vm1, %v664_v62, %v4593_v32  ;;  %v3110_v26 = vmul.f32 %v2429_v15, %v3082_v34  ;;  %v1650_v2 = vadd.f32 %v1579_v12, %v1409_v13  ;;  %v1353_v37 = vmul.f32 %v2427_v14, %v3079_v63 }
  0x79   : > { %v773_v48 = vadd.f32 %v666_v19, %v531_v11  ;;  %v1660_v62 = vmul.f32 %v2462_v30, %v3079_v63  ;;  %v972_v32 = vsel %vm416_vm0, %v970_v57, %v4446_v49  ;;  %v1517_v44 = vrot.slane %v1419_v40, 1  ;;  %v4595_v57 = vld [vmem:[#allocation8_spill] sm:$0xff] }
  0x7a   : > { %4594 = vst [vmem:[#allocation15_spill] sm:$0xff] %v3110_v26  ;;  %v4447_v0 = vrot.slane %v3110_v26, 1  ;;  %v3122_v47 = vmul.f32 %v2462_v30, %v3082_v34  ;;  %v1891_v22 = vadd.f32 %v1820_v38, %v1650_v2  ;;  %v1213_v19 = vsel %vm658_vm1, %v1211_v29, %v4448_v27 }
  0x7b   : > { %v838_v13 = vadd.f32 %v806_v20, %v773_v48  ;;  %v1758_v12 = vrot.slane %v1660_v62, 2  ;;  %v265_v40 = vmul.f32 %v2403_v5, %v4595_v57  ;;  %v335_v49 = vmul.f32 %v2405_v6, %v4595_v57 }
  0x7c   : > { %v1519_v11 = vsel %vm416_vm0, %v1517_v44, %v4447_v0  ;;  %v3136_v20 = vmul.f32 %v2405_v6, %v2670_v42  ;;  %2268 = vmatmul.msk.f32.gmra.mxu3 %vm1905_vm2, %v1891_v22  ;;  %v577_v38 = vmul.f32 %v2407_v7, %v4595_v57  ;;  %v3144_v2 = vmul.f32 %v2407_v7, %v2670_v42  ;;  %v4597_v0 = vld [vmem:[#allocation11_spill] sm:$0xff]  ;;  %v3160_v42 = vld [vmem:[%s2416_s30 + $0xb0] sm:$0xff] }
  0x7d   : > { %v1079_v29 = vadd.f32 %v972_v32, %v838_v13  ;;  %v442_v62 = vrot.slane %v335_v49, 1  ;;  %v814_v27 = vmul.f32 %v2409_v8, %v4597_v0  ;;  %v884_v63 = vmul.f32 %v2411_v9, %v4597_v0  ;;  %v3152_v32 = vld [vmem:[%s2416_s30 + $0xa8] sm:$0xff]  ;;  %4599 = vst [vmem:[#allocation6_spill] sm:$0xff] %v3160_v42 }
  0x7e   : > { %4596 = vst [vmem:[#allocation4_spill] sm:$0xff] %v3136_v20  ;;  %v4458_v44 = vrot.slane %v3136_v20, 1  ;;  %v684_v13 = vrot.slane %v577_v38, 2  ;;  %v4460_v48 = vrot.slane %v3144_v2, 2  ;;  %v3157_v57 = vmul.f32 %v2411_v9, %v2703_v54 }
  0x7f   : > { %v1320_v22 = vadd.f32 %v1213_v19, %v1079_v29  ;;  %4598 = vst [vmem:[#allocation5_spill] sm:$0xff] %v3152_v32  ;;  %v990_v26 = vrot.slane %v884_v63, 1  ;;  %v1125_v43 = vmul.f32 %v2418_v10, %v4597_v0  ;;  %v3169_v19 = vmul.f32 %v2418_v10, %v2703_v54 }
  0x80   : > { %v444_v49 = vsel %vm416_vm0, %v442_v62, %v4458_v44  ;;  %v686_v58 = vsel %vm658_vm1, %v684_v13, %v4460_v48  ;;  %v4461_v39 = vrot.slane %v3157_v57, 1  ;;  %v4600_v20 = vrot.slane %v3122_v47, 2 }
  0x81   : > { %v1385_v29 = vadd.f32 %v1353_v37, %v1320_v22  ;;  %v539_v38 = vadd.f32 %v444_v49, %v265_v40  ;;  %v1231_v63 = vrot.slane %v1125_v43, 2  ;;  %v4464_v44 = vrot.slane %v3169_v19, 2 }
  0x82   : > { %v1760_v62 = vsel %vm658_vm1, %v1758_v12, %v4600_v20  ;;  %v1431_v0 = vmul.f32 %v2429_v15, %v3152_v32  ;;  %v1361_v40 = vmul.f32 %v2427_v14, %v3152_v32  ;;  %v3185_v22 = vmul.f32 %v2429_v15, %v3160_v42 }
  0x83   : > { %v1626_v54 = vadd.f32 %v1519_v11, %v1385_v29  ;;  %v781_v37 = vadd.f32 %v686_v58, %v539_v38  ;;  %v992_v12 = vsel %vm416_vm0, %v990_v26, %v4461_v39  ;;  %v1672_v20 = vmul.f32 %v2462_v30, %v3152_v32  ;;  %v3202_v26 = vld [vmem:[%s2416_s30 + $0x118] sm:$0x3] }
  0x84   : > { %v1537_v43 = vrot.slane %v1431_v0, 1  ;;  %v3194_v13 = vmul.f32 %v2462_v30, %v3160_v42  ;;  %v1233_v49 = vsel %vm658_vm1, %v1231_v63, %v4464_v44  ;;  %v4465_v29 = vrot.slane %v3185_v22, 1  ;;  %v4601_v0 = vld [vmem:[#allocation16_spill] sm:$0xff] }
  0x85   : > { %v1867_v58 = vadd.f32 %v1760_v62, %v1626_v54  ;;  %v846_v11 = vadd.f32 %v814_v27, %v781_v37  ;;  %v1778_v38 = vrot.slane %v1672_v20, 2  ;;  %v349_v39 = vmul.f32 %v2405_v6, %v4601_v0 }
  0x86   : > { %v4466_v48 = vrot.slane %v3194_v13, 2  ;;  %v591_v32 = vmul.f32 %v2407_v7, %v4601_v0  ;;  %v1539_v27 = vsel %vm416_vm0, %v1537_v43, %v4465_v29  ;;  %v274_v62 = vmul.f32 %v2403_v5, %v2432_v16 }
  0x87   : > { %2244 = vmatmul.msk.f32.gmra.mxu0 %vm1905_vm2, %v1867_v58  ;;  %v1087_v54 = vadd.f32 %v992_v12, %v846_v11  ;;  %v898_v63 = vmul.f32 %v2411_v9, %v2746_v21  ;;  %v465_v37 = vrot.slane %v349_v39, 1  ;;  %v823_v44 = vmul.f32 %v2409_v8, %v2465_v31 }
  0x88   : > { %v707_v20 = vrot.slane %v591_v32, 2  ;;  %v1139_v0 = vmul.f32 %v2418_v10, %v2746_v21  ;;  %v1780_v12 = vsel %vm658_vm1, %v1778_v38, %v4466_v48  ;;  %v1445_v16 = vmul.f32 %v2429_v15, %v3202_v26 }
  0x89   : > { %v1328_v58 = vadd.f32 %v1233_v49, %v1087_v54  ;;  %v1013_v43 = vrot.slane %v898_v63, 1  ;;  %v4602_v11 = vrot.slane %v2912_v45, 1  ;;  %v4603_v32 = vrot.slane %v2922_v36, 2 }
  0x8a   : > { %v1254_v29 = vrot.slane %v1139_v0, 2  ;;  %v1686_v21 = vmul.f32 %v2462_v30, %v3202_v26  ;;  %v1370_v38 = vmul.f32 %v2427_v14, %v2939_v24  ;;  %v1560_v63 = vrot.slane %v1445_v16, 1 }
  0x8b   : > { %v466_v39 = vsel %vm416_vm0, %v4602_v11, %v465_v37  ;;  %v708_v31 = vsel %vm658_vm1, %v4603_v32, %v707_v20  ;;  %v1393_v49 = vadd.f32 %v1361_v40, %v1328_v58  ;;  %v4604_v48 = vrot.slane %v2943_v25, 1  ;;  %v3244_v40 = vld [vmem:[%s2416_s30 + $0x178] sm:$0x3] }
  0x8c   : > { %v548_v54 = vadd.f32 %v466_v39, %v274_v62  ;;  %v4605_v37 = vrot.slane %v2956_v1, 2  ;;  %v1801_v11 = vrot.slane %v1686_v21, 2  ;;  %v361_v20 = vmul.f32 %v2405_v6, %v2779_v17 }
  0x8d   : > { %v1014_v45 = vsel %vm416_vm0, %v4604_v48, %v1013_v43  ;;  %v1634_v0 = vadd.f32 %v1539_v27, %v1393_v49  ;;  %v282_v62 = vmul.f32 %v2403_v5, %v2516_v60  ;;  %v603_v25 = vmul.f32 %v2407_v7, %v2779_v17 }
  0x8e   : > { %v1255_v36 = vsel %vm658_vm1, %v4605_v37, %v1254_v29  ;;  %v790_v30 = vadd.f32 %v708_v31, %v548_v54  ;;  %v4606_v48 = vrot.slane %v2964_v55, 1  ;;  %v4607_v29 = vrot.slane %v2973_v53, 2 }
  0x8f   : > { %v485_v43 = vrot.slane %v361_v20, 1  ;;  %v910_v27 = vmul.f32 %v2411_v9, %v2789_v4  ;;  %v1875_v16 = vadd.f32 %v1780_v12, %v1634_v0  ;;  %v727_v32 = vrot.slane %v603_v25, 2 }
  0x90   : > { %v1561_v1 = vsel %vm416_vm0, %v4606_v48, %v1560_v63  ;;  %v1802_v58 = vsel %vm658_vm1, %v4607_v29, %v1801_v11  ;;  %v855_v39 = vadd.f32 %v823_v44, %v790_v30  ;;  %v1151_v60 = vmul.f32 %v2418_v10, %v2789_v4  ;;  %v3279_v11 = vld [vmem:[%s4379_s1 + $0x8] ss:$0 sm:$0xff] }
  0x91   : > { %v4608_v17 = vrot.slane %v2988_v59, 1  ;;  %v831_v31 = vmul.f32 %v2409_v8, %v2539_v23  ;;  %v1033_v53 = vrot.slane %v910_v27, 1  ;;  %v1457_v21 = vmul.f32 %v2429_v15, %v3244_v40  ;;  %2252 = vmatmul.msk.f32.gmra.mxu1 %vm1905_vm2, %v1875_v16  ;;  %v3296_v16 = vld [vmem:[%s2416_s30 + $0x58] sm:$0x3] }
  0x92   : > { %v1096_v49 = vadd.f32 %v1014_v45, %v855_v39  ;;  %v4609_v44 = vrot.slane %v2997_v52, 2  ;;  %v1274_v4 = vrot.slane %v1151_v60, 2  ;;  %v4610_v59 = vrot.slane %v3015_v61, 1 }
  0x93   : > { %v486_v55 = vsel %vm416_vm0, %v4608_v17, %v485_v43  ;;  %v1378_v23 = vmul.f32 %v2427_v14, %v3010_v46  ;;  %v1580_v37 = vrot.slane %v1457_v21, 1  ;;  %v1698_v52 = vmul.f32 %v3279_v11, %v3244_v40 }
  0x94   : > { %v556_v12 = vadd.f32 %v486_v55, %v282_v62  ;;  %v728_v54 = vsel %vm658_vm1, %v4609_v44, %v727_v32  ;;  %v1034_v63 = vsel %vm416_vm0, %v4610_v59, %v1033_v53  ;;  %v1337_v45 = vadd.f32 %v1255_v36, %v1096_v49 }
  0x95   : > { %v258_v61 = vmul.f32 %v2403_v5, %v2594_v3  ;;  %v325_v0 = vmul.f32 %v2405_v6, %v2824_v35  ;;  %v4611_v30 = vrot.slane %v3026_v51, 2  ;;  %v4612_v25 = vrot.slane %v3037_v56, 1 }
  0x96   : > { %v798_v20 = vadd.f32 %v728_v54, %v556_v12  ;;  %v1821_v29 = vrot.slane %v1698_v52, 2  ;;  %v567_v43 = vmul.f32 %v2407_v7, %v2824_v35  ;;  %v1402_v36 = vadd.f32 %v1370_v38, %v1337_v45 }
  0x97   : > { %v1275_v62 = vsel %vm658_vm1, %v4611_v30, %v1274_v4  ;;  %v1581_v48 = vsel %vm416_vm0, %v4612_v25, %v1580_v37  ;;  %v425_v3 = vrot.slane %v325_v0, 1  ;;  %v874_v39 = vmul.f32 %v2411_v9, %v2837_v50  ;;  %v4616_v4 = vld [vmem:[#allocation14_spill] sm:$0xff]  ;;  %v4621_v25 = vld [vmem:[#allocation15_spill] sm:$0xff] }
  0x98   : > { %v863_v27 = vadd.f32 %v831_v31, %v798_v20  ;;  %v4613_v51 = vrot.slane %v3049_v33, 2  ;;  %v667_v60 = vrot.slane %v567_v43, 2  ;;  %v807_v56 = vmul.f32 %v2409_v8, %v2625_v41 }
  0x99   : > { %v1115_v17 = vmul.f32 %v2418_v10, %v2837_v50  ;;  %v1643_v35 = vadd.f32 %v1561_v1, %v1402_v36  ;;  %v4614_v55 = vrot.slane %v3062_v18, 1  ;;  %v973_v53 = vrot.slane %v874_v39, 1  ;;  %v3334_v36 = vld [vmem:[%s2416_s30 + $0xb8] sm:$0x3]  ;;  %v4625_v39 = vld [vmem:[#allocation18_spill] sm:$0xff] }
  0x9a   : > { %v1822_v32 = vsel %vm658_vm1, %v4613_v51, %v1821_v29  ;;  %v1104_v38 = vadd.f32 %v1034_v63, %v863_v27  ;;  %v4615_v49 = vrot.slane %v3071_v28, 2  ;;  %v1421_v44 = vmul.f32 %v2429_v15, %v3296_v16  ;;  %v4618_v63 = vld [vmem:[#allocation3_spill] sm:$0xff]  ;;  %4623 = vst [vmem:[#allocation7_spill] sm:$0xff] %v3334_v36  ;;  %v4624_v27 = vld [vmem:[#allocation9_spill] sm:$0xff] }
  0x9b   : > { %v426_v31 = vsel %vm416_vm0, %v4614_v55, %v425_v3  ;;  %v1214_v12 = vrot.slane %v1115_v17, 2  ;;  %v1884_v41 = vadd.f32 %v1802_v58, %v1643_v35  ;;  %v1354_v50 = vmul.f32 %v2427_v14, %v3082_v34  ;;  %v4626_v35 = vld [vmem:[#allocation13_spill] sm:$0xff] }
  0x9c   : > { %v532_v21 = vadd.f32 %v426_v31, %v258_v61  ;;  %v668_v33 = vsel %vm658_vm1, %v4615_v49, %v667_v60  ;;  %v1345_v54 = vadd.f32 %v1275_v62, %v1104_v38  ;;  %v1662_v18 = vmul.f32 %v3279_v11, %v3296_v16  ;;  %v4620_v61 = vld [vmem:[#allocation17_spill] sm:$0xff] }
  0x9d   : > { %v4617_v59 = vrot.slane %v4616_v4, 1  ;;  %v4619_v37 = vrot.slane %v4618_v63, 2  ;;  %v1520_v45 = vrot.slane %v1421_v44, 1  ;;  %2261 = vmatmul.msk.f32.gmra.mxu2 %vm1905_vm2, %v1884_v41  ;;  %v337_v0 = vmul.f32 %v2405_v6, %v4620_v61  ;;  %v2301_v63 = vld [vmem:[%s2416_s30 + $0xf0] sm:$0xff] }
  0x9e   : > { %v774_v1 = vadd.f32 %v668_v33, %v532_v21  ;;  %v1410_v58 = vadd.f32 %v1378_v23, %v1345_v54  ;;  %v1761_v20 = vrot.slane %v1662_v18, 2  ;;  %v579_v30 = vmul.f32 %v2407_v7, %v4620_v61  ;;  %v4628_v33 = vld [vmem:[#allocation4_spill] sm:$0xff] }
  0x9f   : > { %v974_v28 = vsel %vm416_vm0, %v4617_v59, %v973_v53  ;;  %v1215_v52 = vsel %vm658_vm1, %v4619_v37, %v1214_v12  ;;  %v4622_v29 = vrot.slane %v4621_v25, 1  ;;  %v266_v3 = vmul.f32 %v2403_v5, %v4624_v27 }
  0xa0   : > { %v839_v62 = vadd.f32 %v807_v56, %v774_v1  ;;  %v886_v23 = vmul.f32 %v2411_v9, %v4625_v39  ;;  %v1651_v51 = vadd.f32 %v1581_v48, %v1410_v58  ;;  %v445_v60 = vrot.slane %v337_v0, 1 }
  0xa1   : > { %v1521_v43 = vsel %vm416_vm0, %v4622_v29, %v1520_v45  ;;  %v687_v17 = vrot.slane %v579_v30, 2  ;;  %v815_v38 = vmul.f32 %v2409_v8, %v4626_v35  ;;  %v4627_v56 = vrot.slane %v3122_v47, 2 }
  0xa2   : > { %v1080_v55 = vadd.f32 %v974_v28, %v839_v62  ;;  %v993_v53 = vrot.slane %v886_v23, 1  ;;  %v1127_v21 = vmul.f32 %v2418_v10, %v4625_v39  ;;  %v1892_v49 = vadd.f32 %v1822_v32, %v1651_v51 }
  0xa3   : > { %v1762_v31 = vsel %vm658_vm1, %v4627_v56, %v1761_v20  ;;  %v4629_v12 = vrot.slane %v4628_v33, 1  ;;  %v4630_v44 = vrot.slane %v3144_v2, 2  ;;  %v1433_v47 = vmul.f32 %v2429_v15, %v3334_v36  ;;  %v3367_v20 = vld [vmem:[%s2416_s30 + $0xf8] sm:$0xff] }
  0xa4   : > { %v1321_v54 = vadd.f32 %v1215_v52, %v1080_v55  ;;  %v1234_v1 = vrot.slane %v1127_v21, 2  ;;  %v1362_v4 = vmul.f32 %v2427_v14, %v3160_v42  ;;  %2269 = vmatmul.msk.f32.gmra.mxu3 %vm1905_vm2, %v1892_v49  ;;  %v4631_v32 = vrot.slane %v3157_v57, 1 }
  0xa5   : > { %v446_v48 = vsel %vm416_vm0, %v4629_v12, %v445_v60  ;;  %v688_v41 = vsel %vm658_vm1, %v4630_v44, %v687_v17  ;;  %v1540_v28 = vrot.slane %v1433_v47, 1  ;;  %v1674_v2 = vmul.f32 %v3279_v11, %v3334_v36 }
  0xa6   : > { %v540_v18 = vadd.f32 %v446_v48, %v266_v3  ;;  %v994_v59 = vsel %vm416_vm0, %v4631_v32, %v993_v53  ;;  %v350_v37 = vmul.f32 %v2301_v63, %v2405_v6  ;;  %v1386_v45 = vadd.f32 %v1354_v50, %v1321_v54  ;;  %v3412_v54 = vld [vmem:[%s2416_s30 + $0x120] sm:$0xff]  ;;  %v3418_v32 = vld [vmem:[%s2416_s30 + $0x128] sm:$0xff] }
  0xa7   : > { %v275_v58 = vmul.f32 %v2301_v63, %v2403_v5  ;;  %v3371_v61 = vmul.f32 %v3367_v20, %v2405_v6  ;;  %v4632_v57 = vrot.slane %v3169_v19, 2  ;;  %v1781_v30 = vrot.slane %v1674_v2, 2  ;;  %v4634_v19 = vld [vmem:[#allocation10_spill] sm:$0xff]  ;;  %4636 = vst [vmem:[#allocation8_spill] sm:$0xff] %v3412_v54 }
  0xa8   : > { %v782_v52 = vadd.f32 %v688_v41, %v540_v18  ;;  %v467_v62 = vrot.slane %v350_v37, 1  ;;  %v592_v25 = vmul.f32 %v2301_v63, %v2407_v7  ;;  %v1627_v29 = vadd.f32 %v1521_v43, %v1386_v45 }
  0xa9   : > { %v1235_v0 = vsel %vm658_vm1, %v4632_v57, %v1234_v1  ;;  %v4480_v50 = vrot.slane %v3371_v61, 1  ;;  %v3380_v3 = vmul.f32 %v3367_v20, %v2407_v7  ;;  %v4633_v39 = vrot.slane %v3185_v22, 1 }
  0xaa   : > { %v847_v27 = vadd.f32 %v815_v38, %v782_v52  ;;  %v709_v51 = vrot.slane %v592_v25, 2  ;;  %v824_v60 = vmul.f32 %v2409_v8, %v4634_v19  ;;  %v899_v17 = vmul.f32 %v2411_v9, %v4634_v19  ;;  %v2305_v25 = vld [vmem:[%s2416_s30 + $0x150] sm:$0xff] }
  0xab   : > { %v1541_v23 = vsel %vm416_vm0, %v4633_v39, %v1540_v28  ;;  %v1868_v35 = vadd.f32 %v1762_v31, %v1627_v29  ;;  %v469_v38 = vsel %vm416_vm0, %v467_v62, %v4480_v50  ;;  %v4479_v55 = vrot.slane %v3380_v3, 2  ;;  %v2311_v50 = vld [vmem:[%s2416_s30 + $0x90] sm:$0xff] }
  0xac   : > { %v1088_v43 = vadd.f32 %v994_v59, %v847_v27  ;;  %v549_v56 = vadd.f32 %v469_v38, %v275_v58  ;;  %v3395_v22 = vmul.f32 %v2411_v9, %v2939_v24  ;;  %v1015_v53 = vrot.slane %v899_v17, 1 }
  0xad   : > { %v1140_v21 = vmul.f32 %v2418_v10, %v4634_v19  ;;  %2245 = vmatmul.msk.f32.gmra.mxu0 %vm1905_vm2, %v1868_v35  ;;  %v4635_v49 = vrot.slane %v3194_v13, 2  ;;  %v711_v12 = vsel %vm658_vm1, %v709_v51, %v4479_v55  ;;  %v3408_v48 = vmul.f32 %v2418_v10, %v2939_v24 }
  0xae   : > { %v1329_v31 = vadd.f32 %v1235_v0, %v1088_v43  ;;  %v791_v44 = vadd.f32 %v711_v12, %v549_v56  ;;  %v4478_v41 = vrot.slane %v3395_v22, 1  ;;  %v1446_v18 = vmul.f32 %v3412_v54, %v2429_v15  ;;  %v3469_v12 = vld [vmem:[%s2416_s30 + $0x188] sm:$0xff] }
  0xaf   : > { %v1782_v33 = vsel %vm658_vm1, %v4635_v49, %v1781_v30  ;;  %v1256_v47 = vrot.slane %v1140_v21, 2  ;;  %v4474_v1 = vrot.slane %v3408_v48, 2  ;;  %v3422_v59 = vmul.f32 %v3418_v32, %v2429_v15  ;;  %v4637_v21 = vld [vmem:[#allocation12_spill] sm:$0xff] }
  0xb0   : > { %v1394_v13 = vadd.f32 %v1362_v4, %v1329_v31  ;;  %v1687_v28 = vmul.f32 %v3412_v54, %v3279_v11  ;;  %v856_v2 = vadd.f32 %v824_v60, %v791_v44  ;;  %v1017_v63 = vsel %vm416_vm0, %v1015_v53, %v4478_v41 }
  0xb1   : > { %v1562_v37 = vrot.slane %v1446_v18, 1  ;;  %v3431_v4 = vmul.f32 %v3418_v32, %v3279_v11  ;;  %v1258_v52 = vsel %vm658_vm1, %v1256_v47, %v4474_v1  ;;  %v4473_v58 = vrot.slane %v3422_v59, 1 }
  0xb2   : > { %v1635_v45 = vadd.f32 %v1541_v23, %v1394_v13  ;;  %v1803_v57 = vrot.slane %v1687_v28, 2  ;;  %v1097_v0 = vadd.f32 %v1017_v63, %v856_v2  ;;  %v1371_v30 = vmul.f32 %v3412_v54, %v2427_v14  ;;  %v3444_v23 = vld [vmem:[%s2416_s30 + $0x158] sm:$0xff] }
  0xb3   : > { %v4472_v62 = vrot.slane %v3431_v4, 2  ;;  %v362_v29 = vmul.f32 %v2305_v25, %v2405_v6  ;;  %v283_v39 = vmul.f32 %v2305_v25, %v2403_v5  ;;  %v3448_v51 = vmul.f32 %v3444_v23, %v2405_v6 }
  0xb4   : > { %v1876_v27 = vadd.f32 %v1782_v33, %v1635_v45  ;;  %v604_v19 = vmul.f32 %v2305_v25, %v2407_v7  ;;  %v1338_v60 = vadd.f32 %v1258_v52, %v1097_v0  ;;  %v1564_v17 = vsel %vm416_vm0, %v1562_v37, %v4473_v58  ;;  %v3466_v33 = vld [vmem:[%s2416_s30 + $0x180] sm:$0xff] }
  0xb5   : > { %v487_v35 = vrot.slane %v362_v29, 1  ;;  %v3456_v43 = vmul.f32 %v3444_v23, %v2407_v7  ;;  %v1805_v38 = vsel %vm658_vm1, %v1803_v57, %v4472_v62  ;;  %v4471_v56 = vrot.slane %v3448_v51, 1  ;;  %4638 = vst [vmem:[#allocation11_spill] sm:$0xff] %v3466_v33 }
  0xb6   : > { %2253 = vmatmul.msk.f32.gmra.mxu1 %vm1905_vm2, %v1876_v27  ;;  %v729_v53 = vrot.slane %v604_v19, 2  ;;  %v911_v31 = vmul.f32 %v2411_v9, %v4637_v21  ;;  %v1403_v49 = vadd.f32 %v1371_v30, %v1338_v60  ;;  %v3474_v47 = vmul.f32 %v2411_v9, %v3010_v46 }
  0xb7   : > { %v4469_v44 = vrot.slane %v3456_v43, 2  ;;  %v1152_v18 = vmul.f32 %v2418_v10, %v4637_v21  ;;  %v489_v13 = vsel %vm416_vm0, %v487_v35, %v4471_v56  ;;  %v832_v28 = vmul.f32 %v2409_v8, %v4637_v21 }
  0xb8   : > { %v1035_v2 = vrot.slane %v911_v31, 1  ;;  %v3485_v63 = vmul.f32 %v2418_v10, %v3010_v46  ;;  %v1644_v37 = vadd.f32 %v1564_v17, %v1403_v49  ;;  %v557_v45 = vadd.f32 %v489_v13, %v283_v39 }
  0xb9   : > { %v731_v52 = vsel %vm658_vm1, %v729_v53, %v4469_v44  ;;  %v4468_v57 = vrot.slane %v3474_v47, 1  ;;  %v1276_v0 = vrot.slane %v1152_v18, 2  ;;  %v1458_v25 = vmul.f32 %v2429_v15, %v3466_v33  ;;  %v2307_v18 = vld [vmem:[%s2416_s30 + $0x30] sm:$0xff] }
  0xba   : > { %v4467_v30 = vrot.slane %v3485_v63, 2  ;;  %v3496_v29 = vmul.f32 %v2429_v15, %v3469_v12  ;;  %v1885_v27 = vadd.f32 %v1805_v38, %v1644_v37  ;;  %v799_v39 = vadd.f32 %v731_v52, %v557_v45  ;;  %v3519_v45 = vld [vmem:[%s2416_s30 + $0x38] sm:$0xff] }
  0xbb   : > { %v1379_v19 = vmul.f32 %v2427_v14, %v3466_v33  ;;  %v1699_v60 = vmul.f32 %v3279_v11, %v3466_v33  ;;  %v1037_v17 = vsel %vm416_vm0, %v1035_v2, %v4468_v57  ;;  %v1582_v35 = vrot.slane %v1458_v25, 1  ;;  %v4639_v57 = vld [vmem:[#allocation2_spill] sm:$0xff] }
  0xbc   : > { %v4470_v53 = vrot.slane %v3496_v29, 1  ;;  %v3508_v21 = vmul.f32 %v3279_v11, %v3469_v12  ;;  %2262 = vmatmul.msk.f32.gmra.mxu2 %vm1905_vm2, %v1885_v27  ;;  %v864_v38 = vadd.f32 %v832_v28, %v799_v39  ;;  %v1278_v31 = vsel %vm658_vm1, %v1276_v0, %v4467_v30 }
  0xbd   : > { %v1823_v49 = vrot.slane %v1699_v60, 2  ;;  %v326_v13 = vmul.f32 %v2307_v18, %v2405_v6  ;;  %v259_v37 = vmul.f32 %v2307_v18, %v2403_v5  ;;  %v3523_v52 = vmul.f32 %v3519_v45, %v2405_v6 }
  0xbe   : > { %v4475_v2 = vrot.slane %v3508_v21, 2  ;;  %v568_v28 = vmul.f32 %v2307_v18, %v2407_v7  ;;  %v1105_v25 = vadd.f32 %v1037_v17, %v864_v38  ;;  %v1584_v0 = vsel %vm416_vm0, %v1582_v35, %v4470_v53 }
  0xbf   : > { %v427_v27 = vrot.slane %v326_v13, 1  ;;  %v3531_v39 = vmul.f32 %v3519_v45, %v2407_v7  ;;  %v4477_v60 = vrot.slane %v3523_v52, 1  ;;  %v808_v44 = vmul.f32 %v2409_v8, %v4639_v57 }
  0xc0   : > { %v669_v30 = vrot.slane %v568_v28, 2  ;;  %v875_v18 = vmul.f32 %v2411_v9, %v4639_v57  ;;  %v1346_v17 = vadd.f32 %v1278_v31, %v1105_v25  ;;  %v3541_v35 = vmul.f32 %v2411_v9, %v3082_v34 }
  0xc1   : > { %v4476_v38 = vrot.slane %v3531_v39, 2  ;;  %v1116_v13 = vmul.f32 %v2418_v10, %v4639_v57  ;;  %v1825_v28 = vsel %vm658_vm1, %v1823_v49, %v4475_v2  ;;  %v429_v53 = vsel %vm416_vm0, %v427_v27, %v4477_v60  ;;  %v3561_v2 = vld [vmem:[%s2416_s30 + $0x60] sm:$0xff] }
  0xc2   : > { %v975_v56 = vrot.slane %v875_v18, 1  ;;  %v3553_v31 = vmul.f32 %v2418_v10, %v3082_v34  ;;  %v1411_v25 = vadd.f32 %v1379_v19, %v1346_v17  ;;  %v533_v62 = vadd.f32 %v429_v53, %v259_v37  ;;  %4640 = vst [vmem:[#allocation16_spill] sm:$0xff] %v3561_v2  ;;  %v3566_v18 = vld [vmem:[%s2416_s30 + $0x68] sm:$0xff] }
  0xc3   : > { %v671_v58 = vsel %vm658_vm1, %v669_v30, %v4476_v38  ;;  %v4481_v57 = vrot.slane %v3541_v35, 1  ;;  %v1216_v1 = vrot.slane %v1116_v13, 2  ;;  %v1422_v27 = vmul.f32 %v3561_v2, %v2429_v15 }
  0xc4   : > { %v4483_v49 = vrot.slane %v3553_v31, 2  ;;  %v3570_v19 = vmul.f32 %v3566_v18, %v2429_v15  ;;  %v1652_v53 = vadd.f32 %v1584_v0, %v1411_v25  ;;  %v775_v30 = vadd.f32 %v671_v58, %v533_v62 }
  0xc5   : > { %v1355_v37 = vmul.f32 %v3561_v2, %v2427_v14  ;;  %v1663_v17 = vmul.f32 %v3561_v2, %v3279_v11  ;;  %v977_v13 = vsel %vm416_vm0, %v975_v56, %v4481_v57  ;;  %v1522_v38 = vrot.slane %v1422_v27, 1  ;;  %v3594_v57 = vld [vmem:[%s2416_s30 + $0x98] sm:$0xff] }
  0xc6   : > { %v4482_v60 = vrot.slane %v3570_v19, 1  ;;  %v3582_v41 = vmul.f32 %v3566_v18, %v3279_v11  ;;  %v1893_v0 = vadd.f32 %v1825_v28, %v1652_v53  ;;  %v840_v25 = vadd.f32 %v808_v44, %v775_v30 }
  0xc7   : > { %v1218_v58 = vsel %vm658_vm1, %v1216_v1, %v4483_v49  ;;  %v1763_v62 = vrot.slane %v1663_v17, 2  ;;  %v267_v56 = vmul.f32 %v2311_v50, %v2403_v5  ;;  %v338_v27 = vmul.f32 %v2311_v50, %v2405_v6 }
  0xc8   : > { %v1524_v55 = vsel %vm416_vm0, %v1522_v38, %v4482_v60  ;;  %v3598_v28 = vmul.f32 %v3594_v57, %v2405_v6  ;;  %2270 = vmatmul.msk.f32.gmra.mxu3 %vm1905_vm2, %v1893_v0  ;;  %v1081_v44 = vadd.f32 %v977_v13, %v840_v25  ;;  %v580_v53 = vmul.f32 %v2311_v50, %v2407_v7  ;;  %v4643_v60 = vld [vmem:[#allocation5_spill] sm:$0xff] }
  0xc9   : > { %v3605_v38 = vmul.f32 %v3594_v57, %v2407_v7  ;;  %v447_v30 = vrot.slane %v338_v27, 1  ;;  %v816_v49 = vmul.f32 %v2409_v8, %v4643_v60  ;;  %v887_v2 = vmul.f32 %v2411_v9, %v4643_v60 }
  0xca   : > { %4641 = vst [vmem:[#allocation14_spill] sm:$0xff] %v3598_v28  ;;  %v4493_v17 = vrot.slane %v3598_v28, 1  ;;  %v1322_v0 = vadd.f32 %v1218_v58, %v1081_v44  ;;  %v689_v13 = vrot.slane %v580_v53, 2  ;;  %v3615_v50 = vmul.f32 %v2411_v9, %v3160_v42 }
  0xcb   : > { %4642 = vst [vmem:[#allocation3_spill] sm:$0xff] %v3605_v38  ;;  %v4495_v25 = vrot.slane %v3605_v38, 2  ;;  %v995_v1 = vrot.slane %v887_v2, 1  ;;  %v1128_v33 = vmul.f32 %v2418_v10, %v4643_v60  ;;  %v3624_v54 = vmul.f32 %v2418_v10, %v3160_v42  ;;  %v3635_v60 = vld [vmem:[%s2416_s30 + $0xc0] sm:$0xff] }
  0xcc   : > { %4644 = vst [vmem:[#allocation17_spill] sm:$0xff] %v3615_v50  ;;  %v449_v27 = vsel %vm416_vm0, %v447_v30, %v4493_v17  ;;  %v1387_v58 = vadd.f32 %v1355_v37, %v1322_v0  ;;  %v4498_v36 = vrot.slane %v3615_v50, 1  ;;  %v4645_v28 = vrot.slane %v3582_v41, 2 }
  0xcd   : > { %v541_v44 = vadd.f32 %v449_v27, %v267_v56  ;;  %v691_v53 = vsel %vm658_vm1, %v689_v13, %v4495_v25  ;;  %v1236_v2 = vrot.slane %v1128_v33, 2  ;;  %v4503_v17 = vrot.slane %v3624_v54, 2  ;;  %4646 = vst [vmem:[#allocation15_spill] sm:$0xff] %v3635_v60  ;;  %v3642_v13 = vld [vmem:[%s2416_s30 + $0xc8] sm:$0xff] }
  0xce   : > { %v1765_v30 = vsel %vm658_vm1, %v1763_v62, %v4645_v28  ;;  %v1434_v42 = vmul.f32 %v3635_v60, %v2429_v15  ;;  %v1628_v37 = vadd.f32 %v1524_v55, %v1387_v58  ;;  %v1363_v0 = vmul.f32 %v3635_v60, %v2427_v14  ;;  %4647 = vst [vmem:[#allocation9_spill] sm:$0xff] %v3642_v13 }
  0xcf   : > { %v783_v56 = vadd.f32 %v691_v53, %v541_v44  ;;  %v3646_v27 = vmul.f32 %v3642_v13, %v2429_v15  ;;  %v997_v33 = vsel %vm416_vm0, %v995_v1, %v4498_v36  ;;  %v1675_v28 = vmul.f32 %v3635_v60, %v3279_v11 }
  0xd0   : > { %v1542_v62 = vrot.slane %v1434_v42, 1  ;;  %v3655_v55 = vmul.f32 %v3642_v13, %v3279_v11  ;;  %v1869_v58 = vadd.f32 %v1765_v30, %v1628_v37  ;;  %v1238_v53 = vsel %vm658_vm1, %v1236_v2, %v4503_v17  ;;  %v2315_v42 = vld [vmem:[%s2416_s30 + $0x100] sm:$0x3] }
  0xd1   : > { %v848_v44 = vadd.f32 %v816_v49, %v783_v56  ;;  %v4502_v25 = vrot.slane %v3646_v27, 1  ;;  %v1783_v38 = vrot.slane %v1675_v28, 2  ;;  %v352_v1 = vmul.f32 %v2315_v42, %v2405_v6 }
  0xd2   : > { %v4501_v50 = vrot.slane %v3655_v55, 2  ;;  %v594_v36 = vmul.f32 %v2315_v42, %v2407_v7  ;;  %2246 = vmatmul.msk.f32.gmra.mxu0 %vm1905_vm2, %v1869_v58  ;;  %v276_v30 = vmul.f32 %v3367_v20, %v2403_v5  ;;  %v901_v2 = vmul.f32 %v2411_v9, %v3202_v26 }
  0xd3   : > { %v1089_v60 = vadd.f32 %v997_v33, %v848_v44  ;;  %v1544_v49 = vsel %vm416_vm0, %v1542_v62, %v4502_v25  ;;  %v470_v37 = vrot.slane %v352_v1, 1  ;;  %v825_v28 = vmul.f32 %v2409_v8, %v2939_v24  ;;  %v3681_v44 = vld [vmem:[%s2416_s30 + $0x130] sm:$0x3] }
  0xd4   : > { %v712_v56 = vrot.slane %v594_v36, 2  ;;  %v1142_v42 = vmul.f32 %v2418_v10, %v3202_v26  ;;  %v1785_v33 = vsel %vm658_vm1, %v1783_v38, %v4501_v50  ;;  %v1018_v62 = vrot.slane %v901_v2, 1  ;;  %4648 = vst [vmem:[#allocation18_spill] sm:$0xff] %v3681_v44 }
  0xd5   : > { %v1330_v58 = vadd.f32 %v1238_v53, %v1089_v60  ;;  %v1448_v20 = vmul.f32 %v3681_v44, %v2429_v15  ;;  %v4649_v36 = vrot.slane %v3371_v61, 1  ;;  %v4650_v1 = vrot.slane %v3380_v3, 2 }
  0xd6   : > { %v1259_v60 = vrot.slane %v1142_v42, 2  ;;  %v1689_v53 = vmul.f32 %v3681_v44, %v3279_v11  ;;  %v1372_v50 = vmul.f32 %v3418_v32, %v2427_v14  ;;  %v4651_v17 = vrot.slane %v3395_v22, 1 }
  0xd7   : > { %v471_v24 = vsel %vm416_vm0, %v4649_v36, %v470_v37  ;;  %v713_v26 = vsel %vm658_vm1, %v4650_v1, %v712_v56  ;;  %v1395_v38 = vadd.f32 %v1363_v0, %v1330_v58  ;;  %v1565_v25 = vrot.slane %v1448_v20, 1  ;;  %v2317_v56 = vld [vmem:[%s2416_s30 + $0x160] sm:$0x3]  ;;  %v3704_v0 = vld [vmem:[%s2416_s30 + $0x190] sm:$0x3] }
  0xd8   : > { %v550_v2 = vadd.f32 %v471_v24, %v276_v30  ;;  %v1019_v61 = vsel %vm416_vm0, %v4651_v17, %v1018_v62  ;;  %v4652_v37 = vrot.slane %v3408_v48, 2  ;;  %v1806_v36 = vrot.slane %v1689_v53, 2 }
  0xd9   : > { %v364_v42 = vmul.f32 %v2317_v56, %v2405_v6  ;;  %v1636_v1 = vadd.f32 %v1544_v49, %v1395_v38  ;;  %v284_v30 = vmul.f32 %v3444_v23, %v2403_v5  ;;  %v606_v58 = vmul.f32 %v2317_v56, %v2407_v7 }
  0xda   : > { %v1260_v3 = vsel %vm658_vm1, %v4652_v37, %v1259_v60  ;;  %v792_v44 = vadd.f32 %v713_v26, %v550_v2  ;;  %v4653_v22 = vrot.slane %v3422_v59, 1  ;;  %v4654_v48 = vrot.slane %v3431_v4, 2 }
  0xdb   : > { %v490_v20 = vrot.slane %v364_v42, 1  ;;  %v913_v49 = vmul.f32 %v2411_v9, %v3244_v40  ;;  %v1877_v24 = vadd.f32 %v1785_v33, %v1636_v1  ;;  %v732_v60 = vrot.slane %v606_v58, 2 }
  0xdc   : > { %v1566_v17 = vsel %vm416_vm0, %v4653_v22, %v1565_v25  ;;  %v1807_v62 = vsel %vm658_vm1, %v4654_v48, %v1806_v36  ;;  %v857_v26 = vadd.f32 %v825_v28, %v792_v44  ;;  %v1154_v23 = vmul.f32 %v2418_v10, %v3244_v40 }
  0xdd   : > { %v4655_v53 = vrot.slane %v3448_v51, 1  ;;  %v833_v4 = vmul.f32 %v2409_v8, %v3010_v46  ;;  %v1038_v25 = vrot.slane %v913_v49, 1  ;;  %v1460_v38 = vmul.f32 %v2429_v15, %v3704_v0  ;;  %2254 = vmatmul.msk.f32.gmra.mxu1 %vm1905_vm2, %v1877_v24 }
  0xde   : > { %v1098_v33 = vadd.f32 %v1019_v61, %v857_v26  ;;  %v4656_v44 = vrot.slane %v3456_v43, 2  ;;  %v1279_v2 = vrot.slane %v1154_v23, 2  ;;  %v4657_v51 = vrot.slane %v3474_v47, 1  ;;  %v2318_v43 = vld [vmem:[%s2416_s30 + $0x40] sm:$0x3] }
  0xdf   : > { %v491_v59 = vsel %vm416_vm0, %v4655_v53, %v490_v20  ;;  %v1380_v46 = vmul.f32 %v2427_v14, %v3469_v12  ;;  %v1585_v36 = vrot.slane %v1460_v38, 1  ;;  %v1701_v56 = vmul.f32 %v3279_v11, %v3704_v0 }
  0xe0   : > { %v558_v28 = vadd.f32 %v491_v59, %v284_v30  ;;  %v733_v40 = vsel %vm658_vm1, %v4656_v44, %v732_v60  ;;  %v1039_v37 = vsel %vm416_vm0, %v4657_v51, %v1038_v25  ;;  %v1339_v42 = vadd.f32 %v1260_v3, %v1098_v33 }
  0xe1   : > { %v260_v61 = vmul.f32 %v3519_v45, %v2403_v5  ;;  %v328_v30 = vmul.f32 %v2318_v43, %v2405_v6  ;;  %v4658_v58 = vrot.slane %v3485_v63, 2  ;;  %v4659_v22 = vrot.slane %v3496_v29, 1 }
  0xe2   : > { %v800_v1 = vadd.f32 %v733_v40, %v558_v28  ;;  %v1826_v20 = vrot.slane %v1701_v56, 2  ;;  %v570_v49 = vmul.f32 %v2318_v43, %v2407_v7  ;;  %v1404_v3 = vadd.f32 %v1372_v50, %v1339_v42  ;;  %v3764_v40 = vld [vmem:[%s2416_s30 + $0x70] sm:$0x3] }
  0xe3   : > { %v1280_v47 = vsel %vm658_vm1, %v4658_v58, %v1279_v2  ;;  %v1586_v48 = vsel %vm416_vm0, %v4659_v22, %v1585_v36  ;;  %v430_v26 = vrot.slane %v328_v30, 1  ;;  %v877_v45 = vmul.f32 %v2411_v9, %v3296_v16  ;;  %v4666_v22 = vld [vmem:[#allocation7_spill] sm:$0xff] }
  0xe4   : > { %v865_v24 = vadd.f32 %v833_v4, %v800_v1  ;;  %v4660_v60 = vrot.slane %v3508_v21, 2  ;;  %v672_v23 = vrot.slane %v570_v49, 2  ;;  %v809_v29 = vmul.f32 %v2409_v8, %v3082_v34 }
  0xe5   : > { %v1118_v53 = vmul.f32 %v2418_v10, %v3296_v16  ;;  %v1645_v59 = vadd.f32 %v1566_v17, %v1404_v3  ;;  %v4661_v50 = vrot.slane %v3523_v52, 1  ;;  %v978_v38 = vrot.slane %v877_v45, 1 }
  0xe6   : > { %v1827_v63 = vsel %vm658_vm1, %v4660_v60, %v1826_v20  ;;  %v1106_v25 = vadd.f32 %v1039_v37, %v865_v24  ;;  %v4662_v28 = vrot.slane %v3531_v39, 2  ;;  %v1424_v34 = vmul.f32 %v3764_v40, %v2429_v15  ;;  %v4667_v24 = vld [vmem:[#allocation6_spill] sm:$0xff] }
  0xe7   : > { %v431_v4 = vsel %vm416_vm0, %v4661_v50, %v430_v26  ;;  %v1219_v44 = vrot.slane %v1118_v53, 2  ;;  %v1886_v16 = vadd.f32 %v1807_v62, %v1645_v59  ;;  %v1356_v52 = vmul.f32 %v3566_v18, %v2427_v14  ;;  %v4669_v53 = vld [vmem:[#allocation14_spill] sm:$0xff] }
  0xe8   : > { %v534_v33 = vadd.f32 %v431_v4, %v260_v61  ;;  %v673_v21 = vsel %vm658_vm1, %v4662_v28, %v672_v23  ;;  %v1347_v17 = vadd.f32 %v1280_v47, %v1106_v25  ;;  %v1665_v2 = vmul.f32 %v3764_v40, %v3279_v11  ;;  %v2320_v61 = vld [vmem:[%s2416_s30 + $0xa0] sm:$0x3]  ;;  %v4671_v25 = vld [vmem:[#allocation3_spill] sm:$0xff] }
  0xe9   : > { %v4663_v39 = vrot.slane %v3541_v35, 1  ;;  %v4664_v36 = vrot.slane %v3553_v31, 2  ;;  %v1525_v42 = vrot.slane %v1424_v34, 1  ;;  %2263 = vmatmul.msk.f32.gmra.mxu2 %vm1905_vm2, %v1886_v16  ;;  %v340_v43 = vmul.f32 %v2320_v61, %v2405_v6 }
  0xea   : > { %v776_v51 = vadd.f32 %v673_v21, %v534_v33  ;;  %v1412_v62 = vadd.f32 %v1380_v46, %v1347_v17  ;;  %v1766_v1 = vrot.slane %v1665_v2, 2  ;;  %v582_v30 = vmul.f32 %v2320_v61, %v2407_v7 }
  0xeb   : > { %v979_v37 = vsel %vm416_vm0, %v4663_v39, %v978_v38  ;;  %v1220_v56 = vsel %vm658_vm1, %v4664_v36, %v1219_v44  ;;  %v4665_v35 = vrot.slane %v3570_v19, 1  ;;  %v268_v31 = vmul.f32 %v3594_v57, %v2403_v5  ;;  %v3803_v38 = vld [vmem:[%s2416_s30 + $0xd0] sm:$0x3]  ;;  %v4673_v44 = vld [vmem:[#allocation17_spill] sm:$0xff] }
  0xec   : > { %v841_v58 = vadd.f32 %v809_v29, %v776_v51  ;;  %v889_v20 = vmul.f32 %v2411_v9, %v4666_v22  ;;  %v1653_v49 = vadd.f32 %v1586_v48, %v1412_v62  ;;  %v450_v46 = vrot.slane %v340_v43, 1  ;;  %v2322_v51 = vld [vmem:[%s2416_s30 + $0x108] sm:$0xff] }
  0xed   : > { %v1526_v47 = vsel %vm416_vm0, %v4665_v35, %v1525_v42  ;;  %v692_v3 = vrot.slane %v582_v30, 2  ;;  %v817_v26 = vmul.f32 %v2409_v8, %v4667_v24  ;;  %v4668_v60 = vrot.slane %v3582_v41, 2  ;;  %v3819_v42 = vld [vmem:[%s2416_s30 + $0x110] sm:$0xff] }
  0xee   : > { %v1082_v45 = vadd.f32 %v979_v37, %v841_v58  ;;  %v998_v19 = vrot.slane %v889_v20, 1  ;;  %v1130_v29 = vmul.f32 %v2418_v10, %v4666_v22  ;;  %v1894_v57 = vadd.f32 %v1827_v63, %v1653_v49 }
  0xef   : > { %v1767_v23 = vsel %vm658_vm1, %v4668_v60, %v1766_v1  ;;  %v4670_v59 = vrot.slane %v4669_v53, 1  ;;  %v4672_v50 = vrot.slane %v4671_v25, 2  ;;  %v1436_v41 = vmul.f32 %v3803_v38, %v2429_v15 }
  0xf0   : > { %v1323_v33 = vadd.f32 %v1220_v56, %v1082_v45  ;;  %v1239_v21 = vrot.slane %v1130_v29, 2  ;;  %v1364_v63 = vmul.f32 %v3642_v13, %v2427_v14  ;;  %2271 = vmatmul.msk.f32.gmra.mxu3 %vm1905_vm2, %v1894_v57  ;;  %v4674_v34 = vrot.slane %v4673_v44, 1  ;;  %v3867_v44 = vld [vmem:[%s2416_s30 + $0x140] sm:$0xff] }
  0xf1   : > { %v451_v48 = vsel %vm416_vm0, %v4670_v59, %v450_v46  ;;  %v693_v4 = vsel %vm658_vm1, %v4672_v50, %v692_v3  ;;  %v1545_v17 = vrot.slane %v1436_v41, 1  ;;  %v1677_v2 = vmul.f32 %v3803_v38, %v3279_v11 }
  0xf2   : > { %v542_v28 = vadd.f32 %v451_v48, %v268_v31  ;;  %v999_v16 = vsel %vm416_vm0, %v4674_v34, %v998_v19  ;;  %v353_v39 = vmul.f32 %v2322_v51, %v2405_v6  ;;  %v1388_v37 = vadd.f32 %v1356_v52, %v1323_v33  ;;  %v2324_v33 = vld [vmem:[%s2416_s30 + $0x138] sm:$0xff] }
  0xf3   : > { %v277_v56 = vmul.f32 %v2322_v51, %v2403_v5  ;;  %v3823_v62 = vmul.f32 %v3819_v42, %v2405_v6  ;;  %v4675_v1 = vrot.slane %v3624_v54, 2  ;;  %v1786_v43 = vrot.slane %v1677_v2, 2  ;;  %v4677_v54 = vld [vmem:[#allocation8_spill] sm:$0xff] }
  0xf4   : > { %v784_v36 = vadd.f32 %v693_v4, %v542_v28  ;;  %v472_v30 = vrot.slane %v353_v39, 1  ;;  %v595_v58 = vmul.f32 %v2322_v51, %v2407_v7  ;;  %v1629_v35 = vadd.f32 %v1526_v47, %v1388_v37 }
  0xf5   : > { %v1240_v61 = vsel %vm658_vm1, %v4675_v1, %v1239_v21  ;;  %v4522_v52 = vrot.slane %v3823_v62, 1  ;;  %v3832_v22 = vmul.f32 %v3819_v42, %v2407_v7  ;;  %v4676_v20 = vrot.slane %v3646_v27, 1 }
  0xf6   : > { %v849_v31 = vadd.f32 %v817_v26, %v784_v36  ;;  %v714_v46 = vrot.slane %v595_v58, 2  ;;  %v826_v3 = vmul.f32 %v4677_v54, %v2409_v8  ;;  %v902_v24 = vmul.f32 %v4677_v54, %v2411_v9 }
  0xf7   : > { %v1546_v49 = vsel %vm416_vm0, %v4676_v20, %v1545_v17  ;;  %v1870_v45 = vadd.f32 %v1767_v23, %v1629_v35  ;;  %v474_v26 = vsel %vm416_vm0, %v472_v30, %v4522_v52  ;;  %v4521_v60 = vrot.slane %v3832_v22, 2  ;;  %v2326_v30 = vld [vmem:[%s2416_s30 + $0x168] sm:$0xff]  ;;  %v3891_v20 = vld [vmem:[%s2416_s30 + $0x170] sm:$0xff] }
  0xf8   : > { %v1090_v47 = vadd.f32 %v999_v16, %v849_v31  ;;  %v551_v19 = vadd.f32 %v474_v26, %v277_v56  ;;  %v3847_v27 = vmul.f32 %v3418_v32, %v2411_v9  ;;  %v1020_v29 = vrot.slane %v902_v24, 1 }
  0xf9   : > { %v1143_v57 = vmul.f32 %v4677_v54, %v2418_v10  ;;  %2247 = vmatmul.msk.f32.gmra.mxu0 %vm1905_vm2, %v1870_v45  ;;  %v4678_v53 = vrot.slane %v3655_v55, 2  ;;  %v716_v48 = vsel %vm658_vm1, %v714_v46, %v4521_v60  ;;  %v3860_v25 = vmul.f32 %v3418_v32, %v2418_v10 }
  0xfa   : > { %v1331_v23 = vadd.f32 %v1240_v61, %v1090_v47  ;;  %v793_v50 = vadd.f32 %v716_v48, %v551_v19  ;;  %v4520_v4 = vrot.slane %v3847_v27, 1  ;;  %v1449_v28 = vmul.f32 %v2324_v33, %v2429_v15 }
  0xfb   : > { %v1787_v59 = vsel %vm658_vm1, %v4678_v53, %v1786_v43  ;;  %v1261_v41 = vrot.slane %v1143_v57, 2  ;;  %v4516_v55 = vrot.slane %v3860_v25, 2  ;;  %v3871_v34 = vmul.f32 %v3867_v44, %v2429_v15  ;;  %v249_v53 = vld [vmem:[%s2416_s30 + $0x198] sm:$0xff] }
  0xfc   : > { %v1396_v21 = vadd.f32 %v1364_v63, %v1331_v23  ;;  %v1690_v16 = vmul.f32 %v2324_v33, %v3279_v11  ;;  %v858_v17 = vadd.f32 %v826_v3, %v793_v50  ;;  %v1022_v2 = vsel %vm416_vm0, %v1020_v29, %v4520_v4  ;;  %v4679_v29 = vld [vmem:[#allocation11_spill] sm:$0xff] }
  0xfd   : > { %v1567_v51 = vrot.slane %v1449_v28, 1  ;;  %v3879_v63 = vmul.f32 %v3867_v44, %v3279_v11  ;;  %v1263_v37 = vsel %vm658_vm1, %v1261_v41, %v4516_v55  ;;  %v4515_v36 = vrot.slane %v3871_v34, 1 }
  0xfe   : > { %v1637_v39 = vadd.f32 %v1546_v49, %v1396_v21  ;;  %v1808_v56 = vrot.slane %v1690_v16, 2  ;;  %v1099_v1 = vadd.f32 %v1022_v2, %v858_v17  ;;  %v1373_v61 = vmul.f32 %v2324_v33, %v2427_v14 }
  0xff   : > { %v4509_v43 = vrot.slane %v3879_v63, 2  ;;  %v365_v58 = vmul.f32 %v2326_v30, %v2405_v6  ;;  %v285_v31 = vmul.f32 %v2326_v30, %v2403_v5  ;;  %v3895_v49 = vmul.f32 %v3891_v20, %v2405_v6 }
 0x100   : > { %v1878_v35 = vadd.f32 %v1787_v59, %v1637_v39  ;;  %v607_v46 = vmul.f32 %v2326_v30, %v2407_v7  ;;  %v1340_v54 = vadd.f32 %v1263_v37, %v1099_v1  ;;  %v1569_v3 = vsel %vm416_vm0, %v1567_v51, %v4515_v36  ;;  %v3914_v59 = vld [vmem:[%s2416_s30 + $0x1a0] sm:$0xff] }
 0x101   : > { %v492_v24 = vrot.slane %v365_v58, 1  ;;  %v3903_v45 = vmul.f32 %v3891_v20, %v2407_v7  ;;  %v1810_v47 = vsel %vm658_vm1, %v1808_v56, %v4509_v43  ;;  %v4512_v26 = vrot.slane %v3895_v49, 1 }
 0x102   : > { %2255 = vmatmul.msk.f32.gmra.mxu1 %vm1905_vm2, %v1878_v35  ;;  %v734_v19 = vrot.slane %v607_v46, 2  ;;  %v914_v57 = vmul.f32 %v2411_v9, %v4679_v29  ;;  %v1405_v23 = vadd.f32 %v1373_v61, %v1340_v54  ;;  %v3919_v50 = vmul.f32 %v2411_v9, %v3469_v12 }
 0x103   : > { %v4510_v48 = vrot.slane %v3903_v45, 2  ;;  %v1155_v41 = vmul.f32 %v2418_v10, %v4679_v29  ;;  %v494_v33 = vsel %vm416_vm0, %v492_v24, %v4512_v26  ;;  %v834_v28 = vmul.f32 %v2409_v8, %v4679_v29 }
 0x104   : > { %v1040_v21 = vrot.slane %v914_v57, 1  ;;  %v3930_v16 = vmul.f32 %v2418_v10, %v3469_v12  ;;  %v1646_v17 = vadd.f32 %v1569_v3, %v1405_v23  ;;  %v559_v2 = vadd.f32 %v494_v33, %v285_v31  ;;  %v2328_v57 = vld [vmem:[%s2416_s30 + $0x48] sm:$0xff]  ;;  %v3961_v33 = vld [vmem:[%s2416_s30 + $0x50] sm:$0xff] }
 0x105   : > { %v736_v51 = vsel %vm658_vm1, %v734_v19, %v4510_v48  ;;  %v4508_v39 = vrot.slane %v3919_v50, 1  ;;  %v1281_v37 = vrot.slane %v1155_v41, 2  ;;  %v1461_v1 = vmul.f32 %v2429_v15, %v249_v53 }
 0x106   : > { %v4507_v56 = vrot.slane %v3930_v16, 2  ;;  %v3940_v61 = vmul.f32 %v2429_v15, %v3914_v59  ;;  %v1887_v30 = vadd.f32 %v1810_v47, %v1646_v17  ;;  %v801_v58 = vadd.f32 %v736_v51, %v559_v2 }
 0x107   : > { %v1381_v35 = vmul.f32 %v2427_v14, %v249_v53  ;;  %v1702_v31 = vmul.f32 %v3279_v11, %v249_v53  ;;  %v1042_v46 = vsel %vm416_vm0, %v1040_v21, %v4508_v39  ;;  %v1587_v54 = vrot.slane %v1461_v1, 1 }
 0x108   : > { %v4506_v3 = vrot.slane %v3940_v61, 1  ;;  %v3950_v24 = vmul.f32 %v3279_v11, %v3914_v59  ;;  %2264 = vmatmul.msk.f32.gmra.mxu2 %vm1905_vm2, %v1887_v30  ;;  %v866_v47 = vadd.f32 %v834_v28, %v801_v58  ;;  %v1283_v19 = vsel %vm658_vm1, %v1281_v37, %v4507_v56  ;;  %v4680_v58 = vld [vmem:[#allocation16_spill] sm:$0xff] }
 0x109   : > { %v1828_v29 = vrot.slane %v1702_v31, 2  ;;  %v329_v23 = vmul.f32 %v2328_v57, %v2405_v6  ;;  %v261_v41 = vmul.f32 %v2328_v57, %v2403_v5  ;;  %v3965_v21 = vmul.f32 %v3961_v33, %v2405_v6 }
 0x10a   : > { %v4511_v53 = vrot.slane %v3950_v24, 2  ;;  %v571_v28 = vmul.f32 %v2328_v57, %v2407_v7  ;;  %v1107_v17 = vadd.f32 %v1042_v46, %v866_v47  ;;  %v1589_v2 = vsel %vm416_vm0, %v1587_v54, %v4506_v3 }
 0x10b   : > { %v432_v51 = vrot.slane %v329_v23, 1  ;;  %v3973_v37 = vmul.f32 %v3961_v33, %v2407_v7  ;;  %v4514_v1 = vrot.slane %v3965_v21, 1  ;;  %v810_v31 = vmul.f32 %v4680_v58, %v2409_v8 }
 0x10c   : > { %v674_v30 = vrot.slane %v571_v28, 2  ;;  %v878_v57 = vmul.f32 %v4680_v58, %v2411_v9  ;;  %v1348_v46 = vadd.f32 %v1283_v19, %v1107_v17  ;;  %v3983_v54 = vmul.f32 %v3566_v18, %v2411_v9 }
 0x10d   : > { %v4513_v47 = vrot.slane %v3973_v37, 2  ;;  %v1119_v23 = vmul.f32 %v4680_v58, %v2418_v10  ;;  %v1830_v28 = vsel %vm658_vm1, %v1828_v29, %v4511_v53  ;;  %v434_v3 = vsel %vm416_vm0, %v432_v51, %v4514_v1  ;;  %v2330_v53 = vld [vmem:[%s2416_s30 + $0x78] sm:$0xff]  ;;  %v4005_v51 = vld [vmem:[%s2416_s30 + $0x80] sm:$0xff] }
 0x10e   : > { %v980_v56 = vrot.slane %v878_v57, 1  ;;  %v3995_v19 = vmul.f32 %v3566_v18, %v2418_v10  ;;  %v1413_v17 = vadd.f32 %v1381_v35, %v1348_v46  ;;  %v535_v39 = vadd.f32 %v434_v3, %v261_v41 }
 0x10f   : > { %v676_v43 = vsel %vm658_vm1, %v674_v30, %v4513_v47  ;;  %v4519_v58 = vrot.slane %v3983_v54, 1  ;;  %v1221_v48 = vrot.slane %v1119_v23, 2  ;;  %v1425_v26 = vmul.f32 %v2330_v53, %v2429_v15 }
 0x110   : > { %v4518_v29 = vrot.slane %v3995_v19, 2  ;;  %v4009_v57 = vmul.f32 %v4005_v51, %v2429_v15  ;;  %v1654_v35 = vadd.f32 %v1589_v2, %v1413_v17  ;;  %v777_v3 = vadd.f32 %v676_v43, %v535_v39  ;;  %v2332_v2 = vld [vmem:[%s2416_s30 + $0xa8] sm:$0xff]  ;;  %v4031_v17 = vld [vmem:[%s2416_s30 + $0xb0] sm:$0xff] }
 0x111   : > { %v1357_v41 = vmul.f32 %v2330_v53, %v2427_v14  ;;  %v1666_v30 = vmul.f32 %v2330_v53, %v3279_v11  ;;  %v982_v46 = vsel %vm416_vm0, %v980_v56, %v4519_v58  ;;  %v1527_v23 = vrot.slane %v1425_v26, 1 }
 0x112   : > { %v4517_v47 = vrot.slane %v4009_v57, 1  ;;  %v4019_v1 = vmul.f32 %v4005_v51, %v3279_v11  ;;  %v1895_v36 = vadd.f32 %v1830_v28, %v1654_v35  ;;  %v842_v55 = vadd.f32 %v810_v31, %v777_v3 }
 0x113   : > { %v1223_v43 = vsel %vm658_vm1, %v1221_v48, %v4518_v29  ;;  %v1768_v39 = vrot.slane %v1666_v30, 2  ;;  %v269_v26 = vmul.f32 %v2332_v2, %v2403_v5  ;;  %v341_v56 = vmul.f32 %v2332_v2, %v2405_v6 }
 0x114   : > { %v1529_v53 = vsel %vm416_vm0, %v1527_v23, %v4517_v47  ;;  %v4035_v11 = vmul.f32 %v4031_v17, %v2405_v6  ;;  %2272 = vmatmul.msk.f32.gmra.mxu3 %vm1905_vm2, %v1895_v36  ;;  %v1083_v31 = vadd.f32 %v982_v46, %v842_v55  ;;  %v4526_v48 = vrot.slane %v4019_v1, 2  ;;  %v4682_v23 = vld [vmem:[#allocation15_spill] sm:$0xff] }
 0x115   : > { %v583_v28 = vmul.f32 %v2332_v2, %v2407_v7  ;;  %v4042_v35 = vmul.f32 %v4031_v17, %v2407_v7  ;;  %v452_v3 = vrot.slane %v341_v56, 1  ;;  %v818_v47 = vmul.f32 %v4682_v23, %v2409_v8 }
 0x116   : > { %4681 = vst [vmem:[#allocation13_spill] sm:$0xff] %v4035_v11  ;;  %v4523_v30 = vrot.slane %v4035_v11, 1  ;;  %v890_v29 = vmul.f32 %v4682_v23, %v2411_v9  ;;  %v1324_v36 = vadd.f32 %v1223_v43, %v1083_v31  ;;  %v4052_v2 = vmul.f32 %v3642_v13, %v2411_v9 }
 0x117   : > { %v694_v55 = vrot.slane %v583_v28, 2  ;;  %v4528_v46 = vrot.slane %v4042_v35, 2  ;;  %v1131_v4 = vmul.f32 %v4682_v23, %v2418_v10  ;;  %v4061_v60 = vmul.f32 %v3642_v13, %v2418_v10  ;;  %v2334_v23 = vld [vmem:[%s2416_s30 + $0xd8] sm:$0xff] }
 0x118   : > { %4683 = vst [vmem:[#allocation4_spill] sm:$0xff] %v4052_v2  ;;  %v454_v56 = vsel %vm416_vm0, %v452_v3, %v4523_v30  ;;  %v1000_v58 = vrot.slane %v890_v29, 1  ;;  %v1389_v43 = vadd.f32 %v1357_v41, %v1324_v36  ;;  %v4527_v52 = vrot.slane %v4052_v2, 1 }
 0x119   : > { %4684 = vst [vmem:[#allocation10_spill] sm:$0xff] %v4061_v60  ;;  %v543_v31 = vadd.f32 %v454_v56, %v269_v26  ;;  %v696_v28 = vsel %vm658_vm1, %v694_v55, %v4528_v46  ;;  %v1770_v3 = vsel %vm658_vm1, %v1768_v39, %v4526_v48  ;;  %v1241_v29 = vrot.slane %v1131_v4, 2  ;;  %v4074_v26 = vld [vmem:[%s2416_s30 + $0xe0] sm:$0xff]  ;;  %v4086_v4 = vld [vmem:[%s4379_s1 + $0x8] ss:$0 sm:$0xff] }
 0x11a   : > { %v4530_v30 = vrot.slane %v4061_v60, 2  ;;  %v1437_v11 = vmul.f32 %v2334_v23, %v2429_v15  ;;  %v1630_v13 = vadd.f32 %v1529_v53, %v1389_v43  ;;  %4685 = vst [vmem:[#allocation12_spill] sm:$0xff] %v4074_v26  ;;  %v4078_v36 = vmul.f32 %v4074_v26, %v2429_v15 }
 0x11b   : > { %v785_v41 = vadd.f32 %v696_v28, %v543_v31  ;;  %v1002_v55 = vsel %vm416_vm0, %v1000_v58, %v4527_v52  ;;  %v1678_v56 = vmul.f32 %v4086_v4, %v2334_v23  ;;  %v4091_v53 = vmul.f32 %v4086_v4, %v4074_v26  ;;  %v2337_v52 = vld [vmem:[%s2416_s30 + $0x118] sm:$0x3] }
 0x11c   : > { %4686 = vst [vmem:[#allocation2_spill] sm:$0xff] %v4078_v36  ;;  %v1547_v39 = vrot.slane %v1437_v11, 1  ;;  %v1871_v43 = vadd.f32 %v1770_v3, %v1630_v13  ;;  %v1365_v28 = vmul.f32 %v2334_v23, %v2427_v14  ;;  %v4533_v48 = vrot.slane %v4078_v36, 1  ;;  %v4687_v23 = vld [vmem:[#allocation18_spill] sm:$0xff] }
 0x11d   : > { %v850_v31 = vadd.f32 %v818_v47, %v785_v41  ;;  %v1243_v58 = vsel %vm658_vm1, %v1241_v29, %v4530_v30  ;;  %v278_v11 = vmul.f32 %v3819_v42, %v2403_v5  ;;  %v355_v46 = vmul.f32 %v2337_v52, %v2405_v6 }
 0x11e   : > { %v597_v2 = vmul.f32 %v2337_v52, %v2407_v7  ;;  %2248 = vmatmul.msk.f32.gmra.mxu0 %vm1905_vm2, %v1871_v43  ;;  %v1788_v47 = vrot.slane %v1678_v56, 2  ;;  %v904_v41 = vmul.f32 %v4687_v23, %v2411_v9  ;;  %v1549_v29 = vsel %vm416_vm0, %v1547_v39, %v4533_v48  ;;  %v2338_v56 = vld [vmem:[%s2416_s30 + $0x148] sm:$0x3] }
 0x11f   : > { %v1091_v13 = vadd.f32 %v1002_v55, %v850_v31  ;;  %v475_v42 = vrot.slane %v355_v46, 1  ;;  %v1145_v60 = vmul.f32 %v4687_v23, %v2418_v10  ;;  %v827_v52 = vmul.f32 %v3418_v32, %v2409_v8 }
 0x120   : > { %v717_v30 = vrot.slane %v597_v2, 2  ;;  %v1023_v55 = vrot.slane %v904_v41, 1  ;;  %v1451_v43 = vmul.f32 %v2338_v56, %v2429_v15  ;;  %v4688_v31 = vrot.slane %v3823_v62, 1 }
 0x121   : > { %v1332_v26 = vadd.f32 %v1243_v58, %v1091_v13  ;;  %v4689_v46 = vrot.slane %v3832_v22, 2  ;;  %v1264_v39 = vrot.slane %v1145_v60, 2  ;;  %v1692_v58 = vmul.f32 %v2338_v56, %v4086_v4 }
 0x122   : > { %v476_v3 = vsel %vm416_vm0, %v4688_v31, %v475_v42  ;;  %v4690_v23 = vrot.slane %v4091_v53, 2  ;;  %v1570_v48 = vrot.slane %v1451_v43, 1  ;;  %v4691_v36 = vrot.slane %v3847_v27, 1  ;;  %v251_v31 = vld [vmem:[%s2416_s30 + $0x1a8] sm:$0x3] }
 0x123   : > { %v718_v2 = vsel %vm658_vm1, %v4689_v46, %v717_v30  ;;  %v1397_v13 = vadd.f32 %v1365_v28, %v1332_v26  ;;  %v552_v41 = vadd.f32 %v476_v3, %v278_v11  ;;  %v4692_v42 = vrot.slane %v3860_v25, 2  ;;  %v2339_v30 = vld [vmem:[%s2416_s30 + $0x178] sm:$0x3] }
 0x124   : > { %v1790_v32 = vsel %vm658_vm1, %v1788_v47, %v4690_v23  ;;  %v1024_v62 = vsel %vm416_vm0, %v4691_v36, %v1023_v55  ;;  %v1374_v60 = vmul.f32 %v3867_v44, %v2427_v14  ;;  %v367_v26 = vmul.f32 %v2339_v30, %v2405_v6 }
 0x125   : > { %v1265_v22 = vsel %vm658_vm1, %v4692_v42, %v1264_v39  ;;  %v1638_v28 = vadd.f32 %v1549_v29, %v1397_v13  ;;  %v794_v56 = vadd.f32 %v718_v2, %v552_v41  ;;  %v286_v11 = vmul.f32 %v3891_v20, %v2403_v5  ;;  %v4155_v13 = vpop.f32.mrf.mxu1  ;;  %v4161_v41 = vpop.f32.mrf.mxu2 }
 0x126   : > { %v609_v27 = vmul.f32 %v2339_v30, %v2407_v7  ;;  %v4693_v36 = vrot.slane %v3871_v34, 1  ;;  %v1811_v47 = vrot.slane %v1692_v58, 2  ;;  %v495_v3 = vrot.slane %v367_v26, 1  ;;  %v4153_v58 = vpop.f32.mrf.mxu0 }
 0x127   : > { %v916_v44 = vmul.f32 %v2411_v9, %v3704_v0  ;;  %v1879_v55 = vadd.f32 %v1790_v32, %v1638_v28  ;;  %v859_v43 = vadd.f32 %v827_v52, %v794_v56  ;;  %v1157_v29 = vmul.f32 %v2418_v10, %v3704_v0 }
 0x128   : > { %v1571_v25 = vsel %vm416_vm0, %v4693_v36, %v1570_v48  ;;  %v737_v46 = vrot.slane %v609_v27, 2  ;;  %v4694_v2 = vrot.slane %v3895_v49, 1  ;;  %v835_v34 = vmul.f32 %v2409_v8, %v3469_v12  ;;  %v4163_v12 = vpop.f32.mrf.mxu3  ;;  %v2340_v36 = vld [vmem:[%s2416_s30 + $0x58] sm:$0x3] }
 0x129   : > { %v1043_v39 = vrot.slane %v916_v44, 1  ;;  %v1463_v48 = vmul.f32 %v2429_v15, %v251_v31  ;;  %2256 = vmatmul.msk.f32.gmra.mxu1 %vm1905_vm2, %v1879_v55  ;;  %v1100_v52 = vadd.f32 %v1024_v62, %v859_v43  ;;  %v4695_v0 = vrot.slane %v3903_v45, 2 }
 0x12a   : > { %v496_v20 = vsel %vm416_vm0, %v4694_v2, %v495_v3  ;;  %v1284_v32 = vrot.slane %v1157_v29, 2  ;;  %v4696_v42 = vrot.slane %v3879_v63, 2  ;;  %v1382_v26 = vmul.f32 %v2427_v14, %v3914_v59 }
 0x12b   : > { %v560_v23 = vadd.f32 %v496_v20, %v286_v11  ;;  %v738_v49 = vsel %vm658_vm1, %v4695_v0, %v737_v46  ;;  %v1590_v28 = vrot.slane %v1463_v48, 1  ;;  %v1704_v62 = vmul.f32 %v4086_v4, %v251_v31 }
 0x12c   : > { %v1812_v30 = vsel %vm658_vm1, %v4696_v42, %v1811_v47  ;;  %v1341_v56 = vadd.f32 %v1265_v22, %v1100_v52  ;;  %v4697_v45 = vrot.slane %v3919_v50, 1  ;;  %v331_v3 = vmul.f32 %v2340_v36, %v2405_v6 }
 0x12d   : > { %v802_v11 = vadd.f32 %v738_v49, %v560_v23  ;;  %v4698_v44 = vrot.slane %v3930_v16, 2  ;;  %v1831_v47 = vrot.slane %v1704_v62, 2  ;;  %v262_v59 = vmul.f32 %v3961_v33, %v2403_v5  ;;  %v2341_v49 = vld [vmem:[%s2416_s30 + $0x88] sm:$0x3] }
 0x12e   : > { %v1044_v27 = vsel %vm416_vm0, %v4697_v45, %v1043_v39  ;;  %v573_v55 = vmul.f32 %v2340_v36, %v2407_v7  ;;  %v1406_v22 = vadd.f32 %v1374_v60, %v1341_v56  ;;  %v435_v43 = vrot.slane %v331_v3, 1 }
 0x12f   : > { %v1285_v63 = vsel %vm658_vm1, %v4698_v44, %v1284_v32  ;;  %v867_v31 = vadd.f32 %v835_v34, %v802_v11  ;;  %v880_v50 = vmul.f32 %v3764_v40, %v2411_v9  ;;  %v4699_v46 = vrot.slane %v3940_v61, 1 }
 0x130   : > { %v677_v16 = vrot.slane %v573_v55, 2  ;;  %v811_v2 = vmul.f32 %v3566_v18, %v2409_v8  ;;  %v1121_v33 = vmul.f32 %v3764_v40, %v2418_v10  ;;  %v1647_v20 = vadd.f32 %v1571_v25, %v1406_v22  ;;  %v4199_v18 = vpop.f32.mrf.mxu0  ;;  %v4201_v40 = vpop.f32.mrf.mxu1 }
 0x131   : > { %v1591_v29 = vsel %vm416_vm0, %v4699_v46, %v1590_v28  ;;  %v1108_v39 = vadd.f32 %v1044_v27, %v867_v31  ;;  %v4700_v60 = vrot.slane %v3965_v21, 1  ;;  %v983_v48 = vrot.slane %v880_v50, 1  ;;  %v4207_v56 = vpop.f32.mrf.mxu3  ;;  %v4706_v46 = vld [vmem:[#allocation9_spill] sm:$0xff] }
 0x132   : > { %v4701_v23 = vrot.slane %v3973_v37, 2  ;;  %v1224_v0 = vrot.slane %v1121_v33, 2  ;;  %v1427_v32 = vmul.f32 %v2341_v49, %v2429_v15  ;;  %v1888_v25 = vadd.f32 %v1812_v30, %v1647_v20  ;;  %v2070_v37 = vpop.f32.mrf.mxu2 }
 0x133   : > { %v436_v34 = vsel %vm416_vm0, %v4700_v60, %v435_v43  ;;  %v1349_v42 = vadd.f32 %v1285_v63, %v1108_v39  ;;  %v4702_v21 = vrot.slane %v3950_v24, 2  ;;  %v1668_v62 = vmul.f32 %v2341_v49, %v4086_v4  ;;  %v2342_v63 = vld [vmem:[%s2416_s30 + $0xb8] sm:$0x3]  ;;  %v2343_v39 = vld [vmem:[%s2416_s30 + $0xe8] sm:$0x3] }
 0x134   : > { %v536_v52 = vadd.f32 %v436_v34, %v262_v59  ;;  %v678_v61 = vsel %vm658_vm1, %v4701_v23, %v677_v16  ;;  %v4703_v45 = vrot.slane %v3983_v54, 1  ;;  %v1358_v36 = vmul.f32 %v4005_v51, %v2427_v14  ;;  %2265 = vmatmul.msk.f32.gmra.mxu2 %vm1905_vm2, %v1888_v25  ;;  %v4707_v16 = vld [vmem:[#allocation13_spill] sm:$0xff] }
 0x135   : > { %v1832_v28 = vsel %vm658_vm1, %v4702_v21, %v1831_v47  ;;  %v1530_v3 = vrot.slane %v1427_v32, 1  ;;  %v1414_v30 = vadd.f32 %v1382_v26, %v1349_v42  ;;  %v4704_v24 = vrot.slane %v3995_v19, 2  ;;  %v4712_v21 = vld [vmem:[#allocation4_spill] sm:$0xff] }
 0x136   : > { %v778_v11 = vadd.f32 %v678_v61, %v536_v52  ;;  %v984_v27 = vsel %vm416_vm0, %v4703_v45, %v983_v48  ;;  %v343_v47 = vmul.f32 %v2342_v63, %v2405_v6  ;;  %v585_v59 = vmul.f32 %v2342_v63, %v2407_v7  ;;  %v4231_v6 = vld [vmem:[%s4381_s3] ss:$0 sm:$0xff]  ;;  %v4711_v61 = vld [vmem:[#allocation12_spill] sm:$0xff] }
 0x137   : > { %v1225_v44 = vsel %vm658_vm1, %v4704_v24, %v1224_v0  ;;  %v1771_v54 = vrot.slane %v1668_v62, 2  ;;  %v270_v22 = vmul.f32 %v4031_v17, %v2403_v5  ;;  %v892_v51 = vmul.f32 %v3803_v38, %v2411_v9 }
 0x138   : > { %v843_v55 = vadd.f32 %v811_v2, %v778_v11  ;;  %v1655_v26 = vadd.f32 %v1591_v29, %v1414_v30  ;;  %v4705_v19 = vrot.slane %v4009_v57, 1  ;;  %v455_v43 = vrot.slane %v343_v47, 1  ;;  %v2049_v23 = vpop.f32.mrf.mxu1 }
 0x139   : > { %v697_v50 = vrot.slane %v585_v59, 2  ;;  %v819_v5 = vmul.f32 %v4706_v46, %v2409_v8  ;;  %v1003_v17 = vrot.slane %v892_v51, 1  ;;  %v1133_v9 = vmul.f32 %v3803_v38, %v2418_v10  ;;  %v2025_v38 = vpop.f32.mrf.mxu0  ;;  %v2097_v32 = vpop.f32.mrf.mxu3 }
 0x13a   : > { %v1531_v31 = vsel %vm416_vm0, %v4705_v19, %v1530_v3  ;;  %v1084_v7 = vadd.f32 %v984_v27, %v843_v55  ;;  %v1896_v29 = vadd.f32 %v1832_v28, %v1655_v26  ;;  %v4708_v57 = vrot.slane %v4707_v16, 1 }
 0x13b   : > { %v4709_v33 = vrot.slane %v4042_v35, 2  ;;  %v1439_v60 = vmul.f32 %v2343_v39, %v2429_v15  ;;  %v4710_v8 = vrot.slane %v4019_v1, 2  ;;  %v1244_v10 = vrot.slane %v1133_v9, 2  ;;  %v2073_v1 = vpop.f32.mrf.mxu2 }
 0x13c   : > { %v456_v2 = vsel %vm416_vm0, %v4708_v57, %v455_v43  ;;  %v1325_v34 = vadd.f32 %v1225_v44, %v1084_v7  ;;  %2273 = vmatmul.msk.f32.gmra.mxu3 %vm1905_vm2, %v1896_v29  ;;  %v1366_v35 = vmul.f32 %v4711_v61, %v2427_v14  ;;  %v1680_v0 = vmul.f32 %v2343_v39, %v4086_v4  ;;  %v4714_v4 = vld [vmem:[#allocation10_spill] sm:$0xff] }
 0x13d   : > { %v698_v20 = vsel %vm658_vm1, %v4709_v33, %v697_v50  ;;  %v1772_v48 = vsel %vm658_vm1, %v4710_v8, %v1771_v54  ;;  %v544_v52 = vadd.f32 %v456_v2, %v270_v22  ;;  %v2020_v15 = vadd.f32 %v4231_v6, %v4153_v58  ;;  %v4716_v50 = vld [vmem:[#allocation2_spill] sm:$0xff] }
 0x13e   : > { %v2044_v49 = vadd.f32 %v4231_v6, %v4155_v13  ;;  %v1390_v25 = vadd.f32 %v1358_v36, %v1325_v34  ;;  %v4713_v28 = vrot.slane %v4712_v21, 1  ;;  %v2068_v14 = vadd.f32 %v4231_v6, %v4161_v41 }
 0x13f   : > { %v786_v42 = vadd.f32 %v698_v20, %v544_v52  ;;  %v4715_v58 = vrot.slane %v4714_v4, 2  ;;  %v1550_v11 = vrot.slane %v1439_v60, 1  ;;  %v2115_v45 = vmax.f32 %v2020_v15, 0.0 }
 0x140   : > { %v1004_v62 = vsel %vm416_vm0, %v4713_v28, %v1003_v17  ;;  %v2123_v27 = vmax.f32 %v2044_v49, 0.0  ;;  %v1631_v36 = vadd.f32 %v1531_v31, %v1390_v25  ;;  %v2131_v30 = vmax.f32 %v2068_v14, 0.0  ;;  %v2052_v43 = vpop.f32.mrf.mxu1 }
 0x141   : > { %v1245_v13 = vsel %vm658_vm1, %v4715_v58, %v1244_v10  ;;  %v851_v3 = vadd.f32 %v819_v5, %v786_v42  ;;  %v2092_v24 = vadd.f32 %v4231_v6, %v4163_v12  ;;  %v1791_v44 = vrot.slane %v1680_v0, 2  ;;  %2147 = vst.msk [vmem:[%s4263_s17] sm:$0xff] %vm1905_vm2, %v2115_v45  ;;  %v2100_v16 = vpop.f32.mrf.mxu3 }
 0x142   : > { %v2023_v41 = vadd.f32 %v4231_v6, %v4199_v18  ;;  %v2047_v63 = vadd.f32 %v4231_v6, %v4201_v40  ;;  %v2071_v47 = vadd.f32 %v4231_v6, %v2070_v37  ;;  %v1872_v59 = vadd.f32 %v1772_v48, %v1631_v36  ;;  %2155 = vst.msk [vmem:[%s4263_s17 + $0x40] sm:$0xff] %vm1905_vm2, %v2123_v27 }
 0x143   : > { %v1092_v55 = vadd.f32 %v1004_v62, %v851_v3  ;;  %v2139_v54 = vmax.f32 %v2092_v24, 0.0  ;;  %v2095_v12 = vadd.f32 %v4231_v6, %v4207_v56  ;;  %2163 = vst.msk [vmem:[%s4263_s17 + $0x80] sm:$0xff] %vm1905_vm2, %v2131_v30  ;;  %v2026_v18 = vadd.f32 %v4231_v6, %v2025_v38  ;;  %v2028_v56 = vpop.f32.mrf.mxu0  ;;  %v2076_v29 = vpop.f32.mrf.mxu2 }
 0x144   : > { %v2116_v22 = vmax.f32 %v2023_v41, 0.0  ;;  %v2124_v51 = vmax.f32 %v2047_v63, 0.0  ;;  %v2132_v26 = vmax.f32 %v2071_v47, 0.0  ;;  %2249 = vmatmul.msk.f32.gmra.mxu0 %vm1905_vm2, %v1872_v59  ;;  %v2050_v19 = vadd.f32 %v4231_v6, %v2049_v23 }
 0x145   : > { %v1333_v40 = vadd.f32 %v1245_v13, %v1092_v55  ;;  %2171 = vst.msk [vmem:[%s4263_s17 + $0xc0] sm:$0xff] %vm1905_vm2, %v2139_v54  ;;  %v2140_v37 = vmax.f32 %v2095_v12, 0.0  ;;  %v2074_v31 = vadd.f32 %v4231_v6, %v2073_v1  ;;  %v4717_v7 = vrot.slane %v4716_v50, 1 }
 0x146   : > { %2148 = vst.msk [vmem:[%s4263_s17 + $0x8] sm:$0xff] %vm1905_vm2, %v2116_v22  ;;  %v2117_v5 = vmax.f32 %v2026_v18, 0.0  ;;  %v2098_v17 = vadd.f32 %v4231_v6, %v2097_v32  ;;  %v2029_v9 = vadd.f32 %v4231_v6, %v2028_v56  ;;  %v2125_v2 = vmax.f32 %v2050_v19, 0.0 }
 0x147   : > { %v1551_v46 = vsel %vm416_vm0, %v4717_v7, %v1550_v11  ;;  %v1398_v57 = vadd.f32 %v1366_v35, %v1333_v40  ;;  %2156 = vst.msk [vmem:[%s4263_s17 + $0x48] sm:$0xff] %vm1905_vm2, %v2124_v51  ;;  %v2053_v33 = vadd.f32 %v4231_v6, %v2052_v43  ;;  %v4718_v20 = vrot.slane %v4091_v53, 2 }
 0x148   : > { %2164 = vst.msk [vmem:[%s4263_s17 + $0x88] sm:$0xff] %vm1905_vm2, %v2132_v26  ;;  %v2133_v60 = vmax.f32 %v2074_v31, 0.0  ;;  %v2077_v34 = vadd.f32 %v4231_v6, %v2076_v29  ;;  %v2141_v48 = vmax.f32 %v2098_v17, 0.0  ;;  %v2101_v52 = vadd.f32 %v4231_v6, %v2100_v16 }
 0x149   : > { %v1792_v39 = vsel %vm658_vm1, %v4718_v20, %v1791_v44  ;;  %v1639_v8 = vadd.f32 %v1551_v46, %v1398_v57  ;;  %2172 = vst.msk [vmem:[%s4263_s17 + $0xc8] sm:$0xff] %vm1905_vm2, %v2140_v37  ;;  %v2118_v53 = vmax.f32 %v2029_v9, 0.0  ;;  %v2126_v38 = vmax.f32 %v2053_v33, 0.0 }
 0x14a   : > { %2149 = vst.msk [vmem:[%s4263_s17 + $0x10] sm:$0xff] %vm1905_vm2, %v2117_v5  ;;  %v2134_v23 = vmax.f32 %v2077_v34, 0.0  ;;  %v2142_v61 = vmax.f32 %v2101_v52, 0.0 }
 0x14b   : > { %v1880_v10 = vadd.f32 %v1792_v39, %v1639_v8  ;;  %2157 = vst.msk [vmem:[%s4263_s17 + $0x50] sm:$0xff] %vm1905_vm2, %v2125_v2  ;;  %v2079_v35 = vpop.f32.mrf.mxu2  ;;  %v2103_v49 = vpop.f32.mrf.mxu3 }
 0x14c   : > { %2165 = vst.msk [vmem:[%s4263_s17 + $0x90] sm:$0xff] %vm1905_vm2, %v2133_v60  ;;  %v2080_v0 = vadd.f32 %v4231_v6, %v2079_v35  ;;  %v2104_v1 = vadd.f32 %v4231_v6, %v2103_v49 }
 0x14d   : > { %2257 = vmatmul.msk.f32.gmra.mxu1 %vm1905_vm2, %v1880_v10  ;;  %2173 = vst.msk [vmem:[%s4263_s17 + $0xd0] sm:$0xff] %vm1905_vm2, %v2141_v48 }
 0x14e   : > { %2150 = vst.msk [vmem:[%s4263_s17 + $0x18] sm:$0xff] %vm1905_vm2, %v2118_v53  ;;  %v2135_v15 = vmax.f32 %v2080_v0, 0.0  ;;  %v2143_v32 = vmax.f32 %v2104_v1, 0.0 }
 0x14f   : > { %2158 = vst.msk [vmem:[%s4263_s17 + $0x58] sm:$0xff] %vm1905_vm2, %v2126_v38  ;;  %v2031_v25 = vpop.f32.mrf.mxu0 }
 0x150   : > { %2166 = vst.msk [vmem:[%s4263_s17 + $0x98] sm:$0xff] %vm1905_vm2, %v2134_v23  ;;  %v2032_v42 = vadd.f32 %v4231_v6, %v2031_v25 }
 0x151   : > { %2174 = vst.msk [vmem:[%s4263_s17 + $0xd8] sm:$0xff] %vm1905_vm2, %v2142_v61 }
 0x152   : > { %2167 = vst.msk [vmem:[%s4263_s17 + $0xa0] sm:$0xff] %vm1905_vm2, %v2135_v15  ;;  %v2119_v21 = vmax.f32 %v2032_v42, 0.0 }
 0x153   : > { %2175 = vst.msk [vmem:[%s4263_s17 + $0xe0] sm:$0xff] %vm1905_vm2, %v2143_v32 }
 0x154   : > { %2151 = vst.msk [vmem:[%s4263_s17 + $0x20] sm:$0xff] %vm1905_vm2, %v2119_v21 }
 0x15a   : > { %v2055_v28 = vpop.f32.mrf.mxu1 }
 0x15b   : > { %v2056_v62 = vadd.f32 %v4231_v6, %v2055_v28 }
 0x15d   : > { %v2127_v14 = vmax.f32 %v2056_v62, 0.0 }
 0x15f   : > { %2159 = vst.msk [vmem:[%s4263_s17 + $0x60] sm:$0xff] %vm1905_vm2, %v2127_v14 }
 0x16c   : > { %v2082_v4 = vpop.f32.mrf.mxu2 }
 0x16d   : > { %v2083_v58 = vadd.f32 %v4231_v6, %v2082_v4 }
 0x16f   : > { %v2136_v13 = vmax.f32 %v2083_v58, 0.0 }
 0x171   : > { %2168 = vst.msk [vmem:[%s4263_s17 + $0xa8] sm:$0xff] %vm1905_vm2, %v2136_v13 }
 0x173   : > { %v2106_v11 = vpop.f32.mrf.mxu3 }
 0x174   : > { %v2107_v27 = vadd.f32 %v4231_v6, %v2106_v11 }
 0x176   : > { %v2034_v45 = vpop.f32.mrf.mxu0  ;;  %v2144_v3 = vmax.f32 %v2107_v27, 0.0 }
 0x177   : > { %v2035_v36 = vadd.f32 %v4231_v6, %v2034_v45 }
 0x178   : > { %2176 = vst.msk [vmem:[%s4263_s17 + $0xe8] sm:$0xff] %vm1905_vm2, %v2144_v3 }
 0x179   : > { %v2120_v30 = vmax.f32 %v2035_v36, 0.0 }
 0x17b   : > { %2152 = vst.msk [vmem:[%s4263_s17 + $0x28] sm:$0xff] %vm1905_vm2, %v2120_v30 }
 0x17f   : > { %v2058_v24 = vpop.f32.mrf.mxu1 }
 0x180   : > { %v2059_v44 = vadd.f32 %v4231_v6, %v2058_v24 }
 0x182   : > { %v2128_v41 = vmax.f32 %v2059_v44, 0.0 }
 0x184   : > { %2160 = vst.msk [vmem:[%s4263_s17 + $0x68] sm:$0xff] %vm1905_vm2, %v2128_v41 }
 0x18b   : > { %v2085_v63 = vpop.f32.mrf.mxu2 }
 0x18c   : > { %v2086_v47 = vadd.f32 %v4231_v6, %v2085_v63 }
 0x18e   : > { %v2137_v59 = vmax.f32 %v2086_v47, 0.0 }
 0x190   : > { %2169 = vst.msk [vmem:[%s4263_s17 + $0xb0] sm:$0xff] %vm1905_vm2, %v2137_v59 }
 0x197   : > { %v2109_v55 = vpop.f32.mrf.mxu3 }
 0x198   : > { %v2110_v54 = vadd.f32 %v4231_v6, %v2109_v55 }
 0x19a   : > { %v2145_v12 = vmax.f32 %v2110_v54, 0.0 }
 0x19b   : > { %v2037_v22 = vpop.f32.mrf.mxu0 }
 0x19c   : > { %v2038_v51 = vadd.f32 %v4231_v6, %v2037_v22  ;;  %2177 = vst.msk [vmem:[%s4263_s17 + $0xf0] sm:$0xff] %vm1905_vm2, %v2145_v12 }
 0x19e   : > { %v2121_v26 = vmax.f32 %v2038_v51, 0.0 }
 0x1a0   : > { %2153 = vst.msk [vmem:[%s4263_s17 + $0x30] sm:$0xff] %vm1905_vm2, %v2121_v26 }
 0x1a6   : > { %v2061_v18 = vpop.f32.mrf.mxu1 }
 0x1a7   : > { %v2062_v40 = vadd.f32 %v4231_v6, %v2061_v18 }
 0x1a9   : > { %v2129_v37 = vmax.f32 %v2062_v40, 0.0 }
 0x1ab   : > { %2161 = vst.msk [vmem:[%s4263_s17 + $0x70] sm:$0xff] %vm1905_vm2, %v2129_v37 }
 0x1b7   : > { %v2088_v19 = vpop.f32.mrf.mxu2 }
 0x1b8   : > { %v2089_v31 = vadd.f32 %v4231_v6, %v2088_v19 }
 0x1ba   : > { %v2138_v56 = vmax.f32 %v2089_v31, 0.0 }
 0x1bc   : > { %2170 = vst.msk [vmem:[%s4263_s17 + $0xb8] sm:$0xff] %vm1905_vm2, %v2138_v56 }
 0x1bf   : > { %v2112_v43 = vpop.f32.mrf.mxu3 }
 0x1c0   : > { %v2113_v7 = vadd.f32 %v4231_v6, %v2112_v43 }
 0x1c1   : > { %v2040_v50 = vpop.f32.mrf.mxu0 }
 0x1c2   : > { %v2041_v46 = vadd.f32 %v4231_v6, %v2040_v50  ;;  %v2146_v5 = vmax.f32 %v2113_v7, 0.0 }
 0x1c4   : > { %v2122_v17 = vmax.f32 %v2041_v46, 0.0  ;;  %2178 = vst.msk [vmem:[%s4263_s17 + $0xf8] sm:$0xff] %vm1905_vm2, %v2146_v5 }
 0x1c6   : > { %2154 = vst.msk [vmem:[%s4263_s17 + $0x38] sm:$0xff] %vm1905_vm2, %v2122_v17 }
 0x1ca   : > { %v2064_v9 = vpop.f32.mrf.mxu1 }
 0x1cb   : > { %v2065_v29 = vadd.f32 %v4231_v6, %v2064_v9 }
 0x1cd   : > { %v2130_v16 = vmax.f32 %v2065_v29, 0.0 }
 0x1cf   : > { %2162 = vst.msk [vmem:[%s4263_s17 + $0x78] sm:$0xff] %vm1905_vm2, %v2130_v16 }
 0x1d0 PF: > { %s14_s15 = sadd.s32 1, %s2350_s15  }
 0x1d1   : > { %p11_p4 = scmp.ge.s32.totalorder %s14_s15, 4  }
 0x1d3   :  { %13 = sbr.rel (!%p11_p4) target bundleno = 1 (0x1), region = 66 }

// kernel: conv_forward.4
= control target key start
LH: loop header
LB: loop body
LE: loop exit
PB: predicated region body
PF: predicated region fallthrough
CT: control target
= control target key end

     0   :  { %s2784_s21 = smov 0   ;;  %s4977_s0 = inlined_call_operand.vmem [shape: f32[2,18,18,32], index: 0, kind: input, shape index: {}]   ;;  %s4978_s1 = inlined_call_operand.vmem [shape: f32[9,32], index: 1, kind: input, shape index: {}]   ;;  %s4979_s2 = inlined_call_operand.vmem [shape: f32[32,32], index: 2, kind: input, shape index: {}]   ;;  %s4980_s3 = inlined_call_operand.vmem [shape: f32[1,32], index: 3, kind: input, shape index: {}]   ;;  %s4981_s4 = inlined_call_operand.vmem [shape: f32[2,16,16,32], index: 4, kind: output, shape index: {0}]   ;;  %s4982_s5 = inlined_call_operand.vmem [shape: f32[2,16,32], index: 5, kind: output, shape index: {1}]   ;;  %s4983_s6 = inlined_call_operand.vmem [shape: f32[2,16,32], index: 6, kind: output, shape index: {2}]  }
   0x1 LB: > { %s2621_s22 = sadd.s32 4294967295, %s2746_s21   ;;  %p2625_p0 = scmp.ge.s32.totalorder %s2746_s21, 1  ;;  %s2746_s21 = sphi %s2784_s21, %s17_s21  }
   0x2   : > { %p217_p1 = scmp.lt.s32.totalorder %s2746_s21, 3 }
   0x4   : > { %p218_p2 = pnand %p2625_p0, %p217_p1 }
   0x6   : > { %221 = sbr.rel (%p218_p2) target bundleno = 489 (0x1e9), region = 36 }
   0xb   : > { %v1979_v0 = vld [vmem:[%s4979_s2 + $0x18] sm:$0xff]  ;;  %v1978_v1 = vld [vmem:[%s4979_s2 + $0x10] sm:$0xff]  ;;  %p257_p3 = scmp.lt.s32.totalorder %s2621_s22, 1  ;;  %v331_v2 = vld [vmem:[%s4978_s1] sm:$0xff]  ;;  %vm495_vm0 = vcmask 1046528   ;;  %vm737_vm1 = vcmask 1045504  }
   0xc   : > { %2093 = vmatpush.msra.mxu0 %v1979_v0  ;;  %2670 = vmatpush.msra.mxu1 %v1979_v0  ;;  %v1977_v3 = vld [vmem:[%s4979_s2 + $0x8] sm:$0xff]  ;;  %v1976_v4 = vld [vmem:[%s4979_s2] sm:$0xff]  ;;  %v2810_v5 = vperm.slane %v331_v2, 0  ;;  %v2812_v6 = vperm.slane %v331_v2, 1  ;;  %v2814_v7 = vperm.slane %v331_v2, 2  ;;  %v2816_v8 = vperm.slane %v331_v2, 3 }
   0xd   : > { %2671 = vmatpush.msra.mxu2 %v1979_v0  ;;  %2672 = vmatpush.msra.mxu3 %v1979_v0  ;;  %s5339_s22 = smov (!%p257_p3, %s2621_s22), 1  ;;  %v2818_v9 = vperm.slane %v331_v2, 4  ;;  %v2825_v10 = vperm.slane %v331_v2, 5  ;;  %v2834_v14 = vperm.slane %v331_v2, 6  ;;  %v2845_v19 = vperm.slane %v331_v2, 7 }
   0xe   : > { %2094 = vmatpush.msra.mxu0 %v1978_v1  ;;  %2673 = vmatpush.msra.mxu1 %v1978_v1  ;;  %s2682_s9 = smul.u32 432, %s5339_s22  ;;  %v2869_v29 = vld [vmem:[%s4978_s1 + $0x8] ss:$0 sm:$0xff]  ;;  %vm1984_vm2 = vcmask 261120   ;;  %s2667_s23 = sshll.u32 %s5339_s22, 8  ;;  %vm2441_vm4 = vcmask 1041409  }
   0xf   : > { %2674 = vmatpush.msra.mxu2 %v1978_v1  ;;  %2675 = vmatpush.msra.mxu3 %v1978_v1  ;;  %s4663_s26 = scalar_lea.vmem %s4981_s4, %s2667_s23  ;;  %vm2443_vm5 = vcmask 1042434   ;;  %s2668_s27 = sshll.u32 %s5339_s22, 4  ;;  %vm2445_vm6 = vcmask 1043459   ;;  %vm2447_vm7 = vcmask 1044484   ;;  %vm2449_vm8 = vcmask 1045509  }
  0x10   : > { %2095 = vmatpush.msra.mxu0 %v1977_v3  ;;  %2676 = vmatpush.msra.mxu1 %v1977_v3  ;;  %s2823_s12 = scalar_lea.vmem %s4977_s0, %s2682_s9  ;;  %s4900_s30 = scalar_lea.vmem %s4983_s6, %s2668_s27  ;;  %vm2451_vm9 = vcmask 1046534   ;;  %vm2453_vm10 = vcmask 1047559  }
  0x11   : > { %2677 = vmatpush.msra.mxu2 %v1977_v3  ;;  %2678 = vmatpush.msra.mxu3 %v1977_v3  ;;  %v277_v11 = vld [vmem:[%s2823_s12] sm:$0xff]  ;;  %v2829_v12 = vld [vmem:[%s2823_s12 + $0x8] sm:$0xff]  ;;  %v2832_v13 = vld [vmem:[%s2823_s12 + $0x18] sm:$0xff]  ;;  %s4944_s9 = scalar_lea.vmem %s4982_s5, %s2668_s27 }
  0x12   : > { %2096 = vmatpush.msra.mxu0 %v1976_v4  ;;  %2679 = vmatpush.msra.mxu1 %v1976_v4  ;;  %5150 = vst [vmem:[#allocation2_spill] sm:$0xff] %v2832_v13  ;;  %v2837_v15 = vld [vmem:[%s2823_s12 + $0x20] sm:$0xff]  ;;  %v334_v16 = vmul.f32 %v2810_v5, %v277_v11  ;;  %v399_v17 = vmul.f32 %v2812_v6, %v277_v11  ;;  %v2848_v20 = vld [vmem:[%s2823_s12 + $0x30] sm:$0xff]  ;;  %v2872_v30 = vld [vmem:[%s2823_s12 + $0x38] sm:$0xff] }
  0x13   : > { %2680 = vmatpush.msra.mxu2 %v1976_v4  ;;  %2681 = vmatpush.msra.mxu3 %v1976_v4  ;;  %v2843_v18 = vmul.f32 %v2812_v6, %v2829_v12  ;;  %5151 = vst [vmem:[#allocation3_spill] sm:$0xff] %v2848_v20  ;;  %v641_v21 = vmul.f32 %v2814_v7, %v277_v11  ;;  %v289_v43 = vld [vmem:[%s2823_s12 + $0x60] sm:$0xff]  ;;  %v2906_v48 = vld [vmem:[%s2823_s12 + $0x68] sm:$0xff]  ;;  %v2912_v52 = vld [vmem:[%s2823_s12 + $0x78] sm:$0xff] }
  0x14   : > { %v2853_v22 = vmul.f32 %v2814_v7, %v2829_v12  ;;  %v883_v23 = vmul.f32 %v2816_v8, %v2832_v13  ;;  %v948_v24 = vmul.f32 %v2818_v9, %v2832_v13  ;;  %v496_v25 = vrot.slane %v399_v17, 1  ;;  %5152 = vst [vmem:[#allocation4_spill] sm:$0xff] %v2872_v30  ;;  %v2919_v59 = vld [vmem:[%s2823_s12 + $0x80] sm:$0xff]  ;;  %v2937_v1 = vld [vmem:[%s2823_s12 + $0x90] sm:$0xff] }
  0x15   : > { %v4999_v26 = vrot.slane %v2843_v18, 1  ;;  %v2862_v27 = vmul.f32 %v2818_v9, %v2837_v15  ;;  %v1189_v28 = vmul.f32 %v2825_v10, %v2832_v13  ;;  %v738_v31 = vrot.slane %v641_v21, 2  ;;  %5153 = vst [vmem:[#allocation5_spill] sm:$0xff] %v2912_v52  ;;  %v2944_v21 = vld [vmem:[%s2823_s12 + $0x98] sm:$0xff] }
  0x16   : > { %v4998_v32 = vrot.slane %v2853_v22, 2  ;;  %v1044_v33 = vrot.slane %v948_v24, 1  ;;  %v2877_v34 = vmul.f32 %v2825_v10, %v2837_v15  ;;  %v1430_v38 = vmul.f32 %v2834_v14, %v2848_v20  ;;  %5154 = vst [vmem:[#allocation6_spill] sm:$0xff] %v2937_v1 }
  0x17   : > { %v498_v35 = vsel %vm495_vm0, %v496_v25, %v4999_v26  ;;  %v4996_v36 = vrot.slane %v2862_v27, 1  ;;  %v1285_v37 = vrot.slane %v1189_v28, 2  ;;  %v1495_v42 = vmul.f32 %v2845_v19, %v2848_v20 }
  0x18   : > { %v608_v39 = vadd.f32 %v498_v35, %v334_v16  ;;  %v740_v40 = vsel %vm737_vm1, %v738_v31, %v4998_v32  ;;  %v4993_v41 = vrot.slane %v2877_v34, 2  ;;  %v2897_v45 = vmul.f32 %v2845_v19, %v2872_v30 }
  0x19   : > { %v1046_v44 = vsel %vm495_vm0, %v1044_v33, %v4996_v36  ;;  %v1736_v46 = vmul.f32 %v2869_v29, %v2848_v20  ;;  %v2903_v47 = vmul.f32 %v2869_v29, %v2872_v30  ;;  %v1591_v51 = vrot.slane %v1495_v42, 1 }
  0x1a   : > { %v850_v49 = vadd.f32 %v740_v40, %v608_v39  ;;  %v1287_v50 = vsel %vm737_vm1, %v1285_v37, %v4993_v41  ;;  %v342_v53 = vmul.f32 %v2810_v5, %v289_v43  ;;  %v4992_v54 = vrot.slane %v2897_v45, 1 }
  0x1b   : > { %v1832_v55 = vrot.slane %v1736_v46, 2  ;;  %v4990_v56 = vrot.slane %v2903_v47, 2  ;;  %v411_v57 = vmul.f32 %v2812_v6, %v289_v43  ;;  %v2923_v60 = vmul.f32 %v2812_v6, %v2906_v48 }
  0x1c   : > { %v915_v58 = vadd.f32 %v883_v23, %v850_v49  ;;  %v653_v61 = vmul.f32 %v2814_v7, %v289_v43  ;;  %v2928_v62 = vmul.f32 %v2814_v7, %v2906_v48  ;;  %v1593_v63 = vsel %vm495_vm0, %v1591_v51, %v4992_v54 }
  0x1d   : > { %v1834_v0 = vsel %vm737_vm1, %v1832_v55, %v4990_v56  ;;  %v516_v2 = vrot.slane %v411_v57, 1  ;;  %v891_v3 = vmul.f32 %v2816_v8, %v2912_v52  ;;  %v4989_v11 = vrot.slane %v2923_v60, 1  ;;  %v301_v57 = vld [vmem:[%s2823_s12 + $0xc0] sm:$0xff] }
  0x1e   : > { %v1156_v4 = vadd.f32 %v1046_v44, %v915_v58  ;;  %v758_v16 = vrot.slane %v653_v61, 2  ;;  %v4988_v17 = vrot.slane %v2928_v62, 2  ;;  %v960_v23 = vmul.f32 %v2818_v9, %v2912_v52  ;;  %v2985_v58 = vld [vmem:[%s2823_s12 + $0xc8] sm:$0xff] }
  0x1f   : > { %v2950_v24 = vmul.f32 %v2818_v9, %v2919_v59  ;;  %v1201_v25 = vmul.f32 %v2825_v10, %v2912_v52  ;;  %v2956_v28 = vmul.f32 %v2825_v10, %v2919_v59  ;;  %v518_v33 = vsel %vm495_vm0, %v516_v2, %v4989_v11 }
  0x20   : > { %v1397_v31 = vadd.f32 %v1287_v50, %v1156_v4  ;;  %v760_v35 = vsel %vm737_vm1, %v758_v16, %v4988_v17  ;;  %v1438_v37 = vmul.f32 %v2834_v14, %v2937_v1  ;;  %v616_v39 = vadd.f32 %v518_v33, %v342_v53  ;;  %v2993_v33 = vld [vmem:[%s2823_s12 + $0xd8] sm:$0xff] }
  0x21   : > { %v1064_v40 = vrot.slane %v960_v23, 1  ;;  %v4987_v42 = vrot.slane %v2950_v24, 1  ;;  %v1305_v43 = vrot.slane %v1201_v25, 2  ;;  %v4986_v46 = vrot.slane %v2956_v28, 2  ;;  %5155 = vst [vmem:[#allocation7_spill] sm:$0xff] %v2993_v33 }
  0x22   : > { %v1462_v44 = vadd.f32 %v1430_v38, %v1397_v31  ;;  %v1507_v49 = vmul.f32 %v2845_v19, %v2937_v1  ;;  %v2972_v50 = vmul.f32 %v2845_v19, %v2944_v21  ;;  %v858_v51 = vadd.f32 %v760_v35, %v616_v39 }
  0x23   : > { %v1066_v53 = vsel %vm495_vm0, %v1064_v40, %v4987_v42  ;;  %v1748_v55 = vmul.f32 %v2869_v29, %v2937_v1  ;;  %v2981_v38 = vmul.f32 %v2869_v29, %v2944_v21  ;;  %v1307_v2 = vsel %vm737_vm1, %v1305_v43, %v4986_v46  ;;  %v3000_v40 = vld [vmem:[%s2823_s12 + $0xe0] sm:$0xff] }
  0x24   : > { %v1703_v61 = vadd.f32 %v1593_v63, %v1462_v44  ;;  %v1611_v4 = vrot.slane %v1507_v49, 1  ;;  %v4984_v16 = vrot.slane %v2972_v50, 1  ;;  %v923_v23 = vadd.f32 %v891_v3, %v858_v51 }
  0x25   : > { %v1852_v25 = vrot.slane %v1748_v55, 2  ;;  %v4985_v31 = vrot.slane %v2981_v38, 2  ;;  %v350_v35 = vmul.f32 %v2810_v5, %v301_v57  ;;  %v423_v43 = vmul.f32 %v2812_v6, %v301_v57 }
  0x26   : > { %v1944_v39 = vadd.f32 %v1834_v0, %v1703_v61  ;;  %v1613_v63 = vsel %vm495_vm0, %v1611_v4, %v4984_v16  ;;  %v3005_v3 = vmul.f32 %v2812_v6, %v2985_v58  ;;  %v1164_v44 = vadd.f32 %v1066_v53, %v923_v23  ;;  %v3022_v16 = vld [vmem:[%s2823_s12 + $0xf0] sm:$0xff] }
  0x27   : > { %v1854_v49 = vsel %vm737_vm1, %v1852_v25, %v4985_v31  ;;  %v665_v0 = vmul.f32 %v2814_v7, %v301_v57  ;;  %v3013_v51 = vmul.f32 %v2814_v7, %v2985_v58  ;;  %v536_v55 = vrot.slane %v423_v43, 1  ;;  %5156 = vst [vmem:[#allocation8_spill] sm:$0xff] %v3022_v16 }
  0x28   : > { %2633 = vmatmul.msk.f32.vlgmr.msra.gmra.mxu0 %vm1984_vm2, %v1944_v39  ;;  %v4991_v61 = vrot.slane %v3005_v3, 1  ;;  %v899_v4 = vmul.f32 %v2816_v8, %v2993_v33  ;;  %v972_v53 = vmul.f32 %v2818_v9, %v2993_v33  ;;  %v1405_v23 = vadd.f32 %v1307_v2, %v1164_v44  ;;  %v3030_v39 = vld [vmem:[%s2823_s12 + $0xf8] sm:$0xff] }
  0x29   : > { %v778_v25 = vrot.slane %v665_v0, 2  ;;  %v4995_v57 = vrot.slane %v3013_v51, 2  ;;  %v3027_v31 = vmul.f32 %v2818_v9, %v3000_v40  ;;  %v1213_v2 = vmul.f32 %v2825_v10, %v2993_v33  ;;  %v3106_v33 = vld [vmem:[%s2823_s12 + $0x158] sm:$0xff] }
  0x2a   : > { %v538_v43 = vsel %vm495_vm0, %v536_v55, %v4991_v61  ;;  %v1084_v46 = vrot.slane %v972_v53, 1  ;;  %v3039_v44 = vmul.f32 %v2825_v10, %v3000_v40  ;;  %v1470_v0 = vadd.f32 %v1438_v37, %v1405_v23  ;;  %v313_v23 = vld [vmem:[%s2823_s12 + $0x120] sm:$0xff] }
  0x2b   : > { %v624_v42 = vadd.f32 %v538_v43, %v350_v35  ;;  %v780_v17 = vsel %vm737_vm1, %v778_v25, %v4995_v57  ;;  %v4994_v11 = vrot.slane %v3027_v31, 1  ;;  %v1325_v56 = vrot.slane %v1213_v2, 2  ;;  %v3059_v25 = vld [vmem:[%s2823_s12 + $0x128] sm:$0xff] }
  0x2c   : > { %v4997_v55 = vrot.slane %v3039_v44, 2  ;;  %v1446_v53 = vmul.f32 %v2834_v14, %v3022_v16  ;;  %v1519_v61 = vmul.f32 %v2845_v19, %v3022_v16  ;;  %v1711_v54 = vadd.f32 %v1613_v63, %v1470_v0 }
  0x2d   : > { %v866_v41 = vadd.f32 %v780_v17, %v624_v42  ;;  %v1086_v37 = vsel %vm495_vm0, %v1084_v46, %v4994_v11  ;;  %v3055_v35 = vmul.f32 %v2845_v19, %v3030_v39  ;;  %v1760_v17 = vmul.f32 %v2869_v29, %v3022_v16  ;;  %v3072_v11 = vld [vmem:[%s2823_s12 + $0x138] sm:$0xff] }
  0x2e   : > { %v1327_v43 = vsel %vm737_vm1, %v1325_v56, %v4997_v55  ;;  %v1631_v2 = vrot.slane %v1519_v61, 1  ;;  %v3068_v42 = vmul.f32 %v2869_v29, %v3030_v39  ;;  %v1952_v46 = vadd.f32 %v1854_v49, %v1711_v54  ;;  %5157 = vst [vmem:[#allocation9_spill] sm:$0xff] %v3072_v11  ;;  %v3086_v49 = vld [vmem:[%s2823_s12 + $0x140] sm:$0xff] }
  0x2f   : > { %v931_v63 = vadd.f32 %v899_v4, %v866_v41  ;;  %v5000_v0 = vrot.slane %v3055_v35, 1  ;;  %v358_v57 = vmul.f32 %v2810_v5, %v313_v23  ;;  %v1872_v36 = vrot.slane %v1760_v17, 2  ;;  %5159 = vst [vmem:[#allocation11_spill] sm:$0xff] %v3086_v49 }
  0x30   : > { %v5005_v56 = vrot.slane %v3068_v42, 2  ;;  %v435_v61 = vmul.f32 %v2812_v6, %v313_v23  ;;  %v3079_v55 = vmul.f32 %v2812_v6, %v3059_v25  ;;  %2641 = vmatmul.msk.f32.vlgmr.msra.gmra.mxu1 %vm1984_vm2, %v1952_v46  ;;  %v677_v4 = vmul.f32 %v2814_v7, %v313_v23 }
  0x31   : > { %v1172_v41 = vadd.f32 %v1086_v37, %v931_v63  ;;  %v1633_v54 = vsel %vm495_vm0, %v1631_v2, %v5000_v0  ;;  %v3091_v17 = vmul.f32 %v2814_v7, %v3059_v25  ;;  %v907_v37 = vmul.f32 %v2816_v8, %v3072_v11  ;;  %v3100_v2 = vld [vmem:[%s2823_s12 + $0x150] sm:$0xff] }
  0x32   : > { %5158 = vst [vmem:[#allocation10_spill] sm:$0xff] %v3079_v55  ;;  %v1874_v32 = vsel %vm737_vm1, %v1872_v36, %v5005_v56  ;;  %v556_v26 = vrot.slane %v435_v61, 1  ;;  %v5010_v46 = vrot.slane %v3079_v55, 1  ;;  %v798_v0 = vrot.slane %v677_v4, 2 }
  0x33   : > { %v1413_v63 = vadd.f32 %v1327_v43, %v1172_v41  ;;  %5160 = vst [vmem:[#allocation12_spill] sm:$0xff] %v3100_v2  ;;  %v5018_v23 = vrot.slane %v3091_v17, 2  ;;  %v984_v16 = vmul.f32 %v2818_v9, %v3072_v11  ;;  %v3113_v61 = vmul.f32 %v2818_v9, %v3086_v49 }
  0x34   : > { %v558_v36 = vsel %vm495_vm0, %v556_v26, %v5010_v46  ;;  %v1225_v43 = vmul.f32 %v2825_v10, %v3072_v11  ;;  %v3119_v41 = vmul.f32 %v2825_v10, %v3086_v49  ;;  %v1454_v11 = vmul.f32 %v2834_v14, %v3100_v2 }
  0x35   : > { %5161 = vst [vmem:[#allocation13_spill] sm:$0xff] %v3113_v61  ;;  %v1478_v4 = vadd.f32 %v1446_v53, %v1413_v63  ;;  %v632_v56 = vadd.f32 %v558_v36, %v358_v57  ;;  %v800_v1 = vsel %vm737_vm1, %v798_v0, %v5018_v23  ;;  %v1104_v52 = vrot.slane %v984_v16, 1  ;;  %v279_v16 = vld [vmem:[%s2823_s12 + $0x10] sm:$0x3]  ;;  %v3149_v23 = vld [vmem:[%s2823_s12 + $0x28] sm:$0x3] }
  0x36   : > { %v5020_v26 = vrot.slane %v3113_v61, 1  ;;  %v1345_v46 = vrot.slane %v1225_v43, 2  ;;  %v5021_v20 = vrot.slane %v3119_v41, 2  ;;  %v1531_v57 = vmul.f32 %v2845_v19, %v3100_v2  ;;  %5164 = vst [vmem:[#allocation16_spill] sm:$0xff] %v3149_v23 }
  0x37   : > { %v1719_v13 = vadd.f32 %v1633_v54, %v1478_v4  ;;  %v874_v55 = vadd.f32 %v800_v1, %v632_v56  ;;  %v3132_v53 = vmul.f32 %v2845_v19, %v3106_v33  ;;  %v1772_v54 = vmul.f32 %v2869_v29, %v3100_v2 }
  0x38   : > { %v1106_v0 = vsel %vm495_vm0, %v1104_v52, %v5020_v26  ;;  %v1347_v63 = vsel %vm737_vm1, %v1345_v46, %v5021_v20  ;;  %v3145_v1 = vmul.f32 %v2869_v29, %v3106_v33  ;;  %v1651_v43 = vrot.slane %v1531_v57, 1  ;;  %v3153_v26 = vld [vmem:[%s2823_s12 + $0x40] sm:$0x3] }
  0x39   : > { %5162 = vst [vmem:[#allocation14_spill] sm:$0xff] %v3132_v53  ;;  %v1960_v56 = vadd.f32 %v1874_v32, %v1719_v13  ;;  %v939_v36 = vadd.f32 %v907_v37, %v874_v55  ;;  %v5025_v4 = vrot.slane %v3132_v53, 1  ;;  %v1892_v61 = vrot.slane %v1772_v54, 2  ;;  %v3186_v53 = vld [vmem:[%s2823_s12 + $0x88] sm:$0x3] }
  0x3a   : > { %5163 = vst [vmem:[#allocation15_spill] sm:$0xff] %v3145_v1  ;;  %v5024_v52 = vrot.slane %v3145_v1, 2  ;;  %v335_v46 = vmul.f32 %v2810_v5, %v2829_v12  ;;  %v401_v20 = vmul.f32 %v2812_v6, %v279_v16  ;;  %v643_v32 = vmul.f32 %v2814_v7, %v279_v16  ;;  %v291_v1 = vld [vmem:[%s2823_s12 + $0x70] sm:$0x3] }
  0x3b   : > { %2649 = vmatmul.msk.f32.vlgmr.msra.gmra.mxu2 %vm1984_vm2, %v1960_v56  ;;  %v1180_v2 = vadd.f32 %v1106_v0, %v939_v36  ;;  %v1653_v13 = vsel %vm495_vm0, %v1651_v43, %v5025_v4  ;;  %v884_v55 = vmul.f32 %v2816_v8, %v2837_v15  ;;  %v950_v57 = vmul.f32 %v2818_v9, %v3149_v23 }
  0x3c   : > { %v1894_v37 = vsel %vm737_vm1, %v1892_v61, %v5024_v52  ;;  %v499_v12 = vrot.slane %v401_v20, 1  ;;  %v1191_v0 = vmul.f32 %v2825_v10, %v3149_v23  ;;  %v741_v56 = vrot.slane %v643_v32, 2 }
  0x3d   : > { %v1421_v54 = vadd.f32 %v1347_v63, %v1180_v2  ;;  %v1431_v16 = vmul.f32 %v2834_v14, %v2872_v30  ;;  %v1497_v36 = vmul.f32 %v2845_v19, %v3153_v26  ;;  %v5165_v43 = vrot.slane %v2843_v18, 1 }
  0x3e   : > { %v1047_v20 = vrot.slane %v950_v57, 1  ;;  %v1288_v52 = vrot.slane %v1191_v0, 2  ;;  %v1738_v4 = vmul.f32 %v2869_v29, %v3153_v26  ;;  %v5166_v63 = vrot.slane %v2853_v22, 2 }
  0x3f   : > { %v500_v61 = vsel %vm495_vm0, %v5165_v43, %v499_v12  ;;  %v1486_v23 = vadd.f32 %v1454_v11, %v1421_v54  ;;  %v1594_v30 = vrot.slane %v1497_v36, 1  ;;  %v5167_v18 = vrot.slane %v2862_v27, 1  ;;  %v3200_v36 = vld [vmem:[%s2823_s12 + $0xa0] sm:$0x3] }
  0x40   : > { %v609_v2 = vadd.f32 %v500_v61, %v335_v46  ;;  %v742_v32 = vsel %vm737_vm1, %v5166_v63, %v741_v56  ;;  %v5168_v57 = vrot.slane %v2877_v34, 2  ;;  %v1835_v43 = vrot.slane %v1738_v4, 2 }
  0x41   : > { %v1048_v12 = vsel %vm495_vm0, %v5167_v18, %v1047_v20  ;;  %v343_v11 = vmul.f32 %v2810_v5, %v2906_v48  ;;  %v1727_v46 = vadd.f32 %v1653_v13, %v1486_v23  ;;  %v5169_v22 = vrot.slane %v2897_v45, 1 }
  0x42   : > { %v1289_v0 = vsel %vm737_vm1, %v5168_v57, %v1288_v52  ;;  %v851_v54 = vadd.f32 %v742_v32, %v609_v2  ;;  %v413_v27 = vmul.f32 %v2812_v6, %v291_v1  ;;  %v5170_v61 = vrot.slane %v2903_v47, 2  ;;  %v303_v57 = vld [vmem:[%s2823_s12 + $0xd0] sm:$0x3] }
  0x43   : > { %v1595_v56 = vsel %vm495_vm0, %v5169_v22, %v1594_v30  ;;  %v655_v52 = vmul.f32 %v2814_v7, %v291_v1  ;;  %v892_v48 = vmul.f32 %v2816_v8, %v2919_v59  ;;  %v962_v23 = vmul.f32 %v2818_v9, %v3186_v53 }
  0x44   : > { %v1836_v34 = vsel %vm737_vm1, %v5170_v61, %v1835_v43  ;;  %v1968_v45 = vadd.f32 %v1894_v37, %v1727_v46  ;;  %v916_v4 = vadd.f32 %v884_v55, %v851_v54  ;;  %v519_v30 = vrot.slane %v413_v27, 1  ;;  %v3231_v61 = vld [vmem:[%s2823_s12 + $0xe8] sm:$0x3] }
  0x45   : > { %v1203_v13 = vmul.f32 %v2825_v10, %v3186_v53  ;;  %v761_v20 = vrot.slane %v655_v52, 2  ;;  %v1067_v47 = vrot.slane %v962_v23, 1  ;;  %v1439_v2 = vmul.f32 %v2834_v14, %v2944_v21 }
  0x46   : > { %v1509_v1 = vmul.f32 %v2845_v19, %v3200_v36  ;;  %2657 = vmatmul.msk.f32.vlgmr.msra.gmra.mxu3 %vm1984_vm2, %v1968_v45  ;;  %v1157_v63 = vadd.f32 %v1048_v12, %v916_v4  ;;  %v5171_v32 = vrot.slane %v2923_v60, 1  ;;  %v1750_v18 = vmul.f32 %v2869_v29, %v3200_v36 }
  0x47   : > { %v1308_v37 = vrot.slane %v1203_v13, 2  ;;  %v5172_v46 = vrot.slane %v2928_v62, 2  ;;  %v5173_v22 = vrot.slane %v2950_v24, 1  ;;  %v5174_v52 = vrot.slane %v2956_v28, 2  ;;  %v3242_v24 = vld [vmem:[%s2823_s12 + $0x100] sm:$0x3] }
  0x48   : > { %v520_v55 = vsel %vm495_vm0, %v5171_v32, %v519_v30  ;;  %v1614_v12 = vrot.slane %v1509_v1, 1  ;;  %v1398_v60 = vadd.f32 %v1289_v0, %v1157_v63  ;;  %v1855_v45 = vrot.slane %v1750_v18, 2 }
  0x49   : > { %v617_v43 = vadd.f32 %v520_v55, %v343_v11  ;;  %v762_v54 = vsel %vm737_vm1, %v5172_v46, %v761_v20  ;;  %v1068_v27 = vsel %vm495_vm0, %v5173_v22, %v1067_v47  ;;  %v1309_v23 = vsel %vm737_vm1, %v5174_v52, %v1308_v37 }
  0x4a   : > { %v351_v11 = vmul.f32 %v2810_v5, %v2985_v58  ;;  %v5175_v62 = vrot.slane %v2972_v50, 1  ;;  %v425_v13 = vmul.f32 %v2812_v6, %v303_v57  ;;  %v667_v20 = vmul.f32 %v2814_v7, %v303_v57 }
  0x4b   : > { %v859_v4 = vadd.f32 %v762_v54, %v617_v43  ;;  %v1463_v0 = vadd.f32 %v1431_v16, %v1398_v60  ;;  %v5176_v28 = vrot.slane %v2981_v38, 2  ;;  %v900_v58 = vmul.f32 %v2816_v8, %v3000_v40 }
  0x4c   : > { %v1615_v30 = vsel %vm495_vm0, %v5175_v62, %v1614_v12  ;;  %v974_v50 = vmul.f32 %v2818_v9, %v3231_v61  ;;  %v539_v63 = vrot.slane %v425_v13, 1  ;;  %v781_v32 = vrot.slane %v667_v20, 2  ;;  %v315_v12 = vld [vmem:[%s2823_s12 + $0x130] sm:$0x3]  ;;  %v3270_v62 = vld [vmem:[%s2823_s12 + $0x148] sm:$0x3] }
  0x4d   : > { %v1856_v47 = vsel %vm737_vm1, %v5176_v28, %v1855_v45  ;;  %v924_v1 = vadd.f32 %v892_v48, %v859_v4  ;;  %v1215_v55 = vmul.f32 %v2825_v10, %v3231_v61  ;;  %v1704_v37 = vadd.f32 %v1595_v56, %v1463_v0  ;;  %5180 = vst [vmem:[#allocation17_spill] sm:$0xff] %v3270_v62 }
  0x4e   : > { %v1087_v16 = vrot.slane %v974_v50, 1  ;;  %v1447_v38 = vmul.f32 %v2834_v14, %v3030_v39  ;;  %v1521_v18 = vmul.f32 %v2845_v19, %v3242_v24  ;;  %v5177_v43 = vrot.slane %v3005_v3, 1 }
  0x4f   : > { %v1165_v57 = vadd.f32 %v1068_v27, %v924_v1  ;;  %v5178_v48 = vrot.slane %v3013_v51, 2  ;;  %v1328_v22 = vrot.slane %v1215_v55, 2  ;;  %v1945_v60 = vadd.f32 %v1836_v34, %v1704_v37 }
  0x50   : > { %v540_v46 = vsel %vm495_vm0, %v5177_v43, %v539_v63  ;;  %v5179_v52 = vrot.slane %v3027_v31, 1  ;;  %v1634_v4 = vrot.slane %v1521_v18, 1  ;;  %v5181_v3 = vrot.slane %v3039_v44, 2  ;;  %v3290_v63 = vld [vmem:[%s2823_s12 + $0x160] sm:$0x3] }
  0x51   : > { %v782_v54 = vsel %vm737_vm1, %v5178_v48, %v781_v32  ;;  %v625_v56 = vadd.f32 %v540_v46, %v351_v11  ;;  %v1406_v27 = vadd.f32 %v1309_v23, %v1165_v57  ;;  %v1762_v51 = vmul.f32 %v2869_v29, %v3242_v24  ;;  %2634 = vmatmul.msk.f32.gmra.mxu0 %vm1984_vm2, %v1945_v60  ;;  %v5185_v46 = vld [vmem:[#allocation10_spill] sm:$0xff] }
  0x52   : > { %v1088_v45 = vsel %vm495_vm0, %v5179_v52, %v1087_v16  ;;  %v1329_v13 = vsel %vm737_vm1, %v5181_v3, %v1328_v22  ;;  %v359_v34 = vmul.f32 %v2810_v5, %v3059_v25  ;;  %v5182_v11 = vrot.slane %v3055_v35, 1  ;;  %5183 = vst [vmem:[#allocation18_spill] sm:$0xff] %v3290_v63 }
  0x53   : > { %v867_v31 = vadd.f32 %v782_v54, %v625_v56  ;;  %v437_v0 = vmul.f32 %v2812_v6, %v315_v12  ;;  %v679_v23 = vmul.f32 %v2814_v7, %v315_v12  ;;  %v1471_v44 = vadd.f32 %v1439_v2, %v1406_v27  ;;  %v5188_v56 = vld [vmem:[#allocation13_spill] sm:$0xff] }
  0x54   : > { %v1635_v20 = vsel %vm495_vm0, %v5182_v11, %v1634_v4  ;;  %v1875_v28 = vrot.slane %v1762_v51, 2  ;;  %v908_v50 = vmul.f32 %v2816_v8, %v3086_v49  ;;  %v986_v1 = vmul.f32 %v2818_v9, %v3270_v62  ;;  %v5191_v51 = vld [vmem:[#allocation2_spill] sm:$0xff] }
  0x55   : > { %v932_v25 = vadd.f32 %v900_v58, %v867_v31  ;;  %v559_v32 = vrot.slane %v437_v0, 1  ;;  %v801_v55 = vrot.slane %v679_v23, 2  ;;  %v1227_v35 = vmul.f32 %v2825_v10, %v3270_v62 }
  0x56   : > { %v1712_v37 = vadd.f32 %v1615_v30, %v1471_v44  ;;  %v5184_v16 = vrot.slane %v3068_v42, 2  ;;  %v1107_v18 = vrot.slane %v986_v1, 1  ;;  %v1455_v57 = vmul.f32 %v2834_v14, %v3106_v33  ;;  %v5192_v1 = vld [vmem:[#allocation14_spill] sm:$0xff] }
  0x57   : > { %v1173_v43 = vadd.f32 %v1088_v45, %v932_v25  ;;  %v5186_v48 = vrot.slane %v5185_v46, 1  ;;  %v5187_v54 = vrot.slane %v3091_v17, 2  ;;  %v1348_v12 = vrot.slane %v1227_v35, 2 }
  0x58   : > { %v1876_v2 = vsel %vm737_vm1, %v5184_v16, %v1875_v28  ;;  %v1953_v60 = vadd.f32 %v1856_v47, %v1712_v37  ;;  %v5189_v42 = vrot.slane %v5188_v56, 1  ;;  %v1533_v4 = vmul.f32 %v2845_v19, %v3290_v63  ;;  %v5194_v16 = vld [vmem:[#allocation15_spill] sm:$0xff] }
  0x59   : > { %v560_v58 = vsel %vm495_vm0, %v5186_v48, %v559_v32  ;;  %v802_v22 = vsel %vm737_vm1, %v5187_v54, %v801_v55  ;;  %v1414_v27 = vadd.f32 %v1329_v13, %v1173_v43  ;;  %v5190_v45 = vrot.slane %v3119_v41, 2  ;;  %v5197_v54 = vld [vmem:[#allocation3_spill] sm:$0xff] }
  0x5a   : > { %v633_v30 = vadd.f32 %v560_v58, %v359_v34  ;;  %v1108_v52 = vsel %vm495_vm0, %v5189_v42, %v1107_v18  ;;  %v1774_v17 = vmul.f32 %v2869_v29, %v3290_v63  ;;  %v336_v31 = vmul.f32 %v2810_v5, %v5191_v51  ;;  %2642 = vmatmul.msk.f32.gmra.mxu1 %vm1984_vm2, %v1953_v60  ;;  %v3339_v58 = vld [vmem:[%s2823_s12 + $0x48] sm:$0xff]  ;;  %v3349_v60 = vld [vmem:[%s2823_s12 + $0x50] sm:$0xff] }
  0x5b   : > { %v1349_v3 = vsel %vm737_vm1, %v5190_v45, %v1348_v12  ;;  %v1654_v34 = vrot.slane %v1533_v4, 1  ;;  %v402_v11 = vmul.f32 %v2812_v6, %v5191_v51  ;;  %v3322_v13 = vmul.f32 %v2812_v6, %v2837_v15  ;;  %5196 = vst [vmem:[#allocation10_spill] sm:$0xff] %v3339_v58  ;;  %v5199_v42 = vld [vmem:[#allocation4_spill] sm:$0xff] }
  0x5c   : > { %v875_v47 = vadd.f32 %v802_v22, %v633_v30  ;;  %v1479_v41 = vadd.f32 %v1447_v38, %v1414_v27  ;;  %v1895_v0 = vrot.slane %v1774_v17, 2  ;;  %v644_v23 = vmul.f32 %v2814_v7, %v5191_v51  ;;  %5198 = vst [vmem:[#allocation13_spill] sm:$0xff] %v3349_v60 }
  0x5d   : > { %v3328_v44 = vmul.f32 %v2814_v7, %v2837_v15  ;;  %v5193_v25 = vrot.slane %v5192_v1, 1  ;;  %v501_v55 = vrot.slane %v402_v11, 1  ;;  %v5043_v35 = vrot.slane %v3322_v13, 1 }
  0x5e   : > { %v940_v28 = vadd.f32 %v908_v50, %v875_v47  ;;  %v1720_v37 = vadd.f32 %v1635_v20, %v1479_v41  ;;  %v5195_v38 = vrot.slane %v5194_v16, 2  ;;  %v743_v43 = vrot.slane %v644_v23, 2 }
  0x5f   : > { %v1655_v32 = vsel %vm495_vm0, %v5193_v25, %v1654_v34  ;;  %v5042_v46 = vrot.slane %v3328_v44, 2  ;;  %v503_v50 = vsel %vm495_vm0, %v501_v55, %v5043_v35  ;;  %v885_v22 = vmul.f32 %v2816_v8, %v5197_v54 }
  0x60   : > { %v1896_v18 = vsel %vm737_vm1, %v5195_v38, %v1895_v0  ;;  %v1181_v48 = vadd.f32 %v1108_v52, %v940_v28  ;;  %v951_v20 = vmul.f32 %v2818_v9, %v5197_v54  ;;  %v1961_v12 = vadd.f32 %v1876_v2, %v1720_v37 }
  0x61   : > { %v610_v30 = vadd.f32 %v503_v50, %v336_v31  ;;  %v745_v56 = vsel %vm737_vm1, %v743_v43, %v5042_v46  ;;  %v3356_v52 = vmul.f32 %v2818_v9, %v5199_v42  ;;  %v1192_v45 = vmul.f32 %v2825_v10, %v5197_v54  ;;  %v5200_v43 = vld [vmem:[#allocation5_spill] sm:$0xff] }
  0x62   : > { %v1422_v4 = vadd.f32 %v1349_v3, %v1181_v48  ;;  %v1049_v27 = vrot.slane %v951_v20, 1  ;;  %v3362_v17 = vmul.f32 %v2825_v10, %v5199_v42  ;;  %2650 = vmatmul.msk.f32.gmra.mxu2 %vm1984_vm2, %v1961_v12  ;;  %v1432_v31 = vmul.f32 %v2834_v14, %v3339_v58 }
  0x63   : > { %v852_v2 = vadd.f32 %v745_v56, %v610_v30  ;;  %v5040_v51 = vrot.slane %v3356_v52, 1  ;;  %v1498_v47 = vmul.f32 %v2845_v19, %v3339_v58  ;;  %v1290_v34 = vrot.slane %v1192_v45, 2  ;;  %v5201_v45 = vld [vmem:[#allocation6_spill] sm:$0xff] }
  0x64   : > { %v1487_v3 = vadd.f32 %v1455_v57, %v1422_v4  ;;  %v5038_v11 = vrot.slane %v3362_v17, 2  ;;  %v3373_v41 = vmul.f32 %v2845_v19, %v3349_v60  ;;  %v1739_v1 = vmul.f32 %v2869_v29, %v3339_v58 }
  0x65   : > { %v917_v0 = vadd.f32 %v885_v22, %v852_v2  ;;  %v1051_v23 = vsel %vm495_vm0, %v1049_v27, %v5040_v51  ;;  %v1596_v28 = vrot.slane %v1498_v47, 1  ;;  %v3386_v37 = vmul.f32 %v2869_v29, %v3349_v60  ;;  %v3497_v51 = vld [vmem:[%s2823_s12 + $0x110] sm:$0xff] }
  0x66   : > { %v1728_v25 = vadd.f32 %v1655_v32, %v1487_v3  ;;  %v1292_v57 = vsel %vm737_vm1, %v1290_v34, %v5038_v11  ;;  %v5037_v55 = vrot.slane %v3373_v41, 1  ;;  %v1837_v38 = vrot.slane %v1739_v1, 2  ;;  %v3416_v34 = vld [vmem:[%s2823_s12 + $0xa8] sm:$0xff]  ;;  %v3424_v1 = vld [vmem:[%s2823_s12 + $0xb0] sm:$0xff] }
  0x67   : > { %v1158_v16 = vadd.f32 %v1051_v23, %v917_v0  ;;  %v344_v48 = vmul.f32 %v2810_v5, %v5200_v43  ;;  %v414_v50 = vmul.f32 %v2812_v6, %v5200_v43  ;;  %v5036_v22 = vrot.slane %v3386_v37, 2  ;;  %5202 = vst [vmem:[#allocation2_spill] sm:$0xff] %v3416_v34 }
  0x68   : > { %v1969_v32 = vadd.f32 %v1896_v18, %v1728_v25  ;;  %v1598_v54 = vsel %vm495_vm0, %v1596_v28, %v5037_v55  ;;  %v3398_v20 = vmul.f32 %v2812_v6, %v2919_v59  ;;  %v656_v56 = vmul.f32 %v2814_v7, %v5200_v43 }
  0x69   : > { %v1399_v12 = vadd.f32 %v1292_v57, %v1158_v16  ;;  %v521_v30 = vrot.slane %v414_v50, 1  ;;  %v3404_v4 = vmul.f32 %v2814_v7, %v2919_v59  ;;  %v1839_v18 = vsel %vm737_vm1, %v1837_v38, %v5036_v22 }
  0x6a   : > { %2658 = vmatmul.msk.f32.gmra.mxu3 %vm1984_vm2, %v1969_v32  ;;  %v5032_v27 = vrot.slane %v3398_v20, 1  ;;  %v893_v2 = vmul.f32 %v2816_v8, %v5201_v45  ;;  %v963_v47 = vmul.f32 %v2818_v9, %v5201_v45  ;;  %v763_v0 = vrot.slane %v656_v56, 2 }
  0x6b   : > { %v1464_v3 = vadd.f32 %v1432_v31, %v1399_v12  ;;  %v5035_v23 = vrot.slane %v3404_v4, 2  ;;  %v3421_v28 = vmul.f32 %v2818_v9, %v2944_v21  ;;  %v1204_v16 = vmul.f32 %v2825_v10, %v5201_v45 }
  0x6c   : > { %v523_v25 = vsel %vm495_vm0, %v521_v30, %v5032_v27  ;;  %v1069_v57 = vrot.slane %v963_v47, 1  ;;  %v3433_v31 = vmul.f32 %v2825_v10, %v2944_v21  ;;  %v1440_v30 = vmul.f32 %v2834_v14, %v3416_v34 }
  0x6d   : > { %v1705_v38 = vadd.f32 %v1598_v54, %v1464_v3  ;;  %v618_v43 = vadd.f32 %v523_v25, %v344_v48  ;;  %v765_v50 = vsel %vm737_vm1, %v763_v0, %v5035_v23  ;;  %v5034_v32 = vrot.slane %v3421_v28, 1 }
  0x6e   : > { %v1310_v12 = vrot.slane %v1204_v16, 2  ;;  %v5033_v56 = vrot.slane %v3433_v31, 2  ;;  %v1510_v45 = vmul.f32 %v2845_v19, %v3416_v34  ;;  %v3449_v54 = vmul.f32 %v2845_v19, %v3424_v1 }
  0x6f   : > { %v1946_v47 = vadd.f32 %v1839_v18, %v1705_v38  ;;  %v860_v27 = vadd.f32 %v765_v50, %v618_v43  ;;  %v1071_v48 = vsel %vm495_vm0, %v1069_v57, %v5034_v32  ;;  %v1751_v25 = vmul.f32 %v2869_v29, %v3416_v34  ;;  %v5203_v38 = vld [vmem:[#allocation7_spill] sm:$0xff] }
  0x70   : > { %v1312_v3 = vsel %vm737_vm1, %v1310_v12, %v5033_v56  ;;  %v1616_v0 = vrot.slane %v1510_v45, 1  ;;  %v3458_v18 = vmul.f32 %v2869_v29, %v3424_v1  ;;  %v5039_v16 = vrot.slane %v3449_v54, 1  ;;  %v3477_v32 = vld [vmem:[%s2823_s12 + $0x108] sm:$0xff] }
  0x71   : > { %2635 = vmatmul.msk.f32.gmra.mxu0 %vm1984_vm2, %v1946_v47  ;;  %v925_v57 = vadd.f32 %v893_v2, %v860_v27  ;;  %v352_v43 = vmul.f32 %v2810_v5, %v5203_v38  ;;  %v426_v50 = vmul.f32 %v2812_v6, %v5203_v38  ;;  %v1857_v12 = vrot.slane %v1751_v25, 2  ;;  %5205 = vst [vmem:[#allocation15_spill] sm:$0xff] %v3477_v32 }
  0x72   : > { %v5041_v45 = vrot.slane %v3458_v18, 2  ;;  %v3469_v56 = vmul.f32 %v2812_v6, %v3000_v40  ;;  %v668_v47 = vmul.f32 %v2814_v7, %v5203_v38  ;;  %v1618_v2 = vsel %vm495_vm0, %v1616_v0, %v5039_v16  ;;  %v5206_v38 = vld [vmem:[#allocation8_spill] sm:$0xff] }
  0x73   : > { %v1166_v27 = vadd.f32 %v1071_v48, %v925_v57  ;;  %v541_v23 = vrot.slane %v426_v50, 1  ;;  %v3481_v25 = vmul.f32 %v2814_v7, %v3000_v40  ;;  %v901_v48 = vmul.f32 %v2816_v8, %v5206_v38 }
  0x74   : > { %5204 = vst [vmem:[#allocation14_spill] sm:$0xff] %v3469_v56  ;;  %v1859_v22 = vsel %vm737_vm1, %v1857_v12, %v5041_v45  ;;  %v5048_v55 = vrot.slane %v3469_v56, 1  ;;  %v783_v11 = vrot.slane %v668_v47, 2  ;;  %v975_v50 = vmul.f32 %v2818_v9, %v5206_v38 }
  0x75   : > { %v1407_v57 = vadd.f32 %v1312_v3, %v1166_v27  ;;  %v5056_v0 = vrot.slane %v3481_v25, 2  ;;  %v3494_v16 = vmul.f32 %v2818_v9, %v3030_v39  ;;  %v1216_v47 = vmul.f32 %v2825_v10, %v5206_v38 }
  0x76   : > { %v543_v12 = vsel %vm495_vm0, %v541_v23, %v5048_v55  ;;  %v3506_v3 = vmul.f32 %v2825_v10, %v3030_v39  ;;  %v1448_v27 = vmul.f32 %v2834_v14, %v3477_v32  ;;  %v1089_v34 = vrot.slane %v975_v50, 1 }
  0x77   : > { %v1472_v45 = vadd.f32 %v1440_v30, %v1407_v57  ;;  %v626_v46 = vadd.f32 %v543_v12, %v352_v43  ;;  %v785_v35 = vsel %vm737_vm1, %v783_v11, %v5056_v0  ;;  %v5054_v58 = vrot.slane %v3494_v16, 1  ;;  %v3560_v0 = vld [vmem:[%s2823_s12 + $0x168] sm:$0xff] }
  0x78   : > { %5207 = vst [vmem:[#allocation3_spill] sm:$0xff] %v3506_v3  ;;  %v1330_v23 = vrot.slane %v1216_v47, 2  ;;  %v5055_v55 = vrot.slane %v3506_v3, 2  ;;  %v1522_v38 = vmul.f32 %v2845_v19, %v3477_v32  ;;  %v3519_v56 = vmul.f32 %v2845_v19, %v3497_v51  ;;  %v5210_v47 = vld [vmem:[#allocation9_spill] sm:$0xff] }
  0x79   : > { %v1713_v63 = vadd.f32 %v1618_v2, %v1472_v45  ;;  %v868_v62 = vadd.f32 %v785_v35, %v626_v46  ;;  %v1763_v30 = vmul.f32 %v2869_v29, %v3477_v32  ;;  %v1091_v11 = vsel %vm495_vm0, %v1089_v34, %v5054_v58  ;;  %5213 = vst [vmem:[#allocation7_spill] sm:$0xff] %v3560_v0  ;;  %v3566_v32 = vld [vmem:[%s2823_s12 + $0x170] sm:$0xff] }
  0x7a   : > { %5208 = vst [vmem:[#allocation4_spill] sm:$0xff] %v3519_v56  ;;  %v1332_v43 = vsel %vm737_vm1, %v1330_v23, %v5055_v55  ;;  %v1636_v57 = vrot.slane %v1522_v38, 1  ;;  %v3531_v45 = vmul.f32 %v2869_v29, %v3497_v51  ;;  %v5057_v2 = vrot.slane %v3519_v56, 1 }
  0x7b   : > { %v1954_v35 = vadd.f32 %v1859_v22, %v1713_v63  ;;  %v933_v46 = vadd.f32 %v901_v48, %v868_v62  ;;  %v1877_v50 = vrot.slane %v1763_v30, 2  ;;  %v360_v34 = vmul.f32 %v2810_v5, %v5210_v47 }
  0x7c   : > { %5209 = vst [vmem:[#allocation5_spill] sm:$0xff] %v3531_v45  ;;  %v5060_v12 = vrot.slane %v3531_v45, 2  ;;  %v438_v58 = vmul.f32 %v2812_v6, %v5210_v47  ;;  %v3541_v23 = vmul.f32 %v2812_v6, %v3086_v49  ;;  %v1638_v63 = vsel %vm495_vm0, %v1636_v57, %v5057_v2 }
  0x7d   : > { %2643 = vmatmul.msk.f32.gmra.mxu1 %vm1984_vm2, %v1954_v35  ;;  %v1174_v62 = vadd.f32 %v1091_v11, %v933_v46  ;;  %v680_v22 = vmul.f32 %v2814_v7, %v5210_v47  ;;  %v3551_v48 = vmul.f32 %v2814_v7, %v3086_v49  ;;  %v5212_v35 = vld [vmem:[#allocation12_spill] sm:$0xff] }
  0x7e   : > { %5211 = vst [vmem:[#allocation6_spill] sm:$0xff] %v3541_v23  ;;  %v1879_v38 = vsel %vm737_vm1, %v1877_v50, %v5060_v12  ;;  %v561_v30 = vrot.slane %v438_v58, 1  ;;  %v5063_v55 = vrot.slane %v3541_v23, 1  ;;  %v909_v11 = vmul.f32 %v2816_v8, %v5212_v35 }
  0x7f   : > { %v1415_v46 = vadd.f32 %v1332_v43, %v1174_v62  ;;  %v803_v57 = vrot.slane %v680_v22, 2  ;;  %v5067_v47 = vrot.slane %v3551_v48, 2  ;;  %v987_v2 = vmul.f32 %v2818_v9, %v5212_v35 }
  0x80   : > { %v563_v58 = vsel %vm495_vm0, %v561_v30, %v5063_v55  ;;  %v3573_v50 = vmul.f32 %v2818_v9, %v3106_v33  ;;  %v1228_v43 = vmul.f32 %v2825_v10, %v5212_v35  ;;  %v3579_v62 = vmul.f32 %v2825_v10, %v3106_v33 }
  0x81   : > { %v1480_v22 = vadd.f32 %v1448_v27, %v1415_v46  ;;  %v634_v12 = vadd.f32 %v563_v58, %v360_v34  ;;  %v805_v45 = vsel %vm737_vm1, %v803_v57, %v5067_v47  ;;  %v1109_v23 = vrot.slane %v987_v2, 1 }
  0x82   : > { %v5069_v30 = vrot.slane %v3573_v50, 1  ;;  %v1350_v55 = vrot.slane %v1228_v43, 2  ;;  %v5068_v56 = vrot.slane %v3579_v62, 2  ;;  %v1456_v35 = vmul.f32 %v2834_v14, %v3560_v0 }
  0x83   : > { %v1721_v49 = vadd.f32 %v1638_v63, %v1480_v22  ;;  %v876_v3 = vadd.f32 %v805_v45, %v634_v12  ;;  %v1534_v27 = vmul.f32 %v2845_v19, %v3560_v0  ;;  %v3592_v34 = vmul.f32 %v2845_v19, %v3566_v32 }
  0x84   : > { %v1111_v2 = vsel %vm495_vm0, %v1109_v23, %v5069_v30  ;;  %v1352_v46 = vsel %vm737_vm1, %v1350_v55, %v5068_v56  ;;  %v1775_v57 = vmul.f32 %v2869_v29, %v3560_v0  ;;  %v3604_v45 = vmul.f32 %v2869_v29, %v3566_v32  ;;  %v3609_v23 = vld [vmem:[%s2823_s12 + $0x58] sm:$0x3]  ;;  %v5215_v56 = vld [vmem:[#allocation16_spill] sm:$0xff] }
  0x85   : > { %v1962_v12 = vadd.f32 %v1879_v38, %v1721_v49  ;;  %v941_v63 = vadd.f32 %v909_v11, %v876_v3  ;;  %v1656_v58 = vrot.slane %v1534_v27, 1  ;;  %v5073_v43 = vrot.slane %v3592_v34, 1 }
  0x86   : > { %5214 = vst [vmem:[#allocation8_spill] sm:$0xff] %v3604_v45  ;;  %v1897_v22 = vrot.slane %v1775_v57, 2  ;;  %v5072_v47 = vrot.slane %v3604_v45, 2  ;;  %v337_v55 = vmul.f32 %v2810_v5, %v2837_v15  ;;  %v404_v30 = vmul.f32 %v2812_v6, %v5215_v56 }
  0x87   : > { %2651 = vmatmul.msk.f32.gmra.mxu2 %vm1984_vm2, %v1962_v12  ;;  %v1182_v0 = vadd.f32 %v1111_v2, %v941_v63  ;;  %v1658_v49 = vsel %vm495_vm0, %v1656_v58, %v5073_v43  ;;  %v646_v3 = vmul.f32 %v2814_v7, %v5215_v56  ;;  %v886_v38 = vmul.f32 %v2816_v8, %v5199_v42 }
  0x88   : > { %v1899_v15 = vsel %vm737_vm1, %v1897_v22, %v5072_v47  ;;  %v504_v11 = vrot.slane %v404_v30, 1  ;;  %v953_v27 = vmul.f32 %v2818_v9, %v3153_v26  ;;  %v1194_v2 = vmul.f32 %v2825_v10, %v3153_v26 }
  0x89   : > { %v1423_v57 = vadd.f32 %v1352_v46, %v1182_v0  ;;  %v746_v12 = vrot.slane %v646_v3, 2  ;;  %v1433_v63 = vmul.f32 %v2834_v14, %v3349_v60  ;;  %v1500_v56 = vmul.f32 %v2845_v19, %v3609_v23 }
  0x8a   : > { %v5216_v42 = vrot.slane %v3322_v13, 1  ;;  %v1052_v30 = vrot.slane %v953_v27, 1  ;;  %v1293_v22 = vrot.slane %v1194_v2, 2  ;;  %v1741_v47 = vmul.f32 %v2869_v29, %v3609_v23 }
  0x8b   : > { %v1488_v43 = vadd.f32 %v1456_v35, %v1423_v57  ;;  %v5217_v0 = vrot.slane %v3328_v44, 2  ;;  %v1599_v3 = vrot.slane %v1500_v56, 1  ;;  %v5218_v60 = vrot.slane %v3356_v52, 1  ;;  %v3654_v57 = vld [vmem:[%s2823_s12 + $0xb8] sm:$0x3] }
  0x8c   : > { %v505_v58 = vsel %vm495_vm0, %v5216_v42, %v504_v11  ;;  %v5219_v13 = vrot.slane %v3362_v17, 2  ;;  %v1840_v27 = vrot.slane %v1741_v47, 2  ;;  %v345_v2 = vmul.f32 %v2810_v5, %v2919_v59 }
  0x8d   : > { %v611_v26 = vadd.f32 %v505_v58, %v337_v55  ;;  %v747_v46 = vsel %vm737_vm1, %v5217_v0, %v746_v12  ;;  %v1053_v45 = vsel %vm495_vm0, %v5218_v60, %v1052_v30  ;;  %v1729_v29 = vadd.f32 %v1658_v49, %v1488_v43 }
  0x8e   : > { %v1294_v11 = vsel %vm737_vm1, %v5219_v13, %v1293_v22  ;;  %v5220_v55 = vrot.slane %v3373_v41, 1  ;;  %v416_v52 = vmul.f32 %v2812_v6, %v3186_v53  ;;  %v5221_v60 = vrot.slane %v3386_v37, 2 }
  0x8f   : > { %v853_v35 = vadd.f32 %v747_v46, %v611_v26  ;;  %v658_v47 = vmul.f32 %v2814_v7, %v3186_v53  ;;  %v894_v59 = vmul.f32 %v2816_v8, %v2944_v21  ;;  %v965_v41 = vmul.f32 %v2818_v9, %v3200_v36 }
  0x90   : > { %v1600_v44 = vsel %vm495_vm0, %v5220_v55, %v1599_v3  ;;  %v1841_v17 = vsel %vm737_vm1, %v5221_v60, %v1840_v27  ;;  %v1970_v43 = vadd.f32 %v1899_v15, %v1729_v29  ;;  %v524_v12 = vrot.slane %v416_v52, 1  ;;  %v3699_v60 = vld [vmem:[%s2823_s12 + $0x118] sm:$0x3] }
  0x91   : > { %v918_v49 = vadd.f32 %v886_v38, %v853_v35  ;;  %v1206_v56 = vmul.f32 %v2825_v10, %v3200_v36  ;;  %v766_v42 = vrot.slane %v658_v47, 2  ;;  %v1072_v58 = vrot.slane %v965_v41, 1  ;;  %v3680_v36 = vld [vmem:[%s4978_s1 + $0x8] ss:$0 sm:$0xff] }
  0x92   : > { %v1441_v37 = vmul.f32 %v2834_v14, %v3424_v1  ;;  %v1512_v53 = vmul.f32 %v2845_v19, %v3654_v57  ;;  %2659 = vmatmul.msk.f32.gmra.mxu3 %vm1984_vm2, %v1970_v43  ;;  %v5222_v30 = vrot.slane %v3398_v20, 1  ;;  %v1753_v22 = vmul.f32 %v3680_v36, %v3654_v57 }
  0x93   : > { %v1159_v21 = vadd.f32 %v1053_v45, %v918_v49  ;;  %v1313_v15 = vrot.slane %v1206_v56, 2  ;;  %v5223_v0 = vrot.slane %v3404_v4, 2  ;;  %v5224_v45 = vrot.slane %v3421_v28, 1 }
  0x94   : > { %v525_v38 = vsel %vm495_vm0, %v5222_v30, %v524_v12  ;;  %v1619_v3 = vrot.slane %v1512_v53, 1  ;;  %v5225_v27 = vrot.slane %v3433_v31, 2  ;;  %v1860_v35 = vrot.slane %v1753_v22, 2  ;;  %v5228_v53 = vld [vmem:[#allocation14_spill] sm:$0xff] }
  0x95   : > { %v619_v26 = vadd.f32 %v525_v38, %v345_v2  ;;  %v767_v46 = vsel %vm737_vm1, %v5223_v0, %v766_v42  ;;  %v1073_v20 = vsel %vm495_vm0, %v5224_v45, %v1072_v58  ;;  %v1400_v13 = vadd.f32 %v1294_v11, %v1159_v21 }
  0x96   : > { %v1314_v29 = vsel %vm737_vm1, %v5225_v27, %v1313_v15  ;;  %v353_v55 = vmul.f32 %v2810_v5, %v3000_v40  ;;  %v5226_v2 = vrot.slane %v3449_v54, 1  ;;  %v428_v28 = vmul.f32 %v2812_v6, %v3231_v61  ;;  %v5235_v27 = vld [vmem:[#allocation4_spill] sm:$0xff] }
  0x97   : > { %v861_v52 = vadd.f32 %v767_v46, %v619_v26  ;;  %v670_v11 = vmul.f32 %v2814_v7, %v3231_v61  ;;  %v1465_v31 = vadd.f32 %v1433_v63, %v1400_v13  ;;  %v5227_v47 = vrot.slane %v3458_v18, 2  ;;  %v5232_v46 = vld [vmem:[#allocation3_spill] sm:$0xff] }
  0x98   : > { %v1620_v4 = vsel %vm495_vm0, %v5226_v2, %v1619_v3  ;;  %v902_v40 = vmul.f32 %v2816_v8, %v3030_v39  ;;  %v977_v54 = vmul.f32 %v2818_v9, %v3242_v24  ;;  %v544_v49 = vrot.slane %v428_v28, 1 }
  0x99   : > { %v1861_v41 = vsel %vm737_vm1, %v5227_v47, %v1860_v35  ;;  %v926_v43 = vadd.f32 %v894_v59, %v861_v52  ;;  %v786_v12 = vrot.slane %v670_v11, 2  ;;  %v1218_v56 = vmul.f32 %v2825_v10, %v3242_v24 }
  0x9a   : > { %v1706_v42 = vadd.f32 %v1600_v44, %v1465_v31  ;;  %v1092_v58 = vrot.slane %v977_v54, 1  ;;  %v1449_v61 = vmul.f32 %v2834_v14, %v3497_v51  ;;  %v1524_v18 = vmul.f32 %v2845_v19, %v3699_v60  ;;  %v5238_v31 = vld [vmem:[#allocation18_spill] sm:$0xff] }
  0x9b   : > { %v1167_v63 = vadd.f32 %v1073_v20, %v926_v43  ;;  %v5229_v39 = vrot.slane %v5228_v53, 1  ;;  %v5230_v59 = vrot.slane %v3481_v25, 2  ;;  %v1333_v38 = vrot.slane %v1218_v56, 2  ;;  %v5234_v25 = vld [vmem:[#allocation11_spill] sm:$0xff]  ;;  %v3747_v43 = vld [vmem:[%s2823_s12 + $0x178] sm:$0x3] }
  0x9c   : > { %v1947_v15 = vadd.f32 %v1841_v17, %v1706_v42  ;;  %v5231_v44 = vrot.slane %v3494_v16, 1  ;;  %v1639_v26 = vrot.slane %v1524_v18, 1  ;;  %v5233_v45 = vrot.slane %v5232_v46, 2  ;;  %5239 = vst [vmem:[#allocation9_spill] sm:$0xff] %v3747_v43 }
  0x9d   : > { %v545_v21 = vsel %vm495_vm0, %v5229_v39, %v544_v49  ;;  %v787_v30 = vsel %vm737_vm1, %v5230_v59, %v786_v12  ;;  %v1408_v0 = vadd.f32 %v1314_v29, %v1167_v63  ;;  %v1765_v3 = vmul.f32 %v3680_v36, %v3699_v60  ;;  %v5242_v39 = vld [vmem:[#allocation6_spill] sm:$0xff] }
  0x9e   : > { %v627_v24 = vadd.f32 %v545_v21, %v353_v55  ;;  %v1093_v22 = vsel %vm495_vm0, %v5231_v44, %v1092_v58  ;;  %v1334_v20 = vsel %vm737_vm1, %v5233_v45, %v1333_v38  ;;  %v361_v13 = vmul.f32 %v2810_v5, %v5234_v25  ;;  %2636 = vmatmul.msk.f32.gmra.mxu0 %vm1984_vm2, %v1947_v15  ;;  %v5237_v55 = vld [vmem:[#allocation17_spill] sm:$0xff]  ;;  %v2697_v45 = vld [vmem:[%s2823_s12 + $0x30] sm:$0xff] }
  0x9f   : > { %v5236_v16 = vrot.slane %v5235_v27, 1  ;;  %v440_v29 = vmul.f32 %v2812_v6, %v5237_v55  ;;  %v682_v52 = vmul.f32 %v2814_v7, %v5237_v55  ;;  %v1473_v2 = vadd.f32 %v1441_v37, %v1408_v0  ;;  %v5240_v58 = vld [vmem:[#allocation5_spill] sm:$0xff] }
  0xa0   : > { %v869_v17 = vadd.f32 %v787_v30, %v627_v24  ;;  %v1880_v28 = vrot.slane %v1765_v3, 2  ;;  %v910_v11 = vmul.f32 %v2816_v8, %v3106_v33  ;;  %v989_v47 = vmul.f32 %v2818_v9, %v5238_v31 }
  0xa1   : > { %v1640_v35 = vsel %vm495_vm0, %v5236_v16, %v1639_v26  ;;  %v564_v49 = vrot.slane %v440_v29, 1  ;;  %v806_v12 = vrot.slane %v682_v52, 2  ;;  %v1230_v56 = vmul.f32 %v2825_v10, %v5238_v31 }
  0xa2   : > { %v934_v54 = vadd.f32 %v902_v40, %v869_v17  ;;  %v1714_v42 = vadd.f32 %v1620_v4, %v1473_v2  ;;  %v5241_v18 = vrot.slane %v5240_v58, 2  ;;  %v1112_v63 = vrot.slane %v989_v47, 1  ;;  %v5248_v47 = vld [vmem:[#allocation8_spill] sm:$0xff] }
  0xa3   : > { %v1457_v33 = vmul.f32 %v2834_v14, %v3566_v32  ;;  %v5243_v40 = vrot.slane %v5242_v39, 1  ;;  %v5244_v59 = vrot.slane %v3551_v48, 2  ;;  %v1353_v38 = vrot.slane %v1230_v56, 2 }
  0xa4   : > { %v1881_v37 = vsel %vm737_vm1, %v5241_v18, %v1880_v28  ;;  %v1175_v53 = vadd.f32 %v1093_v22, %v934_v54  ;;  %v1955_v4 = vadd.f32 %v1861_v41, %v1714_v42  ;;  %v5245_v24 = vrot.slane %v3573_v50, 1 }
  0xa5   : > { %v565_v21 = vsel %vm495_vm0, %v5243_v40, %v564_v49  ;;  %v807_v30 = vsel %vm737_vm1, %v5244_v59, %v806_v12  ;;  %v1536_v26 = vmul.f32 %v2845_v19, %v3747_v43  ;;  %v5246_v0 = vrot.slane %v3579_v62, 2 }
  0xa6   : > { %v635_v15 = vadd.f32 %v565_v21, %v361_v13  ;;  %v1113_v44 = vsel %vm495_vm0, %v5245_v24, %v1112_v63  ;;  %v1416_v22 = vadd.f32 %v1334_v20, %v1175_v53  ;;  %v1777_v48 = vmul.f32 %v3680_v36, %v3747_v43  ;;  %2644 = vmatmul.msk.f32.gmra.mxu1 %vm1984_vm2, %v1955_v4  ;;  %v3777_v13 = vld [vmem:[%s2823_s12 + $0x38] sm:$0xff]  ;;  %v3819_v4 = vld [vmem:[%s2823_s12 + $0x60] sm:$0xff] }
  0xa7   : > { %v1354_v46 = vsel %vm737_vm1, %v5246_v0, %v1353_v38  ;;  %v338_v3 = vmul.f32 %v2697_v45, %v2810_v5  ;;  %v1659_v50 = vrot.slane %v1536_v26, 1  ;;  %v405_v25 = vmul.f32 %v2697_v45, %v2812_v6  ;;  %v5251_v53 = vld [vmem:[#allocation13_spill] sm:$0xff]  ;;  %5252 = vst [vmem:[#allocation12_spill] sm:$0xff] %v3819_v4  ;;  %v3827_v0 = vld [vmem:[%s2823_s12 + $0x68] sm:$0xff] }
  0xa8   : > { %v877_v41 = vadd.f32 %v807_v30, %v635_v15  ;;  %v3781_v20 = vmul.f32 %v3777_v13, %v2812_v6  ;;  %v1481_v62 = vadd.f32 %v1449_v61, %v1416_v22  ;;  %v1900_v17 = vrot.slane %v1777_v48, 2  ;;  %5253 = vst [vmem:[#allocation16_spill] sm:$0xff] %v3827_v0 }
  0xa9   : > { %v647_v27 = vmul.f32 %v2697_v45, %v2814_v7  ;;  %v3786_v16 = vmul.f32 %v3777_v13, %v2814_v7  ;;  %v5247_v29 = vrot.slane %v3592_v34, 1  ;;  %v506_v2 = vrot.slane %v405_v25, 1  ;;  %v5250_v34 = vld [vmem:[#allocation10_spill] sm:$0xff] }
  0xaa   : > { %v942_v55 = vadd.f32 %v910_v11, %v877_v41  ;;  %v5089_v28 = vrot.slane %v3781_v20, 1  ;;  %v1722_v31 = vadd.f32 %v1640_v35, %v1481_v62  ;;  %v5249_v54 = vrot.slane %v5248_v47, 2 }
  0xab   : > { %v1660_v52 = vsel %vm495_vm0, %v5247_v29, %v1659_v50  ;;  %v748_v49 = vrot.slane %v647_v27, 2  ;;  %v5088_v12 = vrot.slane %v3786_v16, 2  ;;  %v887_v42 = vmul.f32 %v2816_v8, %v5250_v34 }
  0xac   : > { %v1901_v61 = vsel %vm737_vm1, %v5249_v54, %v1900_v17  ;;  %v1183_v56 = vadd.f32 %v1113_v44, %v942_v55  ;;  %v508_v11 = vsel %vm495_vm0, %v506_v2, %v5089_v28  ;;  %v954_v58 = vmul.f32 %v2818_v9, %v5250_v34  ;;  %v2701_v55 = vld [vmem:[%s2823_s12 + $0x90] sm:$0xff]  ;;  %v3854_v54 = vld [vmem:[%s2823_s12 + $0x98] sm:$0xff]  ;;  %v3975_v28 = vld [vmem:[%s2823_s12 + $0x128] sm:$0xff] }
  0xad   : > { %v1963_v35 = vadd.f32 %v1881_v37, %v1722_v31  ;;  %v612_v18 = vadd.f32 %v508_v11, %v338_v3  ;;  %v750_v63 = vsel %vm737_vm1, %v748_v49, %v5088_v12  ;;  %v3808_v39 = vmul.f32 %v2818_v9, %v5251_v53 }
  0xae   : > { %v1424_v40 = vadd.f32 %v1354_v46, %v1183_v56  ;;  %v1054_v21 = vrot.slane %v954_v58, 1  ;;  %v1195_v59 = vmul.f32 %v2825_v10, %v5250_v34  ;;  %v3814_v30 = vmul.f32 %v2825_v10, %v5251_v53 }
  0xaf   : > { %2652 = vmatmul.msk.f32.gmra.mxu2 %vm1984_vm2, %v1963_v35  ;;  %v854_v37 = vadd.f32 %v750_v63, %v612_v18  ;;  %v5087_v38 = vrot.slane %v3808_v39, 1  ;;  %v1434_v15 = vmul.f32 %v3819_v4, %v2834_v14  ;;  %v1501_v24 = vmul.f32 %v3819_v4, %v2845_v19  ;;  %v5254_v35 = vld [vmem:[#allocation2_spill] sm:$0xff] }
  0xb0   : > { %v1489_v44 = vadd.f32 %v1457_v33, %v1424_v40  ;;  %v1295_v26 = vrot.slane %v1195_v59, 2  ;;  %v5086_v22 = vrot.slane %v3814_v30, 2  ;;  %v3831_v46 = vmul.f32 %v3827_v0, %v2845_v19 }
  0xb1   : > { %v919_v48 = vadd.f32 %v887_v42, %v854_v37  ;;  %v1056_v45 = vsel %vm495_vm0, %v1054_v21, %v5087_v38  ;;  %v1601_v3 = vrot.slane %v1501_v24, 1  ;;  %v1742_v41 = vmul.f32 %v3819_v4, %v3680_v36  ;;  %v4027_v4 = vld [vmem:[%s2823_s12 + $0x188] sm:$0xff] }
  0xb2   : > { %v1730_v33 = vadd.f32 %v1660_v52, %v1489_v44  ;;  %v1297_v50 = vsel %vm737_vm1, %v1295_v26, %v5086_v22  ;;  %v5084_v25 = vrot.slane %v3831_v46, 1  ;;  %v3844_v62 = vmul.f32 %v3827_v0, %v3680_v36  ;;  %5264 = vst [vmem:[#allocation6_spill] sm:$0xff] %v4027_v4 }
  0xb3   : > { %v1160_v17 = vadd.f32 %v1056_v45, %v919_v48  ;;  %v1842_v27 = vrot.slane %v1742_v41, 2  ;;  %v346_v29 = vmul.f32 %v2701_v55, %v2810_v5  ;;  %v417_v2 = vmul.f32 %v2701_v55, %v2812_v6 }
  0xb4   : > { %v1971_v31 = vadd.f32 %v1901_v61, %v1730_v33  ;;  %v1603_v52 = vsel %vm495_vm0, %v1601_v3, %v5084_v25  ;;  %v5083_v47 = vrot.slane %v3844_v62, 2  ;;  %v3858_v49 = vmul.f32 %v3854_v54, %v2812_v6 }
  0xb5   : > { %v1401_v56 = vadd.f32 %v1297_v50, %v1160_v17  ;;  %v526_v11 = vrot.slane %v417_v2, 1  ;;  %v659_v34 = vmul.f32 %v2701_v55, %v2814_v7  ;;  %v3863_v42 = vmul.f32 %v3854_v54, %v2814_v7  ;;  %v3894_v17 = vld [vmem:[%s2823_s12 + $0xc0] sm:$0xff] }
  0xb6   : > { %2660 = vmatmul.msk.f32.gmra.mxu3 %vm1984_vm2, %v1971_v31  ;;  %v1844_v61 = vsel %vm737_vm1, %v1842_v27, %v5083_v47  ;;  %v5082_v58 = vrot.slane %v3858_v49, 1  ;;  %v895_v18 = vmul.f32 %v2816_v8, %v5254_v35  ;;  %v966_v63 = vmul.f32 %v2818_v9, %v5254_v35  ;;  %5255 = vst [vmem:[#allocation14_spill] sm:$0xff] %v3894_v17 }
  0xb7   : > { %v1466_v40 = vadd.f32 %v1434_v15, %v1401_v56  ;;  %v768_v21 = vrot.slane %v659_v34, 2  ;;  %v5079_v59 = vrot.slane %v3863_v42, 2  ;;  %v3877_v37 = vmul.f32 %v2818_v9, %v3424_v1 }
  0xb8   : > { %v528_v24 = vsel %vm495_vm0, %v526_v11, %v5082_v58  ;;  %v1074_v44 = vrot.slane %v966_v63, 1  ;;  %v1207_v26 = vmul.f32 %v2825_v10, %v5254_v35  ;;  %v3886_v48 = vmul.f32 %v2825_v10, %v3424_v1 }
  0xb9   : > { %v1707_v15 = vadd.f32 %v1603_v52, %v1466_v40  ;;  %v620_v45 = vadd.f32 %v528_v24, %v346_v29  ;;  %v770_v3 = vsel %vm737_vm1, %v768_v21, %v5079_v59  ;;  %v5078_v41 = vrot.slane %v3877_v37, 1  ;;  %v3904_v52 = vld [vmem:[%s2823_s12 + $0xc8] sm:$0xff]  ;;  %v2705_v21 = vld [vmem:[%s2823_s12 + $0xf0] sm:$0xff] }
  0xba   : > { %v1315_v33 = vrot.slane %v1207_v26, 2  ;;  %v5077_v50 = vrot.slane %v3886_v48, 2  ;;  %v1442_v27 = vmul.f32 %v3894_v17, %v2834_v14  ;;  %v1513_v55 = vmul.f32 %v3894_v17, %v2845_v19  ;;  %v5256_v59 = vld [vmem:[#allocation15_spill] sm:$0xff] }
  0xbb   : > { %v1948_v2 = vadd.f32 %v1844_v61, %v1707_v15  ;;  %v862_v29 = vadd.f32 %v770_v3, %v620_v45  ;;  %v1076_v31 = vsel %vm495_vm0, %v1074_v44, %v5078_v41  ;;  %v3908_v56 = vmul.f32 %v3904_v52, %v2845_v19  ;;  %v3926_v45 = vld [vmem:[%s2823_s12 + $0xf8] sm:$0xff] }
  0xbc   : > { %v1317_v11 = vsel %vm737_vm1, %v1315_v33, %v5077_v50  ;;  %v1621_v34 = vrot.slane %v1513_v55, 1  ;;  %v1754_v61 = vmul.f32 %v3894_v17, %v3680_v36  ;;  %v3917_v35 = vmul.f32 %v3904_v52, %v3680_v36  ;;  %v5262_v17 = vld [vmem:[#allocation7_spill] sm:$0xff] }
  0xbd   : > { %2637 = vmatmul.msk.f32.gmra.mxu0 %vm1984_vm2, %v1948_v2  ;;  %v927_v63 = vadd.f32 %v895_v18, %v862_v29  ;;  %v5081_v40 = vrot.slane %v3908_v56, 1  ;;  %v354_v24 = vmul.f32 %v2705_v21, %v2810_v5  ;;  %v429_v44 = vmul.f32 %v2705_v21, %v2812_v6 }
  0xbe   : > { %v1862_v26 = vrot.slane %v1754_v61, 2  ;;  %v5080_v15 = vrot.slane %v3917_v35, 2  ;;  %v3930_v3 = vmul.f32 %v3926_v45, %v2812_v6  ;;  %v671_v33 = vmul.f32 %v2705_v21, %v2814_v7 }
  0xbf   : > { %v1168_v18 = vadd.f32 %v1076_v31, %v927_v63  ;;  %v1623_v55 = vsel %vm495_vm0, %v1621_v34, %v5081_v40  ;;  %v546_v2 = vrot.slane %v429_v44, 1  ;;  %v3938_v29 = vmul.f32 %v3926_v45, %v2814_v7 }
  0xc0   : > { %v1864_v61 = vsel %vm737_vm1, %v1862_v26, %v5080_v15  ;;  %v5085_v50 = vrot.slane %v3930_v3, 1  ;;  %v788_v41 = vrot.slane %v671_v33, 2  ;;  %v903_v21 = vmul.f32 %v2816_v8, %v5256_v59 }
  0xc1   : > { %v1409_v31 = vadd.f32 %v1317_v11, %v1168_v18  ;;  %v5090_v63 = vrot.slane %v3938_v29, 2  ;;  %v978_v34 = vmul.f32 %v2818_v9, %v5256_v59  ;;  %v3951_v44 = vmul.f32 %v2818_v9, %v3497_v51  ;;  %v3963_v18 = vld [vmem:[%s2823_s12 + $0x120] sm:$0xff] }
  0xc2   : > { %v548_v26 = vsel %vm495_vm0, %v546_v2, %v5085_v50  ;;  %v1219_v33 = vmul.f32 %v2825_v10, %v5256_v59  ;;  %v3960_v11 = vmul.f32 %v2825_v10, %v3497_v51  ;;  %5257 = vst [vmem:[#allocation3_spill] sm:$0xff] %v3963_v18  ;;  %v1450_v15 = vmul.f32 %v3963_v18, %v2834_v14 }
  0xc3   : > { %v1474_v40 = vadd.f32 %v1442_v27, %v1409_v31  ;;  %v628_v58 = vadd.f32 %v548_v26, %v354_v24  ;;  %v790_v47 = vsel %vm737_vm1, %v788_v41, %v5090_v63  ;;  %v1094_v25 = vrot.slane %v978_v34, 1  ;;  %v2709_v63 = vld [vmem:[%s2823_s12 + $0x150] sm:$0xff] }
  0xc4   : > { %v5091_v2 = vrot.slane %v3951_v44, 1  ;;  %v1335_v50 = vrot.slane %v1219_v33, 2  ;;  %v5094_v59 = vrot.slane %v3960_v11, 2  ;;  %v1525_v22 = vmul.f32 %v3963_v18, %v2845_v19 }
  0xc5   : > { %v1715_v38 = vadd.f32 %v1623_v55, %v1474_v40  ;;  %v870_v12 = vadd.f32 %v790_v47, %v628_v58  ;;  %v3979_v27 = vmul.f32 %v3975_v28, %v2845_v19  ;;  %v1766_v41 = vmul.f32 %v3963_v18, %v3680_v36  ;;  %v3999_v18 = vld [vmem:[%s2823_s12 + $0x158] sm:$0xff] }
  0xc6   : > { %v1096_v24 = vsel %vm495_vm0, %v1094_v25, %v5091_v2  ;;  %v1337_v31 = vsel %vm737_vm1, %v1335_v50, %v5094_v59  ;;  %v1641_v40 = vrot.slane %v1525_v22, 1  ;;  %v3991_v47 = vmul.f32 %v3975_v28, %v3680_v36  ;;  %5260 = vst [vmem:[#allocation17_spill] sm:$0xff] %v3999_v18 }
  0xc7   : > { %5258 = vst [vmem:[#allocation11_spill] sm:$0xff] %v3979_v27  ;;  %v1956_v58 = vadd.f32 %v1864_v61, %v1715_v38  ;;  %v935_v55 = vadd.f32 %v903_v21, %v870_v12  ;;  %v5097_v34 = vrot.slane %v3979_v27, 1  ;;  %v1882_v26 = vrot.slane %v1766_v41, 2 }
  0xc8   : > { %5259 = vst [vmem:[#allocation4_spill] sm:$0xff] %v3991_v47  ;;  %v5100_v33 = vrot.slane %v3991_v47, 2  ;;  %v362_v25 = vmul.f32 %v2709_v63, %v2810_v5  ;;  %v441_v2 = vmul.f32 %v2709_v63, %v2812_v6  ;;  %v4003_v22 = vmul.f32 %v3999_v18, %v2812_v6 }
  0xc9   : > { %2645 = vmatmul.msk.f32.gmra.mxu1 %vm1984_vm2, %v1956_v58  ;;  %v1176_v12 = vadd.f32 %v1096_v24, %v935_v55  ;;  %v1643_v38 = vsel %vm495_vm0, %v1641_v40, %v5097_v34  ;;  %v683_v50 = vmul.f32 %v2709_v63, %v2814_v7  ;;  %v4012_v61 = vmul.f32 %v3999_v18, %v2814_v7  ;;  %v4021_v55 = vld [vmem:[%s2823_s12 + $0x180] sm:$0xff] }
  0xca   : > { %5261 = vst [vmem:[#allocation18_spill] sm:$0xff] %v4003_v22  ;;  %v1884_v21 = vsel %vm737_vm1, %v1882_v26, %v5100_v33  ;;  %v566_v41 = vrot.slane %v441_v2, 1  ;;  %v5103_v59 = vrot.slane %v4003_v22, 1  ;;  %v911_v24 = vmul.f32 %v2816_v8, %v5262_v17 }
  0xcb   : > { %v1417_v58 = vadd.f32 %v1337_v31, %v1176_v12  ;;  %5263 = vst [vmem:[#allocation5_spill] sm:$0xff] %v4021_v55  ;;  %v808_v40 = vrot.slane %v683_v50, 2  ;;  %v5108_v63 = vrot.slane %v4012_v61, 2  ;;  %v990_v34 = vmul.f32 %v2818_v9, %v5262_v17 }
  0xcc   : > { %v568_v2 = vsel %vm495_vm0, %v566_v41, %v5103_v59  ;;  %v4034_v26 = vmul.f32 %v2818_v9, %v3566_v32  ;;  %v1231_v31 = vmul.f32 %v2825_v10, %v5262_v17  ;;  %v4040_v12 = vmul.f32 %v2825_v10, %v3566_v32 }
  0xcd   : > { %v1482_v50 = vadd.f32 %v1450_v15, %v1417_v58  ;;  %v636_v33 = vadd.f32 %v568_v2, %v362_v25  ;;  %v810_v47 = vsel %vm737_vm1, %v808_v40, %v5108_v63  ;;  %v1114_v22 = vrot.slane %v990_v34, 1 }
  0xce   : > { %v5110_v41 = vrot.slane %v4034_v26, 1  ;;  %v1355_v59 = vrot.slane %v1231_v31, 2  ;;  %v5109_v43 = vrot.slane %v4040_v12, 2  ;;  %v1458_v27 = vmul.f32 %v2834_v14, %v4021_v55 }
  0xcf   : > { %v1723_v17 = vadd.f32 %v1643_v38, %v1482_v50  ;;  %v878_v18 = vadd.f32 %v810_v47, %v636_v33  ;;  %v1537_v15 = vmul.f32 %v2845_v19, %v4021_v55  ;;  %v4053_v25 = vmul.f32 %v2845_v19, %v4027_v4 }
  0xd0   : > { %v1116_v34 = vsel %vm495_vm0, %v1114_v22, %v5110_v41  ;;  %v1357_v58 = vsel %vm737_vm1, %v1355_v59, %v5109_v43  ;;  %v1778_v40 = vmul.f32 %v3680_v36, %v4021_v55  ;;  %v4065_v47 = vmul.f32 %v3680_v36, %v4027_v4  ;;  %v2711_v59 = vld [vmem:[%s2823_s12 + $0x40] sm:$0x3] }
  0xd1   : > { %v1964_v33 = vadd.f32 %v1884_v21, %v1723_v17  ;;  %v943_v38 = vadd.f32 %v911_v24, %v878_v18  ;;  %v1661_v2 = vrot.slane %v1537_v15, 1  ;;  %v5112_v31 = vrot.slane %v4053_v25, 1 }
  0xd2   : > { %5265 = vst [vmem:[#allocation8_spill] sm:$0xff] %v4065_v47  ;;  %v1902_v50 = vrot.slane %v1778_v40, 2  ;;  %v5111_v63 = vrot.slane %v4065_v47, 2  ;;  %v339_v22 = vmul.f32 %v3777_v13, %v2810_v5  ;;  %v407_v43 = vmul.f32 %v2711_v59, %v2812_v6 }
  0xd3   : > { %2653 = vmatmul.msk.f32.gmra.mxu2 %vm1984_vm2, %v1964_v33  ;;  %v1184_v41 = vadd.f32 %v1116_v34, %v943_v38  ;;  %v1663_v18 = vsel %vm495_vm0, %v1661_v2, %v5112_v31  ;;  %v649_v21 = vmul.f32 %v2711_v59, %v2814_v7  ;;  %v888_v24 = vmul.f32 %v2816_v8, %v5251_v53  ;;  %v4090_v2 = vld [vmem:[%s2823_s12 + $0x70] sm:$0x3] }
  0xd4   : > { %v1904_v17 = vsel %vm737_vm1, %v1902_v50, %v5111_v63  ;;  %v509_v13 = vrot.slane %v407_v43, 1  ;;  %v956_v15 = vmul.f32 %v2818_v9, %v3609_v23  ;;  %v1197_v34 = vmul.f32 %v2825_v10, %v3609_v23 }
  0xd5   : > { %v1425_v40 = vadd.f32 %v1357_v58, %v1184_v41  ;;  %v751_v33 = vrot.slane %v649_v21, 2  ;;  %v1435_v38 = vmul.f32 %v3827_v0, %v2834_v14  ;;  %v1503_v53 = vmul.f32 %v4090_v2, %v2845_v19 }
  0xd6   : > { %v5266_v59 = vrot.slane %v3781_v20, 1  ;;  %v1057_v50 = vrot.slane %v956_v15, 1  ;;  %v1298_v63 = vrot.slane %v1197_v34, 2  ;;  %v1744_v23 = vmul.f32 %v4090_v2, %v3680_v36 }
  0xd7   : > { %v1490_v41 = vadd.f32 %v1458_v27, %v1425_v40  ;;  %v5267_v21 = vrot.slane %v3786_v16, 2  ;;  %v1604_v55 = vrot.slane %v1503_v53, 1  ;;  %v5268_v0 = vrot.slane %v3808_v39, 1  ;;  %v2713_v40 = vld [vmem:[%s2823_s12 + $0xa0] sm:$0x3] }
  0xd8   : > { %v510_v43 = vsel %vm495_vm0, %v5266_v59, %v509_v13  ;;  %v5269_v20 = vrot.slane %v3814_v30, 2  ;;  %v1845_v15 = vrot.slane %v1744_v23, 2  ;;  %v347_v34 = vmul.f32 %v3854_v54, %v2810_v5 }
  0xd9   : > { %v613_v58 = vadd.f32 %v510_v43, %v339_v22  ;;  %v752_v31 = vsel %vm737_vm1, %v5267_v21, %v751_v33  ;;  %v1058_v47 = vsel %vm495_vm0, %v5268_v0, %v1057_v50  ;;  %v1731_v59 = vadd.f32 %v1663_v18, %v1490_v41  ;;  %v4128_v50 = vld [vmem:[%s2823_s12 + $0xd0] sm:$0x3] }
  0xda   : > { %v1299_v13 = vsel %vm737_vm1, %v5269_v20, %v1298_v63  ;;  %v5270_v16 = vrot.slane %v3831_v46, 1  ;;  %v419_v39 = vmul.f32 %v2713_v40, %v2812_v6  ;;  %v5271_v0 = vrot.slane %v3844_v62, 2 }
  0xdb   : > { %v855_v27 = vadd.f32 %v752_v31, %v613_v58  ;;  %v661_v63 = vmul.f32 %v2713_v40, %v2814_v7  ;;  %v896_v33 = vmul.f32 %v2816_v8, %v3424_v1  ;;  %v968_v54 = vmul.f32 %v2818_v9, %v3654_v57 }
  0xdc   : > { %v1605_v22 = vsel %vm495_vm0, %v5270_v16, %v1604_v55  ;;  %v1846_v30 = vsel %vm737_vm1, %v5271_v0, %v1845_v15  ;;  %v1972_v31 = vadd.f32 %v1904_v17, %v1731_v59  ;;  %v529_v46 = vrot.slane %v419_v39, 1 }
  0xdd   : > { %v920_v18 = vadd.f32 %v888_v24, %v855_v27  ;;  %v1209_v55 = vmul.f32 %v2825_v10, %v3654_v57  ;;  %v771_v53 = vrot.slane %v661_v63, 2  ;;  %v1077_v43 = vrot.slane %v968_v54, 1  ;;  %v2715_v63 = vld [vmem:[%s2823_s12 + $0x100] sm:$0x3] }
  0xde   : > { %v1443_v62 = vmul.f32 %v3904_v52, %v2834_v14  ;;  %v1515_v23 = vmul.f32 %v4128_v50, %v2845_v19  ;;  %2661 = vmatmul.msk.f32.gmra.mxu3 %vm1984_vm2, %v1972_v31  ;;  %v5272_v24 = vrot.slane %v3858_v49, 1  ;;  %v1756_v57 = vmul.f32 %v4128_v50, %v3680_v36 }
  0xdf   : > { %v1161_v1 = vadd.f32 %v1058_v47, %v920_v18  ;;  %v1318_v41 = vrot.slane %v1209_v55, 2  ;;  %v5273_v21 = vrot.slane %v3863_v42, 2  ;;  %v5274_v15 = vrot.slane %v3877_v37, 1 }
  0xe0   : > { %v530_v17 = vsel %vm495_vm0, %v5272_v24, %v529_v46  ;;  %v1624_v27 = vrot.slane %v1515_v23, 1  ;;  %v5275_v47 = vrot.slane %v3886_v48, 2  ;;  %v1865_v40 = vrot.slane %v1756_v57, 2 }
  0xe1   : > { %v621_v58 = vadd.f32 %v530_v17, %v347_v34  ;;  %v772_v20 = vsel %vm737_vm1, %v5273_v21, %v771_v53  ;;  %v1078_v59 = vsel %vm495_vm0, %v5274_v15, %v1077_v43  ;;  %v1402_v16 = vadd.f32 %v1299_v13, %v1161_v1 }
  0xe2   : > { %v1319_v49 = vsel %vm737_vm1, %v5275_v47, %v1318_v41  ;;  %v355_v39 = vmul.f32 %v3926_v45, %v2810_v5  ;;  %v5276_v34 = vrot.slane %v3908_v56, 1  ;;  %v431_v37 = vmul.f32 %v2715_v63, %v2812_v6  ;;  %v5283_v47 = vld [vmem:[#allocation11_spill] sm:$0xff] }
  0xe3   : > { %v863_v0 = vadd.f32 %v772_v20, %v621_v58  ;;  %v673_v54 = vmul.f32 %v2715_v63, %v2814_v7  ;;  %v1467_v13 = vadd.f32 %v1435_v38, %v1402_v16  ;;  %v5277_v48 = vrot.slane %v3917_v35, 2  ;;  %v4167_v35 = vld [vmem:[%s2823_s12 + $0x130] sm:$0x3] }
  0xe4   : > { %v1625_v42 = vsel %vm495_vm0, %v5276_v34, %v1624_v27  ;;  %v904_v18 = vmul.f32 %v2816_v8, %v3497_v51  ;;  %v980_v45 = vmul.f32 %v2818_v9, %v3699_v60  ;;  %v549_v46 = vrot.slane %v431_v37, 1  ;;  %v5285_v37 = vld [vmem:[#allocation9_spill] sm:$0xff] }
  0xe5   : > { %v1866_v31 = vsel %vm737_vm1, %v5277_v48, %v1865_v40  ;;  %v928_v56 = vadd.f32 %v896_v33, %v863_v0  ;;  %v791_v55 = vrot.slane %v673_v54, 2  ;;  %v1221_v53 = vmul.f32 %v2825_v10, %v3699_v60  ;;  %v4199_v48 = vld [vmem:[%s2823_s12 + $0x190] sm:$0x3] }
  0xe6   : > { %v1708_v43 = vadd.f32 %v1605_v22, %v1467_v13  ;;  %v1097_v23 = vrot.slane %v980_v45, 1  ;;  %v1451_v38 = vmul.f32 %v3975_v28, %v2834_v14  ;;  %v1527_v1 = vmul.f32 %v4167_v35, %v2845_v19  ;;  %5286 = vst [vmem:[#allocation10_spill] sm:$0xff] %v4199_v48 }
  0xe7   : > { %v1169_v51 = vadd.f32 %v1078_v59, %v928_v56  ;;  %v5278_v24 = vrot.slane %v3930_v3, 1  ;;  %v5279_v17 = vrot.slane %v3938_v29, 2  ;;  %v1338_v22 = vrot.slane %v1221_v53, 2  ;;  %v5282_v29 = vld [vmem:[#allocation17_spill] sm:$0xff]  ;;  %v5287_v53 = vld [vmem:[#allocation4_spill] sm:$0xff] }
  0xe8   : > { %v1949_v41 = vadd.f32 %v1846_v30, %v1708_v43  ;;  %v5280_v58 = vrot.slane %v3951_v44, 1  ;;  %v1644_v20 = vrot.slane %v1527_v1, 1  ;;  %v5281_v59 = vrot.slane %v3960_v11, 2 }
  0xe9   : > { %v550_v33 = vsel %vm495_vm0, %v5278_v24, %v549_v46  ;;  %v792_v60 = vsel %vm737_vm1, %v5279_v17, %v791_v55  ;;  %v1410_v15 = vadd.f32 %v1319_v49, %v1169_v51  ;;  %v1768_v27 = vmul.f32 %v4167_v35, %v3680_v36  ;;  %v5289_v51 = vld [vmem:[#allocation18_spill] sm:$0xff] }
  0xea   : > { %v629_v57 = vadd.f32 %v550_v33, %v355_v39  ;;  %v1098_v21 = vsel %vm495_vm0, %v5280_v58, %v1097_v23  ;;  %v1339_v3 = vsel %vm737_vm1, %v5281_v59, %v1338_v22  ;;  %v363_v16 = vmul.f32 %v5282_v29, %v2810_v5  ;;  %2638 = vmatmul.msk.f32.gmra.mxu0 %vm1984_vm2, %v1949_v41  ;;  %v2717_v39 = vld [vmem:[%s2823_s12 + $0x160] sm:$0x3]  ;;  %v2718_v59 = vld [vmem:[%s2823_s12 + $0x48] sm:$0xff] }
  0xeb   : > { %v5284_v44 = vrot.slane %v5283_v47, 1  ;;  %v443_v49 = vmul.f32 %v2717_v39, %v2812_v6  ;;  %v685_v11 = vmul.f32 %v2717_v39, %v2814_v7  ;;  %v1475_v0 = vadd.f32 %v1443_v62, %v1410_v15 }
  0xec   : > { %v871_v30 = vadd.f32 %v792_v60, %v629_v57  ;;  %v1885_v34 = vrot.slane %v1768_v27, 2  ;;  %v912_v63 = vmul.f32 %v2816_v8, %v3566_v32  ;;  %v992_v54 = vmul.f32 %v2818_v9, %v5285_v37 }
  0xed   : > { %v1645_v40 = vsel %vm495_vm0, %v5284_v44, %v1644_v20  ;;  %v569_v45 = vrot.slane %v443_v49, 1  ;;  %v811_v56 = vrot.slane %v685_v11, 2  ;;  %v1233_v46 = vmul.f32 %v2825_v10, %v5285_v37 }
  0xee   : > { %v936_v13 = vadd.f32 %v904_v18, %v871_v30  ;;  %v1716_v55 = vadd.f32 %v1625_v42, %v1475_v0  ;;  %v5288_v43 = vrot.slane %v5287_v53, 2  ;;  %v1117_v23 = vrot.slane %v992_v54, 1  ;;  %v5295_v54 = vld [vmem:[#allocation8_spill] sm:$0xff] }
  0xef   : > { %v1459_v32 = vmul.f32 %v2834_v14, %v4027_v4  ;;  %v5290_v18 = vrot.slane %v5289_v51, 1  ;;  %v5291_v33 = vrot.slane %v4012_v61, 2  ;;  %v1358_v60 = vrot.slane %v1233_v46, 2 }
  0xf0   : > { %v1886_v62 = vsel %vm737_vm1, %v5288_v43, %v1885_v34  ;;  %v1177_v1 = vadd.f32 %v1098_v21, %v936_v13  ;;  %v1957_v42 = vadd.f32 %v1866_v31, %v1716_v55  ;;  %v5292_v41 = vrot.slane %v4034_v26, 1 }
  0xf1   : > { %v570_v24 = vsel %vm495_vm0, %v5290_v18, %v569_v45  ;;  %v812_v17 = vsel %vm737_vm1, %v5291_v33, %v811_v56  ;;  %v1539_v58 = vmul.f32 %v2845_v19, %v4199_v48  ;;  %v5293_v20 = vrot.slane %v4040_v12, 2 }
  0xf2   : > { %v637_v22 = vadd.f32 %v570_v24, %v363_v16  ;;  %v1118_v57 = vsel %vm495_vm0, %v5292_v41, %v1117_v23  ;;  %v1418_v21 = vadd.f32 %v1339_v3, %v1177_v1  ;;  %v1780_v61 = vmul.f32 %v3680_v36, %v4199_v48  ;;  %2646 = vmatmul.msk.f32.gmra.mxu1 %vm1984_vm2, %v1957_v42  ;;  %v4229_v16 = vld [vmem:[%s2823_s12 + $0x50] sm:$0xff]  ;;  %v2720_v42 = vld [vmem:[%s2823_s12 + $0x78] sm:$0xff] }
  0xf3   : > { %v1359_v15 = vsel %vm737_vm1, %v5293_v20, %v1358_v60  ;;  %v340_v27 = vmul.f32 %v2718_v59, %v2810_v5  ;;  %v1664_v26 = vrot.slane %v1539_v58, 1  ;;  %v408_v29 = vmul.f32 %v2718_v59, %v2812_v6  ;;  %v5298_v1 = vld [vmem:[#allocation16_spill] sm:$0xff]  ;;  %v4275_v20 = vld [vmem:[%s2823_s12 + $0x80] sm:$0xff] }
  0xf4   : > { %v879_v31 = vadd.f32 %v812_v17, %v637_v22  ;;  %v4233_v3 = vmul.f32 %v4229_v16, %v2812_v6  ;;  %v1483_v12 = vadd.f32 %v1451_v38, %v1418_v21  ;;  %v1905_v30 = vrot.slane %v1780_v61, 2 }
  0xf5   : > { %v650_v47 = vmul.f32 %v2718_v59, %v2814_v7  ;;  %v4238_v44 = vmul.f32 %v4229_v16, %v2814_v7  ;;  %v5294_v49 = vrot.slane %v4053_v25, 1  ;;  %v511_v0 = vrot.slane %v408_v29, 1  ;;  %v5297_v25 = vld [vmem:[#allocation12_spill] sm:$0xff] }
  0xf6   : > { %v944_v39 = vadd.f32 %v912_v63, %v879_v31  ;;  %v5135_v34 = vrot.slane %v4233_v3, 1  ;;  %v1724_v37 = vadd.f32 %v1645_v40, %v1483_v12  ;;  %v5296_v13 = vrot.slane %v5295_v54, 2 }
  0xf7   : > { %v1665_v11 = vsel %vm495_vm0, %v5294_v49, %v1664_v26  ;;  %v753_v45 = vrot.slane %v650_v47, 2  ;;  %v5132_v56 = vrot.slane %v4238_v44, 2  ;;  %v889_v55 = vmul.f32 %v5297_v25, %v2816_v8 }
  0xf8   : > { %v1906_v38 = vsel %vm737_vm1, %v5296_v13, %v1905_v30  ;;  %v1185_v46 = vadd.f32 %v1118_v57, %v944_v39  ;;  %v513_v63 = vsel %vm495_vm0, %v511_v0, %v5135_v34  ;;  %v957_v53 = vmul.f32 %v5297_v25, %v2818_v9  ;;  %v2722_v39 = vld [vmem:[%s2823_s12 + $0xa8] sm:$0xff]  ;;  %v4301_v13 = vld [vmem:[%s2823_s12 + $0xb0] sm:$0xff] }
  0xf9   : > { %v1965_v40 = vadd.f32 %v1886_v62, %v1724_v37  ;;  %v614_v43 = vadd.f32 %v513_v63, %v340_v27  ;;  %v755_v23 = vsel %vm737_vm1, %v753_v45, %v5132_v56  ;;  %v4260_v51 = vmul.f32 %v5298_v1, %v2818_v9 }
  0xfa   : > { %v1426_v18 = vadd.f32 %v1359_v15, %v1185_v46  ;;  %v1059_v24 = vrot.slane %v957_v53, 1  ;;  %v1198_v33 = vmul.f32 %v5297_v25, %v2825_v10  ;;  %v4266_v17 = vmul.f32 %v5298_v1, %v2825_v10 }
  0xfb   : > { %2654 = vmatmul.msk.f32.gmra.mxu2 %vm1984_vm2, %v1965_v40  ;;  %v856_v62 = vadd.f32 %v755_v23, %v614_v43  ;;  %v5128_v60 = vrot.slane %v4260_v51, 1  ;;  %v1436_v22 = vmul.f32 %v2720_v42, %v2834_v14  ;;  %v1504_v41 = vmul.f32 %v2720_v42, %v2845_v19  ;;  %v5299_v40 = vld [vmem:[#allocation14_spill] sm:$0xff] }
  0xfc   : > { %v1491_v57 = vadd.f32 %v1459_v32, %v1426_v18  ;;  %v1300_v58 = vrot.slane %v1198_v33, 2  ;;  %v5127_v21 = vrot.slane %v4266_v17, 2  ;;  %v4279_v15 = vmul.f32 %v4275_v20, %v2845_v19 }
  0xfd   : > { %v921_v61 = vadd.f32 %v889_v55, %v856_v62  ;;  %v1061_v59 = vsel %vm495_vm0, %v1059_v24, %v5128_v60  ;;  %v1606_v27 = vrot.slane %v1504_v41, 1  ;;  %v1745_v31 = vmul.f32 %v2720_v42, %v3680_v36  ;;  %v4413_v60 = vld [vmem:[%s2823_s12 + $0x140] sm:$0xff] }
  0xfe   : > { %v1732_v26 = vadd.f32 %v1665_v11, %v1491_v57  ;;  %v1302_v32 = vsel %vm737_vm1, %v1300_v58, %v5127_v21  ;;  %v5126_v29 = vrot.slane %v4279_v15, 1  ;;  %v4291_v12 = vmul.f32 %v4275_v20, %v3680_v36 }
  0xff   : > { %v1162_v30 = vadd.f32 %v1061_v59, %v921_v61  ;;  %v1847_v47 = vrot.slane %v1745_v31, 2  ;;  %v348_v49 = vmul.f32 %v2722_v39, %v2810_v5  ;;  %v420_v0 = vmul.f32 %v2722_v39, %v2812_v6 }
 0x100   : > { %v1973_v37 = vadd.f32 %v1906_v38, %v1732_v26  ;;  %v1608_v11 = vsel %vm495_vm0, %v1606_v27, %v5126_v29  ;;  %v5124_v54 = vrot.slane %v4291_v12, 2  ;;  %v4305_v45 = vmul.f32 %v4301_v13, %v2812_v6 }
 0x101   : > { %v1403_v46 = vadd.f32 %v1302_v32, %v1162_v30  ;;  %v531_v63 = vrot.slane %v420_v0, 1  ;;  %v662_v25 = vmul.f32 %v2722_v39, %v2814_v7  ;;  %v4310_v55 = vmul.f32 %v4301_v13, %v2814_v7  ;;  %v2724_v32 = vld [vmem:[%s2823_s12 + $0xd8] sm:$0xff] }
 0x102   : > { %2662 = vmatmul.msk.f32.gmra.mxu3 %vm1984_vm2, %v1973_v37  ;;  %v1849_v38 = vsel %vm737_vm1, %v1847_v47, %v5124_v54  ;;  %v5123_v53 = vrot.slane %v4305_v45, 1  ;;  %v897_v43 = vmul.f32 %v5299_v40, %v2816_v8  ;;  %v969_v23 = vmul.f32 %v5299_v40, %v2818_v9  ;;  %v4347_v37 = vld [vmem:[%s2823_s12 + $0xe0] sm:$0xff] }
 0x103   : > { %v1468_v18 = vadd.f32 %v1436_v22, %v1403_v46  ;;  %v773_v24 = vrot.slane %v662_v25, 2  ;;  %v5122_v33 = vrot.slane %v4310_v55, 2  ;;  %v4324_v62 = vmul.f32 %v3904_v52, %v2818_v9 }
 0x104   : > { %v533_v42 = vsel %vm495_vm0, %v531_v63, %v5123_v53  ;;  %v1079_v41 = vrot.slane %v969_v23, 1  ;;  %v1210_v57 = vmul.f32 %v5299_v40, %v2825_v10  ;;  %v4333_v58 = vmul.f32 %v3904_v52, %v2825_v10 }
 0x105   : > { %v1709_v22 = vadd.f32 %v1608_v11, %v1468_v18  ;;  %v622_v61 = vadd.f32 %v533_v42, %v348_v49  ;;  %v775_v59 = vsel %vm737_vm1, %v773_v24, %v5122_v33  ;;  %v5121_v27 = vrot.slane %v4324_v62, 1  ;;  %v2726_v18 = vld [vmem:[%s2823_s12 + $0x108] sm:$0xff] }
 0x106   : > { %v1320_v31 = vrot.slane %v1210_v57, 2  ;;  %v5118_v26 = vrot.slane %v4333_v58, 2  ;;  %v1444_v30 = vmul.f32 %v2724_v32, %v2834_v14  ;;  %v1516_v47 = vmul.f32 %v2724_v32, %v2845_v19 }
 0x107   : > { %v1950_v39 = vadd.f32 %v1849_v38, %v1709_v22  ;;  %v864_v0 = vadd.f32 %v775_v59, %v622_v61  ;;  %v1081_v49 = vsel %vm495_vm0, %v1079_v41, %v5121_v27  ;;  %v4351_v11 = vmul.f32 %v4347_v37, %v2845_v19  ;;  %v4368_v22 = vld [vmem:[%s2823_s12 + $0x110] sm:$0xff] }
 0x108   : > { %v1322_v46 = vsel %vm737_vm1, %v1320_v31, %v5118_v26  ;;  %v1626_v63 = vrot.slane %v1516_v47, 1  ;;  %v1757_v25 = vmul.f32 %v2724_v32, %v3680_v36  ;;  %v4359_v38 = vmul.f32 %v4347_v37, %v3680_v36 }
 0x109   : > { %2639 = vmatmul.msk.f32.gmra.mxu0 %vm1984_vm2, %v1950_v39  ;;  %v929_v40 = vadd.f32 %v897_v43, %v864_v0  ;;  %v5120_v23 = vrot.slane %v4351_v11, 1  ;;  %v356_v24 = vmul.f32 %v2726_v18, %v2810_v5  ;;  %v432_v42 = vmul.f32 %v2726_v18, %v2812_v6 }
 0x10a   : > { %v1867_v41 = vrot.slane %v1757_v25, 2  ;;  %v5119_v57 = vrot.slane %v4359_v38, 2  ;;  %v4372_v61 = vmul.f32 %v4368_v22, %v2812_v6  ;;  %v674_v59 = vmul.f32 %v2726_v18, %v2814_v7  ;;  %v5300_v18 = vld [vmem:[#allocation3_spill] sm:$0xff] }
 0x10b   : > { %v1170_v43 = vadd.f32 %v1081_v49, %v929_v40  ;;  %v1628_v31 = vsel %vm495_vm0, %v1626_v63, %v5120_v23  ;;  %v551_v32 = vrot.slane %v432_v42, 1  ;;  %v4380_v47 = vmul.f32 %v4368_v22, %v2814_v7 }
 0x10c   : > { %v1869_v39 = vsel %vm737_vm1, %v1867_v41, %v5119_v57  ;;  %v5125_v0 = vrot.slane %v4372_v61, 1  ;;  %v793_v25 = vrot.slane %v674_v59, 2  ;;  %v905_v26 = vmul.f32 %v5300_v18, %v2816_v8 }
 0x10d   : > { %v1411_v49 = vadd.f32 %v1322_v46, %v1170_v43  ;;  %v5130_v40 = vrot.slane %v4380_v47, 2  ;;  %v981_v63 = vmul.f32 %v5300_v18, %v2818_v9  ;;  %v4393_v42 = vmul.f32 %v3975_v28, %v2818_v9  ;;  %v2728_v43 = vld [vmem:[%s2823_s12 + $0x138] sm:$0xff] }
 0x10e   : > { %v553_v41 = vsel %vm495_vm0, %v551_v32, %v5125_v0  ;;  %v1222_v59 = vmul.f32 %v5300_v18, %v2825_v10  ;;  %v4402_v46 = vmul.f32 %v3975_v28, %v2825_v10  ;;  %v1452_v57 = vmul.f32 %v2728_v43, %v2834_v14 }
 0x10f   : > { %v1476_v23 = vadd.f32 %v1444_v30, %v1411_v49  ;;  %v630_v27 = vadd.f32 %v553_v41, %v356_v24  ;;  %v795_v33 = vsel %vm737_vm1, %v793_v25, %v5130_v40  ;;  %v1099_v53 = vrot.slane %v981_v63, 1  ;;  %v4436_v40 = vld [vmem:[%s2823_s12 + $0x170] sm:$0xff] }
 0x110   : > { %v5129_v54 = vrot.slane %v4393_v42, 1  ;;  %v1340_v32 = vrot.slane %v1222_v59, 2  ;;  %v5131_v0 = vrot.slane %v4402_v46, 2  ;;  %v1528_v18 = vmul.f32 %v2728_v43, %v2845_v19 }
 0x111   : > { %v1717_v29 = vadd.f32 %v1628_v31, %v1476_v23  ;;  %v872_v21 = vadd.f32 %v795_v33, %v630_v27  ;;  %v4417_v30 = vmul.f32 %v4413_v60, %v2845_v19  ;;  %v1769_v24 = vmul.f32 %v2728_v43, %v3680_v36  ;;  %v2730_v43 = vld [vmem:[%s2823_s12 + $0x168] sm:$0xff] }
 0x112   : > { %v1101_v25 = vsel %vm495_vm0, %v1099_v53, %v5129_v54  ;;  %v1342_v49 = vsel %vm737_vm1, %v1340_v32, %v5131_v0  ;;  %v1646_v63 = vrot.slane %v1528_v18, 1  ;;  %v4428_v33 = vmul.f32 %v4413_v60, %v3680_v36  ;;  %v5304_v0 = vld [vmem:[#allocation5_spill] sm:$0xff] }
 0x113   : > { %5301 = vst [vmem:[#allocation13_spill] sm:$0xff] %v4417_v30  ;;  %v1958_v27 = vadd.f32 %v1869_v39, %v1717_v29  ;;  %v937_v23 = vadd.f32 %v905_v26, %v872_v21  ;;  %v5133_v31 = vrot.slane %v4417_v30, 1  ;;  %v1887_v41 = vrot.slane %v1769_v24, 2 }
 0x114   : > { %5302 = vst [vmem:[#allocation2_spill] sm:$0xff] %v4428_v33  ;;  %v5134_v59 = vrot.slane %v4428_v33, 2  ;;  %v364_v53 = vmul.f32 %v2730_v43, %v2810_v5  ;;  %v444_v54 = vmul.f32 %v2730_v43, %v2812_v6  ;;  %v4440_v36 = vmul.f32 %v4436_v40, %v2812_v6 }
 0x115   : > { %2647 = vmatmul.msk.f32.gmra.mxu1 %vm1984_vm2, %v1958_v27  ;;  %v1178_v21 = vadd.f32 %v1101_v25, %v937_v23  ;;  %v1648_v29 = vsel %vm495_vm0, %v1646_v63, %v5133_v31  ;;  %v686_v26 = vmul.f32 %v2730_v43, %v2814_v7  ;;  %v4449_v39 = vmul.f32 %v4436_v40, %v2814_v7  ;;  %v328_v23 = vld [vmem:[%s2823_s12 + $0x198] sm:$0xff]  ;;  %v4462_v31 = vld [vmem:[%s2823_s12 + $0x1a0] sm:$0xff] }
 0x116   : > { %5303 = vst [vmem:[#allocation15_spill] sm:$0xff] %v4440_v36  ;;  %v1889_v32 = vsel %vm737_vm1, %v1887_v41, %v5134_v59  ;;  %v571_v18 = vrot.slane %v444_v54, 1  ;;  %v5137_v24 = vrot.slane %v4440_v36, 1  ;;  %v913_v25 = vmul.f32 %v2816_v8, %v5304_v0 }
 0x117   : > { %v1419_v27 = vadd.f32 %v1342_v49, %v1178_v21  ;;  %v813_v56 = vrot.slane %v686_v26, 2  ;;  %v5147_v63 = vrot.slane %v4449_v39, 2  ;;  %v993_v43 = vmul.f32 %v2818_v9, %v5304_v0 }
 0x118   : > { %v573_v41 = vsel %vm495_vm0, %v571_v18, %v5137_v24  ;;  %v4469_v54 = vmul.f32 %v2818_v9, %v4027_v4  ;;  %v1234_v49 = vmul.f32 %v2825_v10, %v5304_v0  ;;  %v4475_v21 = vmul.f32 %v2825_v10, %v4027_v4 }
 0x119   : > { %v1484_v26 = vadd.f32 %v1452_v57, %v1419_v27  ;;  %v638_v59 = vadd.f32 %v573_v41, %v364_v53  ;;  %v815_v34 = vsel %vm737_vm1, %v813_v56, %v5147_v63  ;;  %v1119_v36 = vrot.slane %v993_v43, 1 }
 0x11a   : > { %v5144_v18 = vrot.slane %v4469_v54, 1  ;;  %v1360_v24 = vrot.slane %v1234_v49, 2  ;;  %v5143_v33 = vrot.slane %v4475_v21, 2  ;;  %v1460_v48 = vmul.f32 %v2834_v14, %v328_v23 }
 0x11b   : > { %v1725_v30 = vadd.f32 %v1648_v29, %v1484_v26  ;;  %v880_v0 = vadd.f32 %v815_v34, %v638_v59  ;;  %v1540_v4 = vmul.f32 %v2845_v19, %v328_v23  ;;  %v4486_v57 = vmul.f32 %v2845_v19, %v4462_v31  ;;  %v4497_v29 = vld [vmem:[%s4978_s1 + $0x8] ss:$0 sm:$0xff] }
 0x11c   : > { %v1121_v56 = vsel %vm495_vm0, %v1119_v36, %v5144_v18  ;;  %v1362_v53 = vsel %vm737_vm1, %v1360_v24, %v5143_v33  ;;  %v1781_v34 = vmul.f32 %v4497_v29, %v328_v23  ;;  %v4502_v59 = vmul.f32 %v4497_v29, %v4462_v31  ;;  %v2733_v33 = vld [vmem:[%s2823_s12 + $0x58] sm:$0x3] }
 0x11d   : > { %5305 = vst [vmem:[#allocation7_spill] sm:$0xff] %v4486_v57  ;;  %v1966_v27 = vadd.f32 %v1889_v32, %v1725_v30  ;;  %v945_v43 = vadd.f32 %v913_v25, %v880_v0  ;;  %v1666_v41 = vrot.slane %v1540_v4, 1  ;;  %v5146_v36 = vrot.slane %v4486_v57, 1 }
 0x11e   : > { %5306 = vst [vmem:[#allocation17_spill] sm:$0xff] %v4502_v59  ;;  %v1907_v49 = vrot.slane %v1781_v34, 2  ;;  %v5145_v26 = vrot.slane %v4502_v59, 2  ;;  %v341_v24 = vmul.f32 %v4229_v16, %v2810_v5  ;;  %v410_v18 = vmul.f32 %v2733_v33, %v2812_v6 }
 0x11f   : > { %2655 = vmatmul.msk.f32.gmra.mxu2 %vm1984_vm2, %v1966_v27  ;;  %v1186_v23 = vadd.f32 %v1121_v56, %v945_v43  ;;  %v1668_v30 = vsel %vm495_vm0, %v1666_v41, %v5146_v36  ;;  %v652_v4 = vmul.f32 %v2733_v33, %v2814_v7  ;;  %v890_v32 = vmul.f32 %v5298_v1, %v2816_v8  ;;  %v2734_v33 = vld [vmem:[%s2823_s12 + $0x88] sm:$0x3] }
 0x120   : > { %v1909_v25 = vsel %vm737_vm1, %v1907_v49, %v5145_v26  ;;  %v514_v16 = vrot.slane %v410_v18, 1  ;;  %v959_v0 = vmul.f32 %v4090_v2, %v2818_v9  ;;  %v1200_v56 = vmul.f32 %v4090_v2, %v2825_v10 }
 0x121   : > { %v1427_v34 = vadd.f32 %v1362_v53, %v1186_v23  ;;  %v756_v27 = vrot.slane %v652_v4, 2  ;;  %v1437_v43 = vmul.f32 %v4275_v20, %v2834_v14  ;;  %v1506_v41 = vmul.f32 %v2734_v33, %v2845_v19 }
 0x122   : > { %v5307_v1 = vrot.slane %v4233_v3, 1  ;;  %v1062_v18 = vrot.slane %v959_v0, 1  ;;  %v1303_v26 = vrot.slane %v1200_v56, 2  ;;  %v1747_v36 = vmul.f32 %v2734_v33, %v4497_v29 }
 0x123   : > { %v1492_v63 = vadd.f32 %v1460_v48, %v1427_v34  ;;  %v5308_v2 = vrot.slane %v4238_v44, 2  ;;  %v1609_v23 = vrot.slane %v1506_v41, 1  ;;  %v5309_v20 = vrot.slane %v4260_v51, 1  ;;  %v2735_v34 = vld [vmem:[%s2823_s12 + $0xb8] sm:$0x3] }
 0x124   : > { %v515_v49 = vsel %vm495_vm0, %v5307_v1, %v514_v16  ;;  %v5310_v3 = vrot.slane %v4266_v17, 2  ;;  %v1850_v16 = vrot.slane %v1747_v36, 2  ;;  %v349_v0 = vmul.f32 %v4301_v13, %v2810_v5  ;;  %v2736_v1 = vld [vmem:[%s2823_s12 + $0xe8] sm:$0x3] }
 0x125   : > { %v615_v59 = vadd.f32 %v515_v49, %v341_v24  ;;  %v757_v53 = vsel %vm737_vm1, %v5308_v2, %v756_v27  ;;  %v1063_v4 = vsel %vm495_vm0, %v5309_v20, %v1062_v18  ;;  %v1733_v56 = vadd.f32 %v1668_v30, %v1492_v63 }
 0x126   : > { %v1304_v57 = vsel %vm737_vm1, %v5310_v3, %v1303_v26  ;;  %v5311_v44 = vrot.slane %v4279_v15, 1  ;;  %v422_v51 = vmul.f32 %v2735_v34, %v2812_v6  ;;  %v5312_v27 = vrot.slane %v4291_v12, 2 }
 0x127   : > { %v857_v48 = vadd.f32 %v757_v53, %v615_v59  ;;  %v664_v26 = vmul.f32 %v2735_v34, %v2814_v7  ;;  %v898_v36 = vmul.f32 %v3904_v52, %v2816_v8  ;;  %v971_v13 = vmul.f32 %v4128_v50, %v2818_v9  ;;  %v4580_v34 = vpop.f32.mrf.mxu1 }
 0x128   : > { %v1610_v24 = vsel %vm495_vm0, %v5311_v44, %v1609_v23  ;;  %v1851_v17 = vsel %vm737_vm1, %v5312_v27, %v1850_v16  ;;  %v1974_v63 = vadd.f32 %v1909_v25, %v1733_v56  ;;  %v534_v15 = vrot.slane %v422_v51, 1  ;;  %v2737_v27 = vld [vmem:[%s2823_s12 + $0x118] sm:$0x3] }
 0x129   : > { %v922_v59 = vadd.f32 %v890_v32, %v857_v48  ;;  %v1212_v30 = vmul.f32 %v4128_v50, %v2825_v10  ;;  %v776_v33 = vrot.slane %v664_v26, 2  ;;  %v1082_v41 = vrot.slane %v971_v13, 1  ;;  %v4567_v50 = vpop.f32.mrf.mxu0 }
 0x12a   : > { %v1445_v12 = vmul.f32 %v4347_v37, %v2834_v14  ;;  %v1518_v49 = vmul.f32 %v2736_v1, %v2845_v19  ;;  %2663 = vmatmul.msk.f32.gmra.mxu3 %vm1984_vm2, %v1974_v63  ;;  %v5313_v18 = vrot.slane %v4305_v45, 1  ;;  %v1759_v2 = vmul.f32 %v2736_v1, %v4497_v29 }
 0x12b   : > { %v1163_v52 = vadd.f32 %v1063_v4, %v922_v59  ;;  %v1323_v32 = vrot.slane %v1212_v30, 2  ;;  %v5314_v23 = vrot.slane %v4310_v55, 2  ;;  %v5315_v20 = vrot.slane %v4324_v62, 1 }
 0x12c   : > { %v535_v25 = vsel %vm495_vm0, %v5313_v18, %v534_v15  ;;  %v1629_v4 = vrot.slane %v1518_v49, 1  ;;  %v5316_v45 = vrot.slane %v4333_v58, 2  ;;  %v1870_v48 = vrot.slane %v1759_v2, 2 }
 0x12d   : > { %v623_v53 = vadd.f32 %v535_v25, %v349_v0  ;;  %v777_v37 = vsel %vm737_vm1, %v5314_v23, %v776_v33  ;;  %v1083_v3 = vsel %vm495_vm0, %v5315_v20, %v1082_v41  ;;  %v1404_v16 = vadd.f32 %v1304_v57, %v1163_v52  ;;  %v4582_v0 = vpop.f32.mrf.mxu2  ;;  %v2170_v23 = vpop.f32.mrf.mxu3 }
 0x12e   : > { %v1324_v56 = vsel %vm737_vm1, %v5316_v45, %v1323_v32  ;;  %v357_v44 = vmul.f32 %v4368_v22, %v2810_v5  ;;  %v5317_v51 = vrot.slane %v4351_v11, 1  ;;  %v434_v57 = vmul.f32 %v2737_v27, %v2812_v6  ;;  %v2739_v45 = vld [vmem:[%s2823_s12 + $0x178] sm:$0x3] }
 0x12f   : > { %v865_v55 = vadd.f32 %v777_v37, %v623_v53  ;;  %v676_v58 = vmul.f32 %v2737_v27, %v2814_v7  ;;  %v1469_v26 = vadd.f32 %v1437_v43, %v1404_v16  ;;  %v5318_v13 = vrot.slane %v4359_v38, 2  ;;  %v2738_v38 = vld [vmem:[%s2823_s12 + $0x148] sm:$0x3] }
 0x130   : > { %v1630_v62 = vsel %vm495_vm0, %v5317_v51, %v1629_v4  ;;  %v906_v63 = vmul.f32 %v3975_v28, %v2816_v8  ;;  %v983_v59 = vmul.f32 %v4167_v35, %v2818_v9  ;;  %v554_v15 = vrot.slane %v434_v57, 1  ;;  %v5323_v4 = vld [vmem:[#allocation13_spill] sm:$0xff]  ;;  %v5325_v51 = vld [vmem:[#allocation6_spill] sm:$0xff] }
 0x131   : > { %v1871_v22 = vsel %vm737_vm1, %v5318_v13, %v1870_v48  ;;  %v930_v11 = vadd.f32 %v898_v36, %v865_v55  ;;  %v796_v30 = vrot.slane %v676_v58, 2  ;;  %v1224_v33 = vmul.f32 %v4167_v35, %v2825_v10  ;;  %v2101_v48 = vpop.f32.mrf.mxu0  ;;  %v5326_v57 = vld [vmem:[#allocation10_spill] sm:$0xff]  ;;  %v330_v58 = vld [vmem:[%s2823_s12 + $0x1a8] sm:$0x3] }
 0x132   : > { %v1710_v41 = vadd.f32 %v1610_v24, %v1469_v26  ;;  %v1102_v1 = vrot.slane %v983_v59, 1  ;;  %v1453_v43 = vmul.f32 %v4413_v60, %v2834_v14  ;;  %v1530_v49 = vmul.f32 %v2738_v38, %v2845_v19 }
 0x133   : > { %v1171_v52 = vadd.f32 %v1083_v3, %v930_v11  ;;  %v5319_v28 = vrot.slane %v4372_v61, 1  ;;  %v5320_v36 = vrot.slane %v4380_v47, 2  ;;  %v1343_v32 = vrot.slane %v1224_v33, 2 }
 0x134   : > { %v1951_v35 = vadd.f32 %v1851_v17, %v1710_v41  ;;  %v5321_v2 = vrot.slane %v4393_v42, 1  ;;  %v1649_v53 = vrot.slane %v1530_v49, 1  ;;  %v5322_v20 = vrot.slane %v4402_v46, 2  ;;  %v5329_v41 = vld [vmem:[#allocation15_spill] sm:$0xff] }
 0x135   : > { %v555_v18 = vsel %vm495_vm0, %v5319_v28, %v554_v15  ;;  %v797_v25 = vsel %vm737_vm1, %v5320_v36, %v796_v30  ;;  %v1412_v37 = vadd.f32 %v1324_v56, %v1171_v52  ;;  %v1771_v3 = vmul.f32 %v2738_v38, %v4497_v29 }
 0x136   : > { %v631_v24 = vadd.f32 %v555_v18, %v357_v44  ;;  %v1103_v60 = vsel %vm495_vm0, %v5321_v2, %v1102_v1  ;;  %v1344_v61 = vsel %vm737_vm1, %v5322_v20, %v1343_v32  ;;  %v365_v47 = vmul.f32 %v4436_v40, %v2810_v5  ;;  %2640 = vmatmul.msk.f32.gmra.mxu0 %vm1984_vm2, %v1951_v35 }
 0x137   : > { %v5324_v42 = vrot.slane %v5323_v4, 1  ;;  %v446_v56 = vmul.f32 %v2739_v45, %v2812_v6  ;;  %v688_v46 = vmul.f32 %v2739_v45, %v2814_v7  ;;  %v1477_v44 = vadd.f32 %v1445_v12, %v1412_v37  ;;  %v4635_v6 = vld [vmem:[%s4980_s3] ss:$0 sm:$0xff]  ;;  %v2125_v7 = vpop.f32.mrf.mxu1  ;;  %v2149_v12 = vpop.f32.mrf.mxu2  ;;  %v5334_v37 = vld [vmem:[#allocation7_spill] sm:$0xff] }
 0x138   : > { %v873_v17 = vadd.f32 %v797_v25, %v631_v24  ;;  %v1890_v55 = vrot.slane %v1771_v3, 2  ;;  %v914_v27 = vmul.f32 %v2816_v8, %v5325_v51  ;;  %v995_v5 = vmul.f32 %v2818_v9, %v5326_v57  ;;  %v5327_v8 = vld [vmem:[#allocation2_spill] sm:$0xff] }
 0x139   : > { %v1650_v16 = vsel %vm495_vm0, %v5324_v42, %v1649_v53  ;;  %v574_v26 = vrot.slane %v446_v56, 1  ;;  %v816_v13 = vrot.slane %v688_v46, 2  ;;  %v1236_v59 = vmul.f32 %v2825_v10, %v5326_v57  ;;  %v2104_v42 = vpop.f32.mrf.mxu0 }
 0x13a   : > { %v938_v40 = vadd.f32 %v906_v63, %v873_v17  ;;  %v1718_v11 = vadd.f32 %v1630_v62, %v1477_v44  ;;  %v5328_v15 = vrot.slane %v5327_v8, 2  ;;  %v1122_v63 = vrot.slane %v995_v5, 1 }
 0x13b   : > { %v1461_v30 = vmul.f32 %v2834_v14, %v4462_v31  ;;  %v5330_v1 = vrot.slane %v5329_v41, 1  ;;  %v5331_v38 = vrot.slane %v4449_v39, 2  ;;  %v1363_v52 = vrot.slane %v1236_v59, 2 }
 0x13c   : > { %v1891_v9 = vsel %vm737_vm1, %v5328_v15, %v1890_v55  ;;  %v1179_v33 = vadd.f32 %v1103_v60, %v938_v40  ;;  %v1959_v62 = vadd.f32 %v1871_v22, %v1718_v11  ;;  %v5332_v18 = vrot.slane %v4469_v54, 1  ;;  %v2173_v60 = vpop.f32.mrf.mxu3 }
 0x13d   : > { %v575_v10 = vsel %vm495_vm0, %v5330_v1, %v574_v26  ;;  %v817_v49 = vsel %vm737_vm1, %v5331_v38, %v816_v13  ;;  %v1542_v25 = vmul.f32 %v2845_v19, %v330_v58  ;;  %v5333_v31 = vrot.slane %v4475_v21, 2 }
 0x13e   : > { %v639_v28 = vadd.f32 %v575_v10, %v365_v47  ;;  %v1123_v36 = vsel %vm495_vm0, %v5332_v18, %v1122_v63  ;;  %v1420_v14 = vadd.f32 %v1344_v61, %v1179_v33  ;;  %v1783_v35 = vmul.f32 %v4497_v29, %v330_v58  ;;  %2648 = vmatmul.msk.f32.gmra.mxu1 %vm1984_vm2, %v1959_v62 }
 0x13f   : > { %v1364_v32 = vsel %vm737_vm1, %v5333_v31, %v1363_v52  ;;  %v2099_v39 = vadd.f32 %v4635_v6, %v4567_v50  ;;  %v1669_v24 = vrot.slane %v1542_v25, 1  ;;  %v2123_v19 = vadd.f32 %v4635_v6, %v4580_v34  ;;  %v5336_v34 = vld [vmem:[#allocation17_spill] sm:$0xff]  ;;  %v2152_v57 = vpop.f32.mrf.mxu2 }
 0x140   : > { %v881_v22 = vadd.f32 %v817_v49, %v639_v28  ;;  %v2147_v54 = vadd.f32 %v4635_v6, %v4582_v0  ;;  %v1485_v21 = vadd.f32 %v1453_v43, %v1420_v14  ;;  %v1910_v29 = vrot.slane %v1783_v35, 2 }
 0x141   : > { %v2194_v50 = vmax.f32 %v2099_v39, 0.0  ;;  %v2171_v2 = vadd.f32 %v4635_v6, %v2170_v23  ;;  %v5335_v20 = vrot.slane %v5334_v37, 1  ;;  %v2202_v3 = vmax.f32 %v2123_v19, 0.0 }
 0x142   : > { %v946_v53 = vadd.f32 %v914_v27, %v881_v22  ;;  %v2210_v47 = vmax.f32 %v2147_v54, 0.0  ;;  %v1726_v17 = vadd.f32 %v1650_v16, %v1485_v21  ;;  %v5337_v4 = vrot.slane %v5336_v34, 2  ;;  %v2128_v27 = vpop.f32.mrf.mxu1 }
 0x143   : > { %v1670_v61 = vsel %vm495_vm0, %v5335_v20, %v1669_v24  ;;  %2226 = vst.msk [vmem:[%s4663_s26] sm:$0xff] %vm1984_vm2, %v2194_v50  ;;  %v2258_v43 = vsel %vm1984_vm2, %v2194_v50, 0.0  ;;  %v2218_v23 = vmax.f32 %v2171_v2, 0.0  ;;  %v4682_v56 = vsel %vm1984_vm2, %v2202_v3, 0.0 }
 0x144   : > { %v1911_v0 = vsel %vm737_vm1, %v5337_v4, %v1910_v29  ;;  %v1187_v45 = vadd.f32 %v1123_v36, %v946_v53  ;;  %2234 = vst.msk [vmem:[%s4663_s26 + $0x40] sm:$0xff] %vm1984_vm2, %v2202_v3  ;;  %v4685_v46 = vsel %vm1984_vm2, %v2210_v47, 0.0  ;;  %v2102_v16 = vadd.f32 %v4635_v6, %v2101_v48  ;;  %v2176_v18 = vpop.f32.mrf.mxu3 }
 0x145   : > { %v1967_v44 = vadd.f32 %v1891_v9, %v1726_v17  ;;  %2242 = vst.msk [vmem:[%s4663_s26 + $0x80] sm:$0xff] %vm1984_vm2, %v2210_v47  ;;  %v4691_v55 = vsel %vm1984_vm2, %v2218_v23, 0.0  ;;  %v2126_v51 = vadd.f32 %v4635_v6, %v2125_v7  ;;  %v2748_v58 = vmov 16.0  }
 0x146   : > { %v1428_v5 = vadd.f32 %v1364_v32, %v1187_v45  ;;  %2250 = vst.msk [vmem:[%s4663_s26 + $0xc0] sm:$0xff] %vm1984_vm2, %v2218_v23  ;;  %v2195_v40 = vmax.f32 %v2102_v16, 0.0  ;;  %2694 = vrcp.f32 %v2748_v58  ;;  %v2150_v48 = vadd.f32 %v4635_v6, %v2149_v12  ;;  %v2107_v32 = vpop.f32.mrf.mxu0 }
 0x147   : > { %2656 = vmatmul.msk.f32.gmra.mxu2 %vm1984_vm2, %v1967_v44  ;;  %v2203_v26 = vmax.f32 %v2126_v51, 0.0  ;;  %v2174_v13 = vadd.f32 %v4635_v6, %v2173_v60  ;;  %v2105_v59 = vadd.f32 %v4635_v6, %v2104_v42  ;;  %v2129_v7 = vadd.f32 %v4635_v6, %v2128_v27  ;;  %v2155_v20 = vpop.f32.mrf.mxu2 }
 0x148   : > { %v1493_v11 = vadd.f32 %v1461_v30, %v1428_v5  ;;  %2227 = vst.msk [vmem:[%s4663_s26 + $0x8] sm:$0xff] %vm1984_vm2, %v2195_v40  ;;  %v2259_v8 = vsel %vm1984_vm2, %v2195_v40, 0.0  ;;  %v2211_v15 = vmax.f32 %v2150_v48, 0.0  ;;  %v2153_v9 = vadd.f32 %v4635_v6, %v2152_v57 }
 0x149   : > { %v2260_v12 = vadd.f32 %v2259_v8, %v2258_v43  ;;  %2235 = vst.msk [vmem:[%s4663_s26 + $0x48] sm:$0xff] %vm1984_vm2, %v2203_v26  ;;  %v4708_v63 = vsel %vm1984_vm2, %v2203_v26, 0.0  ;;  %v2219_v33 = vmax.f32 %v2174_v13, 0.0  ;;  %v2196_v41 = vmax.f32 %v2105_v59, 0.0 }
 0x14a   : > { %v1734_v1 = vadd.f32 %v1670_v61, %v1493_v11  ;;  %v4712_v30 = vadd.f32 %v4708_v63, %v4682_v56  ;;  %2243 = vst.msk [vmem:[%s4663_s26 + $0x88] sm:$0xff] %vm1984_vm2, %v2211_v15  ;;  %v4717_v10 = vsel %vm1984_vm2, %v2211_v15, 0.0  ;;  %v2204_v38 = vmax.f32 %v2129_v7, 0.0  ;;  %v2131_v19 = vpop.f32.mrf.mxu1 }
 0x14b   : > { %v2261_v49 = vrot.slane %v2260_v12, 4  ;;  %v2332_v52 = vadd.f32 %v4717_v10, %v4685_v46  ;;  %2251 = vst.msk [vmem:[%s4663_s26 + $0xc8] sm:$0xff] %vm1984_vm2, %v2219_v33  ;;  %v4724_v62 = vsel %vm1984_vm2, %v2219_v33, 0.0  ;;  %v2267_v28 = vsel %vm1984_vm2, %v2196_v41, 0.0 }
 0x14c   : > { %v4727_v36 = vpop.eup %2694  ;;  %v1975_v25 = vadd.f32 %v1911_v0, %v1734_v1  ;;  %v4731_v14 = vadd.f32 %v4724_v62, %v4691_v55  ;;  %2228 = vst.msk [vmem:[%s4663_s26 + $0x10] sm:$0xff] %vm1984_vm2, %v2196_v41  ;;  %v4735_v31 = vadd.f32 %v2267_v28, %v2258_v43  ;;  %v2212_v39 = vmax.f32 %v2153_v9, 0.0  ;;  %v2179_v47 = vpop.f32.mrf.mxu3 }
 0x14d   : > { %2236 = vst.msk [vmem:[%s4663_s26 + $0x50] sm:$0xff] %vm1984_vm2, %v2204_v38  ;;  %v2262_v35 = vadd.f32 %v2261_v49, %v2260_v12  ;;  %v2403_v22 = vmul.f32 16.0, %v4727_v36  ;;  %v2177_v24 = vadd.f32 %v4635_v6, %v2176_v18  ;;  %v2108_v54 = vadd.f32 %v4635_v6, %v2107_v32 }
 0x14e   : > { %2664 = vmatmul.msk.f32.gmra.mxu3 %vm1984_vm2, %v1975_v25  ;;  %2244 = vst.msk [vmem:[%s4663_s26 + $0x90] sm:$0xff] %vm1984_vm2, %v2212_v39  ;;  %v2333_v21 = vrot.slane %v2332_v52, 4  ;;  %v2132_v37 = vadd.f32 %v4635_v6, %v2131_v19  ;;  %v4752_v34 = vsel %vm1984_vm2, %v2204_v38, 0.0  ;;  %v2156_v42 = vadd.f32 %v4635_v6, %v2155_v20  ;;  %v2110_v45 = vpop.f32.mrf.mxu0 }
 0x14f   : > { %v2220_v29 = vmax.f32 %v2177_v24, 0.0  ;;  %v2263_v50 = vrot.slane %v2262_v35, 2  ;;  %v2197_v2 = vmax.f32 %v2108_v54, 0.0  ;;  %v2404_v60 = vsub.f32 1.0, %v2403_v22 }
 0x150   : > { %v2334_v61 = vadd.f32 %v2333_v21, %v2332_v52  ;;  %v2205_v0 = vmax.f32 %v2132_v37, 0.0  ;;  %v4759_v16 = vsel %vm1984_vm2, %v2212_v39, 0.0  ;;  %v2180_v51 = vadd.f32 %v4635_v6, %v2179_v47 }
 0x151   : > { %2252 = vst.msk [vmem:[%s4663_s26 + $0xd0] sm:$0xff] %vm1984_vm2, %v2220_v29  ;;  %v2268_v53 = vsel %vm1984_vm2, %v2197_v2, 0.0  ;;  %v2264_v17 = vadd.f32 %v2263_v50, %v2262_v35  ;;  %v2405_v43 = vmul.f32 %v4727_v36, %v2404_v60  ;;  %v2213_v40 = vmax.f32 %v2156_v42, 0.0 }
 0x152   : > { %2229 = vst.msk [vmem:[%s4663_s26 + $0x18] sm:$0xff] %vm1984_vm2, %v2197_v2  ;;  %v2269_v3 = vadd.f32 %v2268_v53, %v2267_v28  ;;  %v4754_v4 = vadd.f32 %v2268_v53, %v2259_v8  ;;  %v4764_v44 = vsel %vm1984_vm2, %v2205_v0, 0.0  ;;  %v2335_v27 = vrot.slane %v2334_v61, 2  ;;  %v2134_v58 = vpop.f32.mrf.mxu1 }
 0x153   : > { %2237 = vst.msk [vmem:[%s4663_s26 + $0x58] sm:$0xff] %vm1984_vm2, %v2205_v0  ;;  %v4769_v5 = vadd.f32 %v4764_v44, %v4752_v34  ;;  %v2265_v48 = vrot.slane %v2264_v17, 1  ;;  %v2221_v26 = vmax.f32 %v2180_v51, 0.0  ;;  %v2111_v13 = vadd.f32 %v4635_v6, %v2110_v45 }
 0x154   : > { %v2270_v23 = vrot.slane %v2269_v3, 4  ;;  %v2135_v59 = vadd.f32 %v4635_v6, %v2134_v58  ;;  %v2406_v7 = vadd.f32 %v4727_v36, %v2405_v43  ;;  %v4775_v11 = vsel %vm1984_vm2, %v2220_v29, 0.0  ;;  %2245 = vst.msk [vmem:[%s4663_s26 + $0x98] sm:$0xff] %vm1984_vm2, %v2213_v40 }
 0x155   : > { %v4780_v15 = vsel %vm1984_vm2, %v2213_v40, 0.0  ;;  %2253 = vst.msk [vmem:[%s4663_s26 + $0xd8] sm:$0xff] %vm1984_vm2, %v2221_v26  ;;  %v4787_v12 = vsel %vm1984_vm2, %v2221_v26, 0.0  ;;  %v2198_v33 = vmax.f32 %v2111_v13, 0.0  ;;  %vm2407_vm3 = vweird.f32 %v4727_v36 }
 0x156   : > { %v2271_v57 = vadd.f32 %v2270_v23, %v2269_v3  ;;  %v2341_v9 = vadd.f32 %v4780_v15, %v4759_v16  ;;  %v2206_v41 = vmax.f32 %v2135_v59, 0.0  ;;  %v4792_v38 = vadd.f32 %v4787_v12, %v4775_v11  ;;  %v2158_v54 = vpop.f32.mrf.mxu2 }
 0x157   : > { %v2336_v49 = vadd.f32 %v2335_v27, %v2334_v61  ;;  %2230 = vst.msk [vmem:[%s4663_s26 + $0x20] sm:$0xff] %vm1984_vm2, %v2198_v33  ;;  %v2276_v28 = vsel %vm1984_vm2, %v2198_v33, 0.0  ;;  %v2266_v18 = vadd.f32 %v2265_v48, %v2264_v17  ;;  %v4803_v35 = vsel %vm2407_vm3, %v4727_v36, %v2406_v7 }
 0x158   : > { %v2272_v8 = vrot.slane %v2271_v57, 2  ;;  %v2342_v52 = vrot.slane %v2341_v9, 4  ;;  %v4798_v32 = vadd.f32 %v4735_v31, %v2276_v28  ;;  %2238 = vst.msk [vmem:[%s4663_s26 + $0x60] sm:$0xff] %vm1984_vm2, %v2206_v41  ;;  %v2159_v31 = vadd.f32 %v4635_v6, %v2158_v54 }
 0x159   : > { %v2337_v24 = vrot.slane %v2336_v49, 1  ;;  %v2409_v21 = vmul.f32 %v4803_v35, %v2266_v18  ;;  %v2312_v48 = vsel %vm1984_vm2, %v2206_v41, 0.0 }
 0x15a   : > { %v2273_v1 = vadd.f32 %v2272_v8, %v2271_v57  ;;  %v2343_v39 = vadd.f32 %v2342_v52, %v2341_v9  ;;  %v2214_v60 = vmax.f32 %v2159_v31, 0.0 }
 0x15b   : > { %v2338_v53 = vadd.f32 %v2337_v24, %v2336_v49 }
 0x15c   : > { %v2274_v25 = vrot.slane %v2273_v1, 1  ;;  %v2344_v19 = vrot.slane %v2343_v39, 2  ;;  %2246 = vst.msk [vmem:[%s4663_s26 + $0xa0] sm:$0xff] %vm1984_vm2, %v2214_v60  ;;  %v2348_v18 = vsel %vm1984_vm2, %v2214_v60, 0.0 }
 0x15d   : > { %v2417_v20 = vmul.f32 %v4803_v35, %v2338_v53 }
 0x15e   : > { %v2275_v22 = vadd.f32 %v2274_v25, %v2273_v1  ;;  %v2345_v50 = vadd.f32 %v2344_v19, %v2343_v39 }
 0x160   : > { %v2410_v29 = vmul.f32 %v4803_v35, %v2275_v22  ;;  %v2346_v36 = vrot.slane %v2345_v50, 1 }
 0x161   : > { %v2182_v47 = vpop.f32.mrf.mxu3 }
 0x162   : > { %v2442_v2 = vsel %vm2441_vm4, %v2410_v29, %v2409_v21  ;;  %v2347_v37 = vadd.f32 %v2346_v36, %v2345_v50  ;;  %v2183_v17 = vadd.f32 %v4635_v6, %v2182_v47 }
 0x164   : > { %v2418_v61 = vmul.f32 %v4803_v35, %v2347_v37  ;;  %v2222_v0 = vmax.f32 %v2183_v17, 0.0 }
 0x166   : > { %v2455_v3 = vsel %vm2441_vm4, %v2418_v61, %v2417_v20  ;;  %2254 = vst.msk [vmem:[%s4663_s26 + $0xe0] sm:$0xff] %vm1984_vm2, %v2222_v0 }
 0x167   : > { %v2113_v43 = vpop.f32.mrf.mxu0 }
 0x168   : > { %v2114_v23 = vadd.f32 %v4635_v6, %v2113_v43 }
 0x16a   : > { %v2199_v42 = vmax.f32 %v2114_v23, 0.0 }
 0x16c   : > { %2231 = vst.msk [vmem:[%s4663_s26 + $0x28] sm:$0xff] %vm1984_vm2, %v2199_v42  ;;  %v2277_v45 = vsel %vm1984_vm2, %v2199_v42, 0.0 }
 0x16d   : > { %v2278_v51 = vadd.f32 %v2277_v45, %v2276_v28  ;;  %v4820_v27 = vadd.f32 %v4754_v4, %v2277_v45 }
 0x16f   : > { %v2137_v57 = vpop.f32.mrf.mxu1  ;;  %v2279_v40 = vrot.slane %v2278_v51, 4 }
 0x170   : > { %v2138_v58 = vadd.f32 %v4635_v6, %v2137_v57 }
 0x171   : > { %v2280_v26 = vadd.f32 %v2279_v40, %v2278_v51 }
 0x172   : > { %v2207_v13 = vmax.f32 %v2138_v58, 0.0 }
 0x173   : > { %v2281_v59 = vrot.slane %v2280_v26, 2 }
 0x174   : > { %2239 = vst.msk [vmem:[%s4663_s26 + $0x68] sm:$0xff] %vm1984_vm2, %v2207_v13  ;;  %v4827_v7 = vsel %vm1984_vm2, %v2207_v13, 0.0 }
 0x175   : > { %v4830_v8 = vadd.f32 %v4827_v7, %v2312_v48  ;;  %v2282_v4 = vadd.f32 %v2281_v59, %v2280_v26 }
 0x177   : > { %v2283_v9 = vrot.slane %v2282_v4, 1 }
 0x179   : > { %v2284_v33 = vadd.f32 %v2283_v9, %v2282_v4 }
 0x17b   : > { %v2411_v1 = vmul.f32 %v4803_v35, %v2284_v33 }
 0x17d   : > { %v4835_v52 = vsel %vm2443_vm5, %v2411_v1, %v2442_v2  ;;  %v2384_v2 = vsel %vm1984_vm2, %v2222_v0, 0.0  ;;  %v2306_v1 = vrot.slane %v4769_v5, 4 }
 0x17e   : > { %v2161_v49 = vpop.f32.mrf.mxu2 }
 0x17f   : > { %v2162_v41 = vadd.f32 %v4635_v6, %v2161_v49 }
 0x181   : > { %v2215_v28 = vmax.f32 %v2162_v41, 0.0  ;;  %v2315_v41 = vrot.slane %v4830_v8, 4 }
 0x183   : > { %2247 = vst.msk [vmem:[%s4663_s26 + $0xa8] sm:$0xff] %vm1984_vm2, %v2215_v28  ;;  %v4841_v25 = vsel %vm1984_vm2, %v2215_v28, 0.0 }
 0x184   : > { %v2350_v39 = vadd.f32 %v4841_v25, %v2348_v18 }
 0x185   : > { %v2185_v22 = vpop.f32.mrf.mxu3 }
 0x186   : > { %v2351_v24 = vrot.slane %v2350_v39, 4  ;;  %v2186_v19 = vadd.f32 %v4635_v6, %v2185_v22  ;;  %v2116_v54 = vpop.f32.mrf.mxu0 }
 0x187   : > { %v2117_v21 = vadd.f32 %v4635_v6, %v2116_v54 }
 0x188   : > { %v2352_v29 = vadd.f32 %v2351_v24, %v2350_v39  ;;  %v2223_v31 = vmax.f32 %v2186_v19, 0.0  ;;  %v2316_v19 = vadd.f32 %v2315_v41, %v4830_v8 }
 0x189   : > { %v2200_v50 = vmax.f32 %v2117_v21, 0.0 }
 0x18a   : > { %v2353_v60 = vrot.slane %v2352_v29, 2  ;;  %2255 = vst.msk [vmem:[%s4663_s26 + $0xe8] sm:$0xff] %vm1984_vm2, %v2223_v31  ;;  %v4850_v53 = vsel %vm1984_vm2, %v2223_v31, 0.0 }
 0x18b   : > { %v4853_v36 = vadd.f32 %v4850_v53, %v2384_v2  ;;  %2232 = vst.msk [vmem:[%s4663_s26 + $0x30] sm:$0xff] %vm1984_vm2, %v2200_v50  ;;  %v2285_v37 = vsel %vm1984_vm2, %v2200_v50, 0.0  ;;  %v2317_v50 = vrot.slane %v2316_v19, 2 }
 0x18c   : > { %v2354_v20 = vadd.f32 %v2353_v60, %v2352_v29  ;;  %v2468_v61 = vadd.f32 %v4798_v32, %v2285_v37 }
 0x18e   : > { %v2355_v47 = vrot.slane %v2354_v20, 1  ;;  %v2469_v17 = vadd.f32 %v2468_v61, %v4682_v56 }
 0x190   : > { %v2356_v0 = vadd.f32 %v2355_v47, %v2354_v20  ;;  %v2470_v43 = vadd.f32 %v2469_v17, %v4752_v34 }
 0x192   : > { %v2419_v23 = vmul.f32 %v4803_v35, %v2356_v0  ;;  %v2140_v42 = vpop.f32.mrf.mxu1  ;;  %v2471_v45 = vadd.f32 %v2470_v43, %v2312_v48  ;;  %v2318_v43 = vadd.f32 %v2317_v50, %v2316_v19 }
 0x193   : > { %v2141_v51 = vadd.f32 %v4635_v6, %v2140_v42 }
 0x194   : > { %v4864_v57 = vsel %vm2443_vm5, %v2419_v23, %v2455_v3 }
 0x195   : > { %v2208_v40 = vmax.f32 %v2141_v51, 0.0 }
 0x197   : > { %2240 = vst.msk [vmem:[%s4663_s26 + $0x70] sm:$0xff] %vm1984_vm2, %v2208_v40  ;;  %v2321_v32 = vsel %vm1984_vm2, %v2208_v40, 0.0 }
 0x198   : > { %v2472_v58 = vadd.f32 %v2471_v45, %v2321_v32 }
 0x19a   : > { %v2473_v56 = vadd.f32 %v2472_v58, %v4685_v46  ;;  %v2297_v46 = vrot.slane %v4712_v30, 4 }
 0x19c   : > { %v2474_v34 = vadd.f32 %v2473_v56, %v4759_v16  ;;  %v2298_v39 = vadd.f32 %v2297_v46, %v4712_v30 }
 0x19e   : > { %v2475_v26 = vadd.f32 %v2474_v34, %v2348_v18  ;;  %v2319_v34 = vrot.slane %v2318_v43, 1 }
 0x1a2   : > { %v2164_v13 = vpop.f32.mrf.mxu2 }
 0x1a3   : > { %v2165_v48 = vadd.f32 %v4635_v6, %v2164_v13  ;;  %v2369_v13 = vrot.slane %v4731_v14, 4 }
 0x1a5   : > { %v2216_v59 = vmax.f32 %v2165_v48, 0.0 }
 0x1a7   : > { %2248 = vst.msk [vmem:[%s4663_s26 + $0xb0] sm:$0xff] %vm1984_vm2, %v2216_v59  ;;  %v4875_v3 = vsel %vm1984_vm2, %v2216_v59, 0.0 }
 0x1a8   : > { %v2476_v4 = vadd.f32 %v2475_v26, %v4875_v3 }
 0x1aa   : > { %v2477_v9 = vadd.f32 %v2476_v4, %v4691_v55  ;;  %v2307_v55 = vadd.f32 %v2306_v1, %v4769_v5  ;;  %v2299_v5 = vrot.slane %v2298_v39, 2 }
 0x1ac   : > { %v2478_v16 = vadd.f32 %v2477_v9, %v4775_v11  ;;  %v2308_v29 = vrot.slane %v2307_v55, 2  ;;  %v2300_v20 = vadd.f32 %v2299_v5, %v2298_v39  ;;  %v2378_v9 = vrot.slane %v4792_v38, 4 }
 0x1ad   : > { %v2188_v33 = vpop.f32.mrf.mxu3 }
 0x1ae   : > { %v2189_v49 = vadd.f32 %v4635_v6, %v2188_v33  ;;  %v2479_v28 = vadd.f32 %v2478_v16, %v2384_v2  ;;  %v2309_v0 = vadd.f32 %v2308_v29, %v2307_v55  ;;  %v2301_v51 = vrot.slane %v2300_v20, 1 }
 0x1af   : > { %v2320_v16 = vadd.f32 %v2319_v34, %v2318_v43 }
 0x1b0   : > { %v2224_v18 = vmax.f32 %v2189_v49, 0.0  ;;  %v2310_v56 = vrot.slane %v2309_v0, 1  ;;  %v2302_v59 = vadd.f32 %v2301_v51, %v2300_v20  ;;  %v2387_v49 = vrot.slane %v4853_v36, 4 }
 0x1b2   : > { %2256 = vst.msk [vmem:[%s4663_s26 + $0xf0] sm:$0xff] %vm1984_vm2, %v2224_v18  ;;  %v4890_v24 = vsel %vm1984_vm2, %v2224_v18, 0.0  ;;  %v2311_v33 = vadd.f32 %v2310_v56, %v2309_v0 }
 0x1b3   : > { %v2119_v22 = vpop.f32.mrf.mxu0  ;;  %v2480_v54 = vadd.f32 %v2479_v28, %v4890_v24  ;;  %v2413_v28 = vmul.f32 %v4803_v35, %v2302_v59 }
 0x1b4   : > { %v2120_v11 = vadd.f32 %v4635_v6, %v2119_v22  ;;  %v2379_v22 = vadd.f32 %v2378_v9, %v4792_v38 }
 0x1b5   : > { %v2496_v21 = vmul.f32 %v2480_v54, %v4803_v35  ;;  %v2388_v54 = vadd.f32 %v2387_v49, %v4853_v36 }
 0x1b6   : > { %v2201_v30 = vmax.f32 %v2120_v11, 0.0  ;;  %v2415_v11 = vmul.f32 %v4803_v35, %v2320_v16 }
 0x1b7   : > { %2498 = vst.msk [vmem:[%s4900_s30] sm:$0xff] %vm1984_vm2, %v2496_v21  ;;  %v2389_v36 = vrot.slane %v2388_v54, 2 }
 0x1b8   : > { %2233 = vst.msk [vmem:[%s4663_s26 + $0x38] sm:$0xff] %vm1984_vm2, %v2201_v30  ;;  %v2286_v31 = vsel %vm1984_vm2, %v2201_v30, 0.0 }
 0x1b9   : > { %v2287_v8 = vadd.f32 %v2286_v31, %v2285_v37  ;;  %v2483_v2 = vadd.f32 %v4820_v27, %v2286_v31  ;;  %v2390_v51 = vadd.f32 %v2389_v36, %v2388_v54 }
 0x1bb   : > { %v2143_v60 = vpop.f32.mrf.mxu1  ;;  %v2288_v61 = vrot.slane %v2287_v8, 4  ;;  %v2484_v47 = vadd.f32 %v2483_v2, %v4708_v63 }
 0x1bc   : > { %v2144_v17 = vadd.f32 %v4635_v6, %v2143_v60 }
 0x1bd   : > { %v2289_v23 = vadd.f32 %v2288_v61, %v2287_v8  ;;  %v2485_v45 = vadd.f32 %v2484_v47, %v4764_v44  ;;  %v2380_v8 = vrot.slane %v2379_v22, 2 }
 0x1be   : > { %v2209_v42 = vmax.f32 %v2144_v17, 0.0 }
 0x1bf   : > { %v2290_v40 = vrot.slane %v2289_v23, 2  ;;  %v2486_v27 = vadd.f32 %v2485_v45, %v4827_v7  ;;  %v2381_v43 = vadd.f32 %v2380_v8, %v2379_v22 }
 0x1c0   : > { %2241 = vst.msk [vmem:[%s4663_s26 + $0x78] sm:$0xff] %vm1984_vm2, %v2209_v42  ;;  %v2322_v37 = vsel %vm1984_vm2, %v2209_v42, 0.0 }
 0x1c1   : > { %v2323_v58 = vadd.f32 %v2322_v37, %v2321_v32  ;;  %v2291_v63 = vadd.f32 %v2290_v40, %v2289_v23  ;;  %v2487_v26 = vadd.f32 %v2486_v27, %v2322_v37  ;;  %v2370_v32 = vadd.f32 %v2369_v13, %v4731_v14 }
 0x1c2   : > { %v2414_v14 = vmul.f32 %v4803_v35, %v2311_v33 }
 0x1c3   : > { %v2324_v48 = vrot.slane %v2323_v58, 4  ;;  %v2292_v4 = vrot.slane %v2291_v63, 1  ;;  %v2488_v44 = vadd.f32 %v2487_v26, %v4717_v10  ;;  %v2371_v21 = vrot.slane %v2370_v32, 2 }
 0x1c5   : > { %v2325_v46 = vadd.f32 %v2324_v48, %v2323_v58  ;;  %v2293_v1 = vadd.f32 %v2292_v4, %v2291_v63  ;;  %v2489_v7 = vadd.f32 %v2488_v44, %v4780_v15  ;;  %v2372_v0 = vadd.f32 %v2371_v21, %v2370_v32 }
 0x1c6   : > { %v2382_v58 = vrot.slane %v2381_v43, 1  ;;  %v2391_v63 = vrot.slane %v2390_v51, 1 }
 0x1c7   : > { %v2326_v41 = vrot.slane %v2325_v46, 2  ;;  %v2412_v18 = vmul.f32 %v4803_v35, %v2293_v1  ;;  %v2490_v39 = vadd.f32 %v2489_v7, %v4841_v25 }
 0x1c8   : > { %v2383_v4 = vadd.f32 %v2382_v58, %v2381_v43  ;;  %v2392_v9 = vadd.f32 %v2391_v63, %v2390_v51 }
 0x1c9   : > { %v2327_v55 = vadd.f32 %v2326_v41, %v2325_v46  ;;  %v2446_v19 = vsel %vm2445_vm6, %v2412_v18, %v4835_v52 }
 0x1ca   : > { %v2167_v10 = vpop.f32.mrf.mxu2  ;;  %v2448_v25 = vsel %vm2447_vm7, %v2413_v28, %v2446_v19  ;;  %v2422_v16 = vmul.f32 %v4803_v35, %v2383_v4  ;;  %v2423_v7 = vmul.f32 %v4803_v35, %v2392_v9 }
 0x1cb   : > { %v2168_v15 = vadd.f32 %v4635_v6, %v2167_v10  ;;  %v2328_v30 = vrot.slane %v2327_v55, 1  ;;  %v2450_v5 = vsel %vm2449_vm8, %v2414_v14, %v2448_v25 }
 0x1cc   : > { %v2452_v31 = vsel %vm2451_vm9, %v2415_v11, %v2450_v5 }
 0x1cd   : > { %v2217_v38 = vmax.f32 %v2168_v15, 0.0  ;;  %v2329_v29 = vadd.f32 %v2328_v30, %v2327_v55 }
 0x1cf   : > { %2249 = vst.msk [vmem:[%s4663_s26 + $0xb8] sm:$0xff] %vm1984_vm2, %v2217_v38  ;;  %v2358_v50 = vsel %vm1984_vm2, %v2217_v38, 0.0  ;;  %v2416_v60 = vmul.f32 %v4803_v35, %v2329_v29 }
 0x1d0   : > { %v2359_v52 = vadd.f32 %v2358_v50, %v4875_v3  ;;  %v2491_v2 = vadd.f32 %v2490_v39, %v2358_v50 }
 0x1d1   : > { %v2191_v20 = vpop.f32.mrf.mxu3  ;;  %v2454_v3 = vsel %vm2453_vm10, %v2416_v60, %v2452_v31 }
 0x1d2   : > { %v2360_v61 = vrot.slane %v2359_v52, 4  ;;  %v2492_v47 = vadd.f32 %v2491_v2, %v4724_v62  ;;  %v2192_v17 = vadd.f32 %v4635_v6, %v2191_v20  ;;  %2464 = vst.msk [vmem:[%s4944_s9] sm:$0xff] %vm1984_vm2, %v2454_v3  ;;  %v2373_v6 = vrot.slane %v2372_v0, 1 }
 0x1d4   : > { %v2361_v23 = vadd.f32 %v2360_v61, %v2359_v52  ;;  %v2225_v42 = vmax.f32 %v2192_v17, 0.0  ;;  %v2493_v45 = vadd.f32 %v2492_v47, %v4787_v12  ;;  %v2374_v48 = vadd.f32 %v2373_v6, %v2372_v0 }
 0x1d6   : > { %v2362_v40 = vrot.slane %v2361_v23, 2  ;;  %2257 = vst.msk [vmem:[%s4663_s26 + $0xf8] sm:$0xff] %vm1984_vm2, %v2225_v42  ;;  %v2394_v37 = vsel %vm1984_vm2, %v2225_v42, 0.0  ;;  %v2494_v62 = vadd.f32 %v2493_v45, %v4850_v53 }
 0x1d7   : > { %v2395_v27 = vadd.f32 %v2394_v37, %v4890_v24  ;;  %v2421_v24 = vmul.f32 %v4803_v35, %v2374_v48 }
 0x1d8   : > { %v2363_v56 = vadd.f32 %v2362_v40, %v2361_v23  ;;  %v2495_v34 = vadd.f32 %v2494_v62, %v2394_v37 }
 0x1d9   : > { %v2396_v26 = vrot.slane %v2395_v27, 4 }
 0x1da   : > { %v2364_v13 = vrot.slane %v2363_v56, 1  ;;  %v2497_v12 = vmul.f32 %v2495_v34, %v4803_v35 }
 0x1db   : > { %v2397_v59 = vadd.f32 %v2396_v26, %v2395_v27 }
 0x1dc   : > { %v2365_v44 = vadd.f32 %v2364_v13, %v2363_v56  ;;  %2499 = vst.msk [vmem:[%s4900_s30 + $0x8] sm:$0xff] %vm1984_vm2, %v2497_v12 }
 0x1dd   : > { %v2398_v53 = vrot.slane %v2397_v59, 2 }
 0x1de   : > { %v2420_v46 = vmul.f32 %v4803_v35, %v2365_v44 }
 0x1df   : > { %v2399_v33 = vadd.f32 %v2398_v53, %v2397_v59 }
 0x1e0   : > { %v2457_v1 = vsel %vm2445_vm6, %v2420_v46, %v4864_v57 }
 0x1e1   : > { %v2458_v32 = vsel %vm2447_vm7, %v2421_v24, %v2457_v1  ;;  %v2400_v49 = vrot.slane %v2399_v33, 1 }
 0x1e2   : > { %v2459_v41 = vsel %vm2449_vm8, %v2422_v16, %v2458_v32 }
 0x1e3   : > { %v2401_v28 = vadd.f32 %v2400_v49, %v2399_v33  ;;  %v2460_v18 = vsel %vm2451_vm9, %v2423_v7, %v2459_v41 }
 0x1e5   : > { %v2424_v10 = vmul.f32 %v4803_v35, %v2401_v28 }
 0x1e7   : > { %v2461_v39 = vsel %vm2453_vm10, %v2424_v10, %v2460_v18 }
 0x1e8   : > { %2465 = vst.msk [vmem:[%s4944_s9 + $0x8] sm:$0xff] %vm1984_vm2, %v2461_v39 }
 0x1e9 PF: > { %s17_s21 = sadd.s32 1, %s2746_s21  }
 0x1ea   : > { %p14_p4 = scmp.ge.s32.totalorder %s17_s21, 4  }
 0x1ec   :  { %16 = sbr.rel (!%p14_p4) target bundleno = 1 (0x1), region = 90 }

</bundles_post_ra>
